<compile_context>
chip_gen: v7x
topology: tpu7x:2x2x1
jax: 0.10.0
libtpu: 0.0.40
codegen_flags: <defaults>
</compile_context>

<pallas_src>
import numpy as np
import jax
import jax.numpy as jnp
from jax import lax
from jax.experimental import pallas as pl
from jax.experimental.pallas import tpu as pltpu


# ----------------------------- Pallas kernels ------------------------------

def _pw_kernel(x_ref, w_ref, s_ref, b_ref, o_ref):
    # 1x1x1 conv == matmul over channels, fused BN(scale,bias) + ReLU.
    y = jnp.dot(x_ref[...], w_ref[...], preferred_element_type=jnp.float32)
    y = y * s_ref[...] + b_ref[...]
    o_ref[...] = jnp.maximum(y, 0.0).astype(o_ref.dtype)


def _spatial_kernel(x_ref, w_ref, s_ref, b_ref, o_ref):
    # (1,3,3) conv, pad=1, as 9 matmuls over F frames at once.
    # x_ref: (F, H+2, W+2, Cin) (spatially zero-padded), o_ref: (F, H, W, Cout)
    F, H, W, Cout = o_ref.shape
    Cin = x_ref.shape[-1]
    acc = jnp.zeros((F * H * W, Cout), jnp.float32)
    for kh in range(3):
        for kw in range(3):
            xs = x_ref[:, kh:kh + H, kw:kw + W, :].reshape(F * H * W, Cin)
            acc += jnp.dot(xs, w_ref[kh, kw], preferred_element_type=jnp.float32)
    y = acc * s_ref[...] + b_ref[...]
    o_ref[...] = jnp.maximum(y, 0.0).reshape(F, H, W, Cout).astype(o_ref.dtype)


def _temporal_kernel(x_ref, w_ref, s_ref, b_ref, o_ref, acc_ref):
    # (3,1,1) conv, pad=1, as 3 big matmuls over all frames (no wrapper pad):
    #   y[d] = x[d] @ w[1]  +  x[d-1] @ w[0] (d>=1)  +  x[d+1] @ w[2] (d<=D-2)
    # x_ref: (1, D, HW, C); acc_ref: VMEM scratch (D, HW, C) f32.
    _, D, HW, C = x_ref.shape
    acc_ref[...] = jnp.dot(
        x_ref[0].reshape(D * HW, C), w_ref[1],
        preferred_element_type=jnp.float32).reshape(D, HW, C)
    lo = jnp.dot(x_ref[0, 0:D - 1].reshape((D - 1) * HW, C), w_ref[0],
                 preferred_element_type=jnp.float32)
    acc_ref[1:D] += lo.reshape(D - 1, HW, C)
    hi = jnp.dot(x_ref[0, 1:D].reshape((D - 1) * HW, C), w_ref[2],
                 preferred_element_type=jnp.float32)
    acc_ref[0:D - 1] += hi.reshape(D - 1, HW, C)
    y = acc_ref[...] * s_ref[...] + b_ref[...]
    o_ref[0] = jnp.maximum(y, 0.0).astype(o_ref.dtype)


def _pool_pw_kernel(x_ref, w_ref, s_ref, b_ref, o_ref):
    # Separable MaxPool3d(3, stride=1, pad=1) fused with 1x1x1 conv + BN + ReLU.
    # x_ref: (1, D+2, H+2, W+2, Cin), padded with -inf.
    _, D, H, W, Cout = o_ref.shape
    Cin = x_ref.shape[-1]
    xv = x_ref[0]                                                   # (D+2,H+2,W+2,C)
    md = jnp.maximum(jnp.maximum(xv[0:D], xv[1:D + 1]), xv[2:D + 2])          # d-max
    mh = jnp.maximum(jnp.maximum(md[:, 0:H], md[:, 1:H + 1]), md[:, 2:H + 2])  # h-max
    mw = jnp.maximum(jnp.maximum(mh[:, :, 0:W], mh[:, :, 1:W + 1]),
                     mh[:, :, 2:W + 2])                                        # w-max
    y = jnp.dot(mw.reshape(D * H * W, Cin), w_ref[...],
                preferred_element_type=jnp.float32)
    y = y * s_ref[...] + b_ref[...]
    o_ref[...] = jnp.maximum(y, 0.0).reshape(1, D, H, W, Cout).astype(o_ref.dtype)


# ------------------------------ pallas_call wrappers ------------------------

def pointwise_conv_bn_relu(x2d, w, scale, bias):
    # x2d: (M, Cin); w: (Cin, Cout); scale/bias: (1, Cout)
    M, Cin = x2d.shape
    Cout = w.shape[1]
    TM = M if M <= 1024 else 1024
    grid = (pl.cdiv(M, TM),)
    return pl.pallas_call(
        _pw_kernel,
        out_shape=jax.ShapeDtypeStruct((M, Cout), x2d.dtype),
        grid=grid,
        in_specs=[pl.BlockSpec((TM, Cin), lambda i: (i, 0)),
                  pl.BlockSpec((Cin, Cout), lambda i: (0, 0)),
                  pl.BlockSpec((1, Cout), lambda i: (0, 0)),
                  pl.BlockSpec((1, Cout), lambda i: (0, 0))],
        out_specs=pl.BlockSpec((TM, Cout), lambda i: (i, 0)),
        compiler_params=pltpu.CompilerParams(dimension_semantics=("parallel",)),
    )(x2d, w, scale, bias)


def spatial_conv_bn_relu(x, w, scale, bias):
    # x: (N, D, H, W, Cin); w: (3, 3, Cin, Cout)
    N, D, H, W, Cin = x.shape
    Cout = w.shape[-1]
    ND = N * D
    xp = jnp.pad(x, ((0, 0), (0, 0), (1, 1), (1, 1), (0, 0)))
    xp = xp.reshape(ND, H + 2, W + 2, Cin)
    # F frames per grid step so the matmul M dim is >= ~256 rows.
    F = min(ND, max(1, pl.cdiv(256, H * W)))
    grid = (pl.cdiv(ND, F),)
    out = pl.pallas_call(
        _spatial_kernel,
        out_shape=jax.ShapeDtypeStruct((ND, H, W, Cout), x.dtype),
        grid=grid,
        in_specs=[pl.BlockSpec((F, H + 2, W + 2, Cin), lambda i: (i, 0, 0, 0)),
                  pl.BlockSpec((3, 3, Cin, Cout), lambda i: (0, 0, 0, 0)),
                  pl.BlockSpec((1, Cout), lambda i: (0, 0)),
                  pl.BlockSpec((1, Cout), lambda i: (0, 0))],
        out_specs=pl.BlockSpec((F, H, W, Cout), lambda i: (i, 0, 0, 0)),
        compiler_params=pltpu.CompilerParams(dimension_semantics=("parallel",)),
    )(xp, w, scale, bias)
    return out.reshape(N, D, H, W, Cout)


def temporal_conv_bn_relu(x, w, scale, bias):
    # x: (N, D, H, W, C); w: (3, C, C).  No wrapper pad; halo handled in-kernel.
    N, D, H, W, C = x.shape
    HW = H * W
    xr = x.reshape(N, D, HW, C)
    out = pl.pallas_call(
        _temporal_kernel,
        out_shape=jax.ShapeDtypeStruct((N, D, HW, C), x.dtype),
        grid=(N,),
        in_specs=[pl.BlockSpec((1, D, HW, C), lambda i: (i, 0, 0, 0)),
                  pl.BlockSpec((3, C, C), lambda i: (0, 0, 0)),
                  pl.BlockSpec((1, C), lambda i: (0, 0)),
                  pl.BlockSpec((1, C), lambda i: (0, 0))],
        out_specs=pl.BlockSpec((1, D, HW, C), lambda i: (i, 0, 0, 0)),
        scratch_shapes=[pltpu.VMEM((D, HW, C), jnp.float32)],
        compiler_params=pltpu.CompilerParams(dimension_semantics=("parallel",)),
    )(xr, w, scale, bias)
    return out.reshape(N, D, H, W, C)


def maxpool_pointwise_bn_relu(x, w, scale, bias):
    # x: (N, D, H, W, Cin); w: (Cin, Cout)
    N, D, H, W, Cin = x.shape
    Cout = w.shape[-1]
    xp = jnp.pad(x, ((0, 0), (1, 1), (1, 1), (1, 1), (0, 0)),
                 constant_values=-jnp.inf)
    return pl.pallas_call(
        _pool_pw_kernel,
        out_shape=jax.ShapeDtypeStruct((N, D, H, W, Cout), x.dtype),
        grid=(N,),
        in_specs=[pl.BlockSpec((1, D + 2, H + 2, W + 2, Cin),
                               lambda i: (i, 0, 0, 0, 0)),
                  pl.BlockSpec((Cin, Cout), lambda i: (0, 0)),
                  pl.BlockSpec((1, Cout), lambda i: (0, 0)),
                  pl.BlockSpec((1, Cout), lambda i: (0, 0))],
        out_specs=pl.BlockSpec((1, D, H, W, Cout), lambda i: (i, 0, 0, 0, 0)),
        compiler_params=pltpu.CompilerParams(dimension_semantics=("parallel",)),
    )(xp, w, scale, bias)


# ------------------------------ Mixed_4d forward ----------------------------

def mixed_4d(x_ncdhw, p):
    N, C, D, H, W = x_ncdhw.shape
    assert C == 512
    x = jnp.transpose(x_ncdhw, (0, 2, 3, 4, 1))  # NDHWC
    M = N * D * H * W
    x2d = x.reshape(M, C)

    # Fused 1x1x1 projections for branches 0 / 1 / 2: x is read from HBM once.
    c0, c1, c2 = 128, 128, 24
    wcat = jnp.concatenate([p['w0'], p['w1a'], p['w2a']], axis=1)          # (512,280)
    scat = jnp.concatenate([p['bn0'][0], p['bn1a'][0], p['bn2a'][0]], axis=1)
    bcat = jnp.concatenate([p['bn0'][1], p['bn1a'][1], p['bn2a'][1]], axis=1)
    y = pointwise_conv_bn_relu(x2d, wcat, scat, bcat)                      # (M, 280)

    x0 = y[:, :c0].reshape(N, D, H, W, c0)                                 # 128
    b1 = y[:, c0:c0 + c1].reshape(N, D, H, W, c1)                          # 128
    b2 = y[:, c0 + c1:c0 + c1 + c2].reshape(N, D, H, W, c2)                # 24

    b1 = spatial_conv_bn_relu(b1, p['w1s'], *p['bn1s'])                    # 256
    b1 = temporal_conv_bn_relu(b1, p['w1t'], *p['bn1t'])                   # 256
    b2 = spatial_conv_bn_relu(b2, p['w2s'], *p['bn2s'])                    # 64
    b2 = temporal_conv_bn_relu(b2, p['w2t'], *p['bn2t'])                   # 64
    b3 = maxpool_pointwise_bn_relu(x, p['w3'], *p['bn3'])                  # 64

    out = jnp.concatenate([x0, b1, b2, b3], axis=-1)                       # 512
    return jnp.transpose(out, (0, 4, 1, 2, 3))  # back to NCDHW


# ------------------------------ pure-JAX reference --------------------------

def _bn_relu(y, s, b):
    return jnp.maximum(y * s + b, 0.0)


def mixed_4d_reference(x_ncdhw, p):
    x = jnp.transpose(x_ncdhw, (0, 2, 3, 4, 1))
    dn = ('NDHWC', 'DHWIO', 'NDHWC')

    def conv(xx, w, pad):
        return lax.conv_general_dilated(xx, w, (1, 1, 1), pad,
                                        dimension_numbers=dn)
    p0 = [(0, 0)] * 3
    ps = [(0, 0), (1, 1), (1, 1)]
    pt = [(1, 1), (0, 0), (0, 0)]

    x0 = _bn_relu(conv(x, p['w0'].reshape(1, 1, 1, 512, 128), p0), *p['bn0'])
    b1 = _bn_relu(conv(x, p['w1a'].reshape(1, 1, 1, 512, 128), p0), *p['bn1a'])
    b1 = _bn_relu(conv(b1, p['w1s'].reshape(1, 3, 3, 128, 256), ps), *p['bn1s'])
    b1 = _bn_relu(conv(b1, p['w1t'].reshape(3, 1, 1, 256, 256), pt), *p['bn1t'])
    b2 = _bn_relu(conv(x, p['w2a'].reshape(1, 1, 1, 512, 24), p0), *p['bn2a'])
    b2 = _bn_relu(conv(b2, p['w2s'].reshape(1, 3, 3, 24, 64), ps), *p['bn2s'])
    b2 = _bn_relu(conv(b2, p['w2t'].reshape(3, 1, 1, 64, 64), pt), *p['bn2t'])
    mp = lax.reduce_window(x, -jnp.inf, lax.max, (1, 3, 3, 3, 1),
                           (1, 1, 1, 1, 1),
                           [(0, 0), (1, 1), (1, 1), (1, 1), (0, 0)])
    b3 = _bn_relu(conv(mp, p['w3'].reshape(1, 1, 1, 512, 64), p0), *p['bn3'])
    out = jnp.concatenate([x0, b1, b2, b3], axis=-1)
    return jnp.transpose(out, (0, 4, 1, 2, 3))


# ------------------------------ parameter init ------------------------------

def init_w(key, shape, fan_in):
    return (jax.random.normal(key, shape, jnp.float32)
            * np.float32(np.sqrt(2.0 / fan_in)))


def init_bn(key, c, eps=1e-3):
    k1, k2, k3, k4 = jax.random.split(key, 4)
    gamma = 1.0 + 0.1 * jax.random.normal(k1, (c,), jnp.float32)
    beta = 0.1 * jax.random.normal(k2, (c,), jnp.float32)
    mean = 0.1 * jax.random.normal(k3, (c,), jnp.float32)
    var = 0.5 + 0.5 * jax.random.uniform(k4, (c,), jnp.float32)
    scale = gamma / jnp.sqrt(var + eps)
    bias = beta - mean * scale
    return scale.reshape(1, c), bias.reshape(1, c)


if __name__ == "__main__":
    key = jax.random.PRNGKey(0)
    kx, kp = jax.random.split(key)
    ks = iter(jax.random.split(kp, 20))

    # Small but module-consistent shapes: input channels must be 512 for Mixed_4d.
    N, Cin, D, H, W = 2, 512, 4, 8, 8
    x = jax.random.normal(kx, (N, Cin, D, H, W), jnp.float32)

    params = {
        'w0':  init_w(next(ks), (512, 128), 512),         'bn0':  init_bn(next(ks), 128),
        'w1a': init_w(next(ks), (512, 128), 512),         'bn1a': init_bn(next(ks), 128),
        'w1s': init_w(next(ks), (3, 3, 128, 256), 1152),  'bn1s': init_bn(next(ks), 256),
        'w1t': init_w(next(ks), (3, 256, 256), 768),      'bn1t': init_bn(next(ks), 256),
        'w2a': init_w(next(ks), (512, 24), 512),          'bn2a': init_bn(next(ks), 24),
        'w2s': init_w(next(ks), (3, 3, 24, 64), 216),     'bn2s': init_bn(next(ks), 64),
        'w2t': init_w(next(ks), (3, 64, 64), 192),        'bn2t': init_bn(next(ks), 64),
        'w3':  init_w(next(ks), (512, 64), 512),          'bn3':  init_bn(next(ks), 64),
    }

    out = jax.block_until_ready(mixed_4d(x, params))
    assert out.shape == (N, 128 + 256 + 64 + 64, D, H, W), out.shape

    ref = jax.block_until_ready(mixed_4d_reference(x, params))
    np.testing.assert_allclose(np.asarray(out), np.asarray(ref),
                               rtol=5e-2, atol=5e-2)
    print("KERNEL_OK")
</pallas_src>

<mosaic_0001>
module attributes {stable_mosaic.version = 11 : i64} {
  func.func @_pw_kernel(%arg0: i32, %arg1: memref<512x512xf32, #tpu.memory_space<vmem>>, %arg2: memref<512x280xf32, #tpu.memory_space<vmem>>, %arg3: memref<1x280xf32, #tpu.memory_space<vmem>>, %arg4: memref<1x280xf32, #tpu.memory_space<vmem>>, %arg5: memref<512x280xf32, #tpu.memory_space<vmem>>) attributes {dimension_semantics = [#tpu.dimension_semantics<parallel>], iteration_bounds = array<i64: 1>, scalar_prefetch = 0 : i64, scratch_operands = 0 : i64, tpu.core_type = #tpu.core_type<tc>, window_params = [{transform_indices = @transform_0, window_bounds = array<i64: 512, 512>}, {pipeline_mode = #tpu.pipeline_mode<synchronous>, transform_indices = @transform_1, window_bounds = array<i64: 512, 280>}, {pipeline_mode = #tpu.pipeline_mode<synchronous>, transform_indices = @transform_2, window_bounds = array<i64: 1, 280>}, {pipeline_mode = #tpu.pipeline_mode<synchronous>, transform_indices = @transform_3, window_bounds = array<i64: 1, 280>}, {transform_indices = @transform_4, window_bounds = array<i64: 512, 280>}]} {
    %c0 = arith.constant 0 : index
    %c0_0 = arith.constant 0 : index
    %0 = vector.load %arg1[%c0, %c0_0] : memref<512x512xf32, #tpu.memory_space<vmem>>, vector<512x512xf32>
    %c0_1 = arith.constant 0 : index
    %c0_2 = arith.constant 0 : index
    %1 = vector.load %arg2[%c0_1, %c0_2] : memref<512x280xf32, #tpu.memory_space<vmem>>, vector<512x280xf32>
    %cst = arith.constant dense<0.000000e+00> : vector<512x280xf32>
    %2 = tpu.matmul %0, %1, %cst {dimension_numbers = #tpu.dot_dimension_numbers<[1], [0], [0], [1], [0, 0, 1, 1], [], []>} : vector<512x512xf32>, vector<512x280xf32>, vector<512x280xf32> -> vector<512x280xf32>
    %c0_3 = arith.constant 0 : index
    %c0_4 = arith.constant 0 : index
    %3 = vector.load %arg3[%c0_3, %c0_4] : memref<1x280xf32, #tpu.memory_space<vmem>>, vector<1x280xf32>
    %4 = vector.broadcast %3 : vector<1x280xf32> to vector<512x280xf32>
    %5 = arith.mulf %2, %4 : vector<512x280xf32>
    %c0_5 = arith.constant 0 : index
    %c0_6 = arith.constant 0 : index
    %6 = vector.load %arg4[%c0_5, %c0_6] : memref<1x280xf32, #tpu.memory_space<vmem>>, vector<1x280xf32>
    %7 = vector.broadcast %6 : vector<1x280xf32> to vector<512x280xf32>
    %8 = arith.addf %5, %7 : vector<512x280xf32>
    %cst_7 = arith.constant 0.000000e+00 : f32
    %9 = vector.broadcast %cst_7 : f32 to vector<512x280xf32>
    %10 = arith.maximumf %8, %9 : vector<512x280xf32>
    %c0_8 = arith.constant 0 : index
    %c0_9 = arith.constant 0 : index
    %11 = vector.load %arg5[%c0_8, %c0_9] : memref<512x280xf32, #tpu.memory_space<vmem>>, vector<512x280xf32>
    tpu.vector_store %arg5[%c0_8, %c0_9], %10 {strides = array<i32>} : memref<512x280xf32, #tpu.memory_space<vmem>>, vector<512x280xf32>,
    return
  }
  func.func @transform_0(%arg0: i32) -> (i32, i32) {
    %c0_i32 = arith.constant 0 : i32
    %c0_i32_0 = arith.constant 0 : i32
    return %arg0, %c0_i32 : i32, i32
  }
  func.func @transform_1(%arg0: i32) -> (i32, i32) {
    %c0_i32 = arith.constant 0 : i32
    %c0_i32_0 = arith.constant 0 : i32
    %c0_i32_1 = arith.constant 0 : i32
    return %c0_i32, %c0_i32_0 : i32, i32
  }
  func.func @transform_2(%arg0: i32) -> (i32, i32) {
    %c0_i32 = arith.constant 0 : i32
    %c0_i32_0 = arith.constant 0 : i32
    %c0_i32_1 = arith.constant 0 : i32
    return %c0_i32, %c0_i32_0 : i32, i32
  }
  func.func @transform_3(%arg0: i32) -> (i32, i32) {
    %c0_i32 = arith.constant 0 : i32
    %c0_i32_0 = arith.constant 0 : i32
    %c0_i32_1 = arith.constant 0 : i32
    return %c0_i32, %c0_i32_0 : i32, i32
  }
  func.func @transform_4(%arg0: i32) -> (i32, i32) {
    %c0_i32 = arith.constant 0 : i32
    %c0_i32_0 = arith.constant 0 : i32
    return %arg0, %c0_i32 : i32, i32
  }
}

</mosaic_0001>

<bundles_post_ra>
// kernel: tpu_custom_call.1
= control target key start
LH: loop header
LB: loop body
LE: loop exit
PB: predicated region body
PF: predicated region fallthrough
CT: control target
= control target key end

     0   :  { %v3421_v0 = vmov 0.0|0.0   ;;  %vm2745_vm0 = vcmask 195584   ;;  %s5865_s1 = inlined_call_operand.vmem [shape: f32[512,280], index: 1, kind: input, shape index: {}]   ;;  %s5866_s0 = inlined_call_operand.vmem [shape: f32[512,512], index: 0, kind: input, shape index: {}]   ;;  %s5867_s2 = inlined_call_operand.vmem [shape: f32[1,280], index: 2, kind: input, shape index: {}]   ;;  %s5868_s3 = inlined_call_operand.vmem [shape: f32[1,280], index: 3, kind: input, shape index: {}]   ;;  %s5869_s4 = inlined_call_operand.vmem [shape: f32[512,280], index: 4, kind: output, shape index: {}]  }
   0x1   :  { %3068 = vmatprep.subr.bf16.mxu1 %v3421_v0  ;;  %v274_v1 = vld [vmem:[%s5865_s1 + $0x8] sm:$0xff]  ;;  %v277_v2 = vld [vmem:[%s5865_s1 + $0x20] sm:$0xff]  ;;  %v275_v3 = vld [vmem:[%s5865_s1 + $0x10] sm:$0xff] }
   0x2   :  { %v2940_v4 = vpack.c.bf16 %v277_v2, %v274_v1  ;;  %v278_v5 = vld [vmem:[%s5865_s1 + $0x28] sm:$0xff]  ;;  %v273_v6 = vld [vmem:[%s5865_s1] sm:$0xff]  ;;  %v276_v7 = vld [vmem:[%s5865_s1 + $0x18] sm:$0xff] }
   0x3   :  { %v3069_v8 = vpack.c.bf16 %v278_v5, %v275_v3  ;;  %v2942_v9 = vpack.c.bf16 %v276_v7, %v273_v6  ;;  %v280_v10 = vld [vmem:[%s5865_s1 + $0x38] sm:$0xff]  ;;  %v283_v11 = vld [vmem:[%s5865_s1 + $0x50] sm:$0xff]  ;;  %v281_v12 = vld [vmem:[%s5865_s1 + $0x40] sm:$0xff] }
   0x4   :  { %2941 = vmatprep.subr.bf16.mxu0 %v2940_v4  ;;  %v2944_v13 = vpack.c.bf16 %v283_v11, %v280_v10  ;;  %v284_v14 = vld [vmem:[%s5865_s1 + $0x58] sm:$0xff]  ;;  %v279_v15 = vld [vmem:[%s5865_s1 + $0x30] sm:$0xff]  ;;  %v282_v16 = vld [vmem:[%s5865_s1 + $0x48] sm:$0xff] }
   0x5   :  { %3070 = vmatpush1.bf16.msra.mxu1 %v3069_v8  ;;  %2943 = vmatpush1.bf16.msra.mxu0 %v2942_v9  ;;  %v3072_v17 = vpack.c.bf16 %v284_v14, %v281_v12  ;;  %v2946_v18 = vpack.c.bf16 %v282_v16, %v279_v15  ;;  %v286_v19 = vld [vmem:[%s5865_s1 + $0x68] sm:$0xff]  ;;  %v289_v20 = vld [vmem:[%s5865_s1 + $0x80] sm:$0xff]  ;;  %v287_v21 = vld [vmem:[%s5865_s1 + $0x70] sm:$0xff] }
   0x6   :  { %3071 = vmatprep.subr.bf16.mxu1 %v3421_v0  ;;  %2945 = vmatprep.subr.bf16.mxu0 %v2944_v13  ;;  %v2948_v22 = vpack.c.bf16 %v289_v20, %v286_v19  ;;  %v290_v23 = vld [vmem:[%s5865_s1 + $0x88] sm:$0xff]  ;;  %v285_v24 = vld [vmem:[%s5865_s1 + $0x60] sm:$0xff]  ;;  %v288_v25 = vld [vmem:[%s5865_s1 + $0x78] sm:$0xff] }
   0x7   :  { %v292_v26 = vld [vmem:[%s5865_s1 + $0x98] sm:$0xff]  ;;  %v295_v27 = vld [vmem:[%s5865_s1 + $0xb0] sm:$0xff]  ;;  %v3075_v28 = vpack.c.bf16 %v290_v23, %v287_v21  ;;  %v2950_v29 = vpack.c.bf16 %v288_v25, %v285_v24  ;;  %v293_v30 = vld [vmem:[%s5865_s1 + $0xa0] sm:$0xff] }
   0x8   :  { %v2952_v31 = vpack.c.bf16 %v295_v27, %v292_v26  ;;  %v296_v32 = vld [vmem:[%s5865_s1 + $0xb8] sm:$0xff]  ;;  %v291_v33 = vld [vmem:[%s5865_s1 + $0x90] sm:$0xff]  ;;  %v294_v34 = vld [vmem:[%s5865_s1 + $0xa8] sm:$0xff] }
   0x9   :  { %3073 = vmatpush1.bf16.msra.mxu1 %v3072_v17  ;;  %2947 = vmatpush1.bf16.msra.mxu0 %v2946_v18  ;;  %v298_v35 = vld [vmem:[%s5865_s1 + $0xc8] sm:$0xff]  ;;  %v301_v36 = vld [vmem:[%s5865_s1 + $0xe0] sm:$0xff]  ;;  %v3078_v37 = vpack.c.bf16 %v296_v32, %v293_v30  ;;  %v2954_v38 = vpack.c.bf16 %v294_v34, %v291_v33  ;;  %v299_v39 = vld [vmem:[%s5865_s1 + $0xd0] sm:$0xff] }
   0xa   :  { %3074 = vmatprep.subr.bf16.mxu1 %v3421_v0  ;;  %2949 = vmatprep.subr.bf16.mxu0 %v2948_v22  ;;  %v2956_v40 = vpack.c.bf16 %v301_v36, %v298_v35  ;;  %v302_v41 = vld [vmem:[%s5865_s1 + $0xe8] sm:$0xff]  ;;  %v297_v42 = vld [vmem:[%s5865_s1 + $0xc0] sm:$0xff]  ;;  %v300_v43 = vld [vmem:[%s5865_s1 + $0xd8] sm:$0xff] }
   0xb   :  { %v304_v44 = vld [vmem:[%s5865_s1 + $0xf8] sm:$0xff]  ;;  %v307_v45 = vld [vmem:[%s5865_s1 + $0x110] sm:$0xff]  ;;  %v3081_v46 = vpack.c.bf16 %v302_v41, %v299_v39  ;;  %v2958_v47 = vpack.c.bf16 %v300_v43, %v297_v42  ;;  %v305_v48 = vld [vmem:[%s5865_s1 + $0x100] sm:$0xff] }
   0xc   :  { %v2960_v49 = vpack.c.bf16 %v307_v45, %v304_v44  ;;  %v308_v50 = vld [vmem:[%s5865_s1 + $0x118] sm:$0xff]  ;;  %v303_v51 = vld [vmem:[%s5865_s1 + $0xf0] sm:$0xff]  ;;  %v306_v52 = vld [vmem:[%s5865_s1 + $0x108] sm:$0xff] }
   0xd   :  { %3076 = vmatpush1.bf16.msra.mxu1 %v3075_v28  ;;  %2951 = vmatpush1.bf16.msra.mxu0 %v2950_v29  ;;  %v310_v53 = vld [vmem:[%s5865_s1 + $0x128] sm:$0xff]  ;;  %v313_v54 = vld [vmem:[%s5865_s1 + $0x140] sm:$0xff]  ;;  %v3084_v55 = vpack.c.bf16 %v308_v50, %v305_v48  ;;  %v2962_v56 = vpack.c.bf16 %v306_v52, %v303_v51  ;;  %v311_v57 = vld [vmem:[%s5865_s1 + $0x130] sm:$0xff] }
   0xe   :  { %3077 = vmatprep.subr.bf16.mxu1 %v3421_v0  ;;  %2953 = vmatprep.subr.bf16.mxu0 %v2952_v31  ;;  %v2964_v58 = vpack.c.bf16 %v313_v54, %v310_v53  ;;  %v314_v59 = vld [vmem:[%s5865_s1 + $0x148] sm:$0xff]  ;;  %v309_v60 = vld [vmem:[%s5865_s1 + $0x120] sm:$0xff]  ;;  %v312_v61 = vld [vmem:[%s5865_s1 + $0x138] sm:$0xff] }
   0xf   :  { %v316_v62 = vld [vmem:[%s5865_s1 + $0x158] sm:$0xff]  ;;  %v319_v63 = vld [vmem:[%s5865_s1 + $0x170] sm:$0xff]  ;;  %v3087_v1 = vpack.c.bf16 %v314_v59, %v311_v57  ;;  %v2966_v2 = vpack.c.bf16 %v312_v61, %v309_v60  ;;  %v317_v3 = vld [vmem:[%s5865_s1 + $0x160] sm:$0xff] }
  0x10   :  { %v2968_v4 = vpack.c.bf16 %v319_v63, %v316_v62  ;;  %v320_v5 = vld [vmem:[%s5865_s1 + $0x178] sm:$0xff]  ;;  %v315_v6 = vld [vmem:[%s5865_s1 + $0x150] sm:$0xff]  ;;  %v318_v7 = vld [vmem:[%s5865_s1 + $0x168] sm:$0xff] }
  0x11   :  { %3079 = vmatpush1.bf16.msra.mxu1 %v3078_v37  ;;  %2955 = vmatpush1.bf16.msra.mxu0 %v2954_v38  ;;  %v322_v8 = vld [vmem:[%s5865_s1 + $0x188] sm:$0xff]  ;;  %v325_v9 = vld [vmem:[%s5865_s1 + $0x1a0] sm:$0xff]  ;;  %v3090_v10 = vpack.c.bf16 %v320_v5, %v317_v3  ;;  %v2970_v11 = vpack.c.bf16 %v318_v7, %v315_v6  ;;  %v323_v12 = vld [vmem:[%s5865_s1 + $0x190] sm:$0xff] }
  0x12   :  { %3080 = vmatprep.subr.bf16.mxu1 %v3421_v0  ;;  %2957 = vmatprep.subr.bf16.mxu0 %v2956_v40  ;;  %v2972_v13 = vpack.c.bf16 %v325_v9, %v322_v8  ;;  %v326_v14 = vld [vmem:[%s5865_s1 + $0x1a8] sm:$0xff]  ;;  %v321_v15 = vld [vmem:[%s5865_s1 + $0x180] sm:$0xff]  ;;  %v324_v16 = vld [vmem:[%s5865_s1 + $0x198] sm:$0xff] }
  0x13   :  { %v328_v17 = vld [vmem:[%s5865_s1 + $0x1b8] sm:$0xff]  ;;  %v331_v18 = vld [vmem:[%s5865_s1 + $0x1d0] sm:$0xff]  ;;  %v3093_v19 = vpack.c.bf16 %v326_v14, %v323_v12  ;;  %v2974_v20 = vpack.c.bf16 %v324_v16, %v321_v15  ;;  %v329_v21 = vld [vmem:[%s5865_s1 + $0x1c0] sm:$0xff] }
  0x14   :  { %v18_v22 = vld [vmem:[%s5866_s0 + $0x8] sm:$0xff]  ;;  %v2976_v23 = vpack.c.bf16 %v331_v18, %v328_v17  ;;  %v332_v24 = vld [vmem:[%s5865_s1 + $0x1d8] sm:$0xff]  ;;  %v327_v25 = vld [vmem:[%s5865_s1 + $0x1b0] sm:$0xff] }
  0x15   :  { %3082 = vmatpush1.bf16.msra.mxu1 %v3081_v46  ;;  %2959 = vmatpush1.bf16.msra.mxu0 %v2958_v47  ;;  %v330_v26 = vld [vmem:[%s5865_s1 + $0x1c8] sm:$0xff]  ;;  %v337_v28 = vld [vmem:[%s5865_s1 + $0x200] sm:$0xff]  ;;  %v3096_v29 = vpack.c.bf16 %v332_v24, %v329_v21  ;;  %v335_v31 = vld [vmem:[%s5865_s1 + $0x1f0] sm:$0xff] }
  0x16   :  { %3083 = vmatprep.subr.bf16.mxu1 %v3421_v0  ;;  %2961 = vmatprep.subr.bf16.mxu0 %v2960_v49  ;;  %v334_v27 = vld [vmem:[%s5865_s1 + $0x1e8] sm:$0xff]  ;;  %v2978_v30 = vpack.c.bf16 %v330_v26, %v327_v25  ;;  %v333_v34 = vld [vmem:[%s5865_s1 + $0x1e0] sm:$0xff]  ;;  %v336_v35 = vld [vmem:[%s5865_s1 + $0x1f8] sm:$0xff] }
  0x17   :  { %1427 = vmatprep.mubr.f32.mxu1 %v18_v22  ;;  %529 = vmatprep.mubr.f32.mxu0 %v18_v22  ;;  %v2980_v32 = vpack.c.bf16 %v337_v28, %v334_v27  ;;  %v338_v33 = vld [vmem:[%s5865_s1 + $0x208] sm:$0xff]  ;;  %v340_v36 = vld [vmem:[%s5865_s1 + $0x218] sm:$0xff]  ;;  %v343_v37 = vld [vmem:[%s5865_s1 + $0x230] sm:$0xff]  ;;  %v2982_v39 = vpack.c.bf16 %v336_v35, %v333_v34 }
  0x18   :  { %v3099_v38 = vpack.c.bf16 %v338_v33, %v335_v31  ;;  %v341_v40 = vld [vmem:[%s5865_s1 + $0x220] sm:$0xff]  ;;  %v2984_v41 = vpack.c.bf16 %v343_v37, %v340_v36  ;;  %v344_v42 = vld [vmem:[%s5865_s1 + $0x238] sm:$0xff]  ;;  %v339_v43 = vld [vmem:[%s5865_s1 + $0x210] sm:$0xff] }
  0x19   :  { %3085 = vmatpush1.bf16.msra.mxu1 %v3084_v55  ;;  %2963 = vmatpush1.bf16.msra.mxu0 %v2962_v56  ;;  %v342_v44 = vld [vmem:[%s5865_s1 + $0x228] sm:$0xff]  ;;  %v349_v46 = vld [vmem:[%s5865_s1 + $0x260] sm:$0xff]  ;;  %v3102_v47 = vpack.c.bf16 %v344_v42, %v341_v40  ;;  %v347_v49 = vld [vmem:[%s5865_s1 + $0x250] sm:$0xff] }
  0x1a   :  { %3086 = vmatprep.subr.bf16.mxu1 %v3421_v0  ;;  %2965 = vmatprep.subr.bf16.mxu0 %v2964_v58  ;;  %v346_v45 = vld [vmem:[%s5865_s1 + $0x248] sm:$0xff]  ;;  %v2986_v48 = vpack.c.bf16 %v342_v44, %v339_v43  ;;  %v345_v52 = vld [vmem:[%s5865_s1 + $0x240] sm:$0xff]  ;;  %v348_v53 = vld [vmem:[%s5865_s1 + $0x258] sm:$0xff] }
  0x1b   :  { %v2988_v50 = vpack.c.bf16 %v349_v46, %v346_v45  ;;  %v350_v51 = vld [vmem:[%s5865_s1 + $0x268] sm:$0xff]  ;;  %v352_v54 = vld [vmem:[%s5865_s1 + $0x278] sm:$0xff]  ;;  %v355_v55 = vld [vmem:[%s5865_s1 + $0x290] sm:$0xff]  ;;  %v2990_v57 = vpack.c.bf16 %v348_v53, %v345_v52 }
  0x1c   :  { %v3105_v56 = vpack.c.bf16 %v350_v51, %v347_v49  ;;  %v353_v58 = vld [vmem:[%s5865_s1 + $0x280] sm:$0xff]  ;;  %v2992_v59 = vpack.c.bf16 %v355_v55, %v352_v54  ;;  %v356_v60 = vld [vmem:[%s5865_s1 + $0x298] sm:$0xff]  ;;  %v351_v61 = vld [vmem:[%s5865_s1 + $0x270] sm:$0xff] }
  0x1d   :  { %3088 = vmatpush1.bf16.msra.mxu1 %v3087_v1  ;;  %2967 = vmatpush1.bf16.msra.mxu0 %v2966_v2  ;;  %v354_v62 = vld [vmem:[%s5865_s1 + $0x288] sm:$0xff]  ;;  %v361_v1 = vld [vmem:[%s5865_s1 + $0x2c0] sm:$0xff]  ;;  %v3108_v2 = vpack.c.bf16 %v356_v60, %v353_v58  ;;  %v360_v8 = vld [vmem:[%s5865_s1 + $0x2b8] sm:$0xff] }
  0x1e   :  { %3089 = vmatprep.subr.bf16.mxu1 %v3421_v0  ;;  %2969 = vmatprep.subr.bf16.mxu0 %v2968_v4  ;;  %v358_v63 = vld [vmem:[%s5865_s1 + $0x2a8] sm:$0xff]  ;;  %v2994_v3 = vpack.c.bf16 %v354_v62, %v351_v61  ;;  %v359_v4 = vld [vmem:[%s5865_s1 + $0x2b0] sm:$0xff]  ;;  %v357_v7 = vld [vmem:[%s5865_s1 + $0x2a0] sm:$0xff] }
  0x1f   :  { %v2996_v5 = vpack.c.bf16 %v361_v1, %v358_v63  ;;  %v362_v6 = vld [vmem:[%s5865_s1 + $0x2c8] sm:$0xff]  ;;  %v364_v9 = vld [vmem:[%s5865_s1 + $0x2d8] sm:$0xff]  ;;  %v2998_v12 = vpack.c.bf16 %v360_v8, %v357_v7  ;;  %v363_v16 = vld [vmem:[%s5865_s1 + $0x2d0] sm:$0xff] }
  0x20   :  { %v368_v15 = vld [vmem:[%s5865_s1 + $0x2f8] sm:$0xff]  ;;  %v366_v17 = vld [vmem:[%s5865_s1 + $0x2e8] sm:$0xff]  ;;  %v371_v25 = vld [vmem:[%s5865_s1 + $0x310] sm:$0xff] }
  0x21   :  { %3091 = vmatpush1.bf16.msra.mxu1 %v3090_v10  ;;  %2971 = vmatpush1.bf16.msra.mxu0 %v2970_v11  ;;  %v367_v10 = vld [vmem:[%s5865_s1 + $0x2f0] sm:$0xff]  ;;  %v3111_v11 = vpack.c.bf16 %v362_v6, %v359_v4  ;;  %v370_v18 = vld [vmem:[%s5865_s1 + $0x308] sm:$0xff]  ;;  %v3002_v21 = vpack.c.bf16 %v366_v17, %v363_v16  ;;  %v372_v24 = vld [vmem:[%s5865_s1 + $0x318] sm:$0xff] }
  0x22   :  { %3092 = vmatprep.subr.bf16.mxu1 %v3421_v0  ;;  %2973 = vmatprep.subr.bf16.mxu0 %v2972_v13  ;;  %v365_v13 = vld [vmem:[%s5865_s1 + $0x2e0] sm:$0xff]  ;;  %v3000_v14 = vpack.c.bf16 %v367_v10, %v364_v9  ;;  %v374_v26 = vld [vmem:[%s5865_s1 + $0x328] sm:$0xff]  ;;  %v376_v27 = vld [vmem:[%s5865_s1 + $0x338] sm:$0xff] }
  0x23   :  { %v379_v28 = vld [vmem:[%s5865_s1 + $0x350] sm:$0xff]  ;;  %v22_v31 = vld [vmem:[%s5866_s0 + $0x28] sm:$0xff]  ;;  %v377_v36 = vld [vmem:[%s5865_s1 + $0x340] sm:$0xff] }
  0x24   :  { %v375_v33 = vld [vmem:[%s5865_s1 + $0x330] sm:$0xff]  ;;  %v3008_v34 = vpack.c.bf16 %v379_v28, %v376_v27  ;;  %v378_v35 = vld [vmem:[%s5865_s1 + $0x348] sm:$0xff]  ;;  %v380_v37 = vld [vmem:[%s5865_s1 + $0x358] sm:$0xff] }
  0x25   :  { %3094 = vmatpush1.bf16.msra.mxu1 %v3093_v19  ;;  %2975 = vmatpush1.bf16.msra.mxu0 %v2974_v20  ;;  %v373_v19 = vld [vmem:[%s5865_s1 + $0x320] sm:$0xff]  ;;  %v3114_v20 = vpack.c.bf16 %v368_v15, %v365_v13  ;;  %v3010_v42 = vpack.c.bf16 %v378_v35, %v375_v33  ;;  %v3120_v43 = vpack.c.bf16 %v380_v37, %v377_v36  ;;  %v384_v46 = vld [vmem:[%s5865_s1 + $0x378] sm:$0xff]  ;;  %v30_v52 = vld [vmem:[%s5866_s0 + $0x68] sm:$0xff] }
  0x26   :  { %3095 = vmatprep.subr.bf16.mxu1 %v3421_v0  ;;  %2977 = vmatprep.subr.bf16.mxu0 %v2976_v23  ;;  %v3004_v22 = vpack.c.bf16 %v373_v19, %v370_v18  ;;  %v369_v23 = vld [vmem:[%s5865_s1 + $0x300] sm:$0xff]  ;;  %v388_v49 = vld [vmem:[%s5865_s1 + $0x398] sm:$0xff]  ;;  %v387_v55 = vld [vmem:[%s5865_s1 + $0x390] sm:$0xff] }
  0x27   :  { %v21_v40 = vld [vmem:[%s5866_s0 + $0x20] sm:$0xff]  ;;  %v394_v60 = vld [vmem:[%s5865_s1 + $0x3c8] sm:$0xff]  ;;  %v395_v6 = vld [vmem:[%s5865_s1 + $0x3d0] sm:$0xff] }
  0x28   :  { %v381_v44 = vld [vmem:[%s5865_s1 + $0x360] sm:$0xff]  ;;  %v34_v63 = vld [vmem:[%s5866_s0 + $0x88] sm:$0xff]  ;;  %v400_v8 = vld [vmem:[%s5865_s1 + $0x3f8] sm:$0xff] }
  0x29   :  { %3097 = vmatpush1.bf16.msra.mxu1 %v3096_v29  ;;  %2979 = vmatpush1.bf16.msra.mxu0 %v2978_v30  ;;  %v17_v29 = vld [vmem:[%s5866_s0] sm:$0xff]  ;;  %v3006_v30 = vpack.c.bf16 %v372_v24, %v369_v23  ;;  %v3014_v53 = vpack.c.bf16 %v384_v46, %v381_v44  ;;  %v398_v7 = vld [vmem:[%s5865_s1 + $0x3e8] sm:$0xff]  ;;  %v403_v9 = vld [vmem:[%s5865_s1 + $0x410] sm:$0xff] }
  0x2a   :  { %3098 = vmatprep.subr.bf16.mxu1 %v3421_v0  ;;  %2981 = vmatprep.subr.bf16.mxu0 %v2980_v32  ;;  %v3117_v32 = vpack.c.bf16 %v374_v26, %v371_v25  ;;  %v25_v51 = vld [vmem:[%s5866_s0 + $0x40] sm:$0xff]  ;;  %v3129_v13 = vpack.c.bf16 %v398_v7, %v395_v6  ;;  %v3024_v15 = vpack.c.bf16 %v403_v9, %v400_v8  ;;  %v402_v16 = vld [vmem:[%s5865_s1 + $0x408] sm:$0xff]  ;;  %v404_v18 = vld [vmem:[%s5865_s1 + $0x418] sm:$0xff] }
  0x2b   :  { %v389_v58 = vld [vmem:[%s5865_s1 + $0x3a0] sm:$0xff]  ;;  %v406_v19 = vld [vmem:[%s5865_s1 + $0x428] sm:$0xff]  ;;  %v408_v27 = vld [vmem:[%s5865_s1 + $0x438] sm:$0xff] }
  0x2c   :  { %v397_v61 = vld [vmem:[%s5865_s1 + $0x3e0] sm:$0xff]  ;;  %v407_v28 = vld [vmem:[%s5865_s1 + $0x430] sm:$0xff]  ;;  %v46_v33 = vld [vmem:[%s5866_s0 + $0xe8] sm:$0xff] }
  0x2d   :  { %3100 = vmatpush1.bf16.msra.mxu1 %v3099_v38  ;;  %2983 = vmatpush1.bf16.msra.mxu0 %v2982_v39  ;;  %v382_v38 = vld [vmem:[%s5865_s1 + $0x368] sm:$0xff]  ;;  %v385_v39 = vld [vmem:[%s5865_s1 + $0x380] sm:$0xff]  ;;  %v3020_v4 = vpack.c.bf16 %v397_v61, %v394_v60  ;;  %v411_v36 = vld [vmem:[%s5865_s1 + $0x450] sm:$0xff] }
  0x2e   :  { %3101 = vmatprep.subr.bf16.mxu1 %v3421_v0  ;;  %2985 = vmatprep.subr.bf16.mxu0 %v2984_v41  ;;  %v26_v41 = vld [vmem:[%s5866_s0 + $0x48] sm:$0xff]  ;;  %v3012_v45 = vpack.c.bf16 %v385_v39, %v382_v38  ;;  %v29_v62 = vld [vmem:[%s5866_s0 + $0x60] sm:$0xff]  ;;  %v432_v8 = vld [vmem:[%s5865_s1 + $0x4f8] sm:$0xff] }
  0x2f   :  { %v33_v10 = vld [vmem:[%s5866_s0 + $0x80] sm:$0xff]  ;;  %v414_v38 = vld [vmem:[%s5865_s1 + $0x468] sm:$0xff]  ;;  %v431_v9 = vld [vmem:[%s5865_s1 + $0x4f0] sm:$0xff] }
  0x30   :  { %v401_v17 = vld [vmem:[%s5865_s1 + $0x400] sm:$0xff]  ;;  %v50_v44 = vld [vmem:[%s5866_s0 + $0x108] sm:$0xff] }
  0x31   :  { %3103 = vmatpush1.bf16.msra.mxu1 %v3102_v47  ;;  %2987 = vmatpush1.bf16.msra.mxu0 %v2986_v48  ;;  %v383_v47 = vld [vmem:[%s5865_s1 + $0x370] sm:$0xff]  ;;  %v386_v48 = vld [vmem:[%s5865_s1 + $0x388] sm:$0xff]  ;;  %v3132_v24 = vpack.c.bf16 %v404_v18, %v401_v17  ;;  %v405_v25 = vld [vmem:[%s5865_s1 + $0x420] sm:$0xff] }
  0x32   :  { %3104 = vmatprep.subr.bf16.mxu1 %v3421_v0  ;;  %2989 = vmatprep.subr.bf16.mxu0 %v2988_v50  ;;  %v391_v50 = vld [vmem:[%s5865_s1 + $0x3b0] sm:$0xff]  ;;  %v3123_v54 = vpack.c.bf16 %v386_v48, %v383_v47  ;;  %v413_v39 = vld [vmem:[%s5865_s1 + $0x460] sm:$0xff]  ;;  %v426_v60 = vld [vmem:[%s5865_s1 + $0x4c8] sm:$0xff] }
  0x33   :  { %v417_v47 = vld [vmem:[%s5865_s1 + $0x480] sm:$0xff]  ;;  %v70_v18 = vld [vmem:[%s5866_s0 + $0x1a8] sm:$0xff] }
  0x34   :  { %v425_v61 = vld [vmem:[%s5865_s1 + $0x4c0] sm:$0xff] }
  0x35   :  { %3106 = vmatpush1.bf16.msra.mxu1 %v3105_v56  ;;  %2991 = vmatpush1.bf16.msra.mxu0 %v2990_v57  ;;  %v3016_v56 = vpack.c.bf16 %v391_v50, %v388_v49  ;;  %v390_v57 = vld [vmem:[%s5865_s1 + $0x3a8] sm:$0xff]  ;;  %v420_v49 = vld [vmem:[%s5865_s1 + $0x498] sm:$0xff]  ;;  %v419_v50 = vld [vmem:[%s5865_s1 + $0x490] sm:$0xff] }
  0x36   :  { %3107 = vmatprep.subr.bf16.mxu1 %v3421_v0  ;;  %2993 = vmatprep.subr.bf16.mxu0 %v2992_v59  ;;  %v392_v59 = vld [vmem:[%s5865_s1 + $0x3b8] sm:$0xff]  ;;  %v3018_v1 = vpack.c.bf16 %v390_v57, %v387_v55  ;;  %v54_v55 = vld [vmem:[%s5866_s0 + $0x128] sm:$0xff]  ;;  %v429_v6 = vld [vmem:[%s5865_s1 + $0x4e0] sm:$0xff] }
  0x37   :  { %v65_v17 = vld [vmem:[%s5866_s0 + $0x180] sm:$0xff] }
  0x39   :  { %3109 = vmatpush1.bf16.msra.mxu1 %v3108_v2  ;;  %2995 = vmatpush1.bf16.msra.mxu0 %v2994_v3  ;;  %v3126_v2 = vpack.c.bf16 %v392_v59, %v389_v58  ;;  %v393_v3 = vld [vmem:[%s5865_s1 + $0x3c0] sm:$0xff]  ;;  %v423_v58 = vld [vmem:[%s5865_s1 + $0x4b0] sm:$0xff] }
  0x3a   :  { %3110 = vmatprep.subr.bf16.mxu1 %v3421_v0  ;;  %2997 = vmatprep.subr.bf16.mxu0 %v2996_v5  ;;  %v396_v5 = vld [vmem:[%s5865_s1 + $0x3d8] sm:$0xff] }
  0x3d   :  { %3112 = vmatpush1.bf16.msra.mxu1 %v3111_v11  ;;  %2999 = vmatpush1.bf16.msra.mxu0 %v2998_v12  ;;  %v38_v11 = vld [vmem:[%s5866_s0 + $0xa8] sm:$0xff]  ;;  %v3022_v12 = vpack.c.bf16 %v396_v5, %v393_v3 }
  0x3e   :  { %3113 = vmatprep.subr.bf16.mxu1 %v3421_v0  ;;  %3001 = vmatprep.subr.bf16.mxu0 %v3000_v14  ;;  %v399_v14 = vld [vmem:[%s5865_s1 + $0x3f0] sm:$0xff]  ;;  %v58_v3 = vld [vmem:[%s5866_s0 + $0x148] sm:$0xff] }
  0x3f   :  { %v3026_v23 = vpack.c.bf16 %v402_v16, %v399_v14  ;;  %v66_v16 = vld [vmem:[%s5866_s0 + $0x188] sm:$0xff] }
  0x41   :  { %3115 = vmatpush1.bf16.msra.mxu1 %v3114_v20  ;;  %3003 = vmatpush1.bf16.msra.mxu0 %v3002_v21  ;;  %v409_v20 = vld [vmem:[%s5865_s1 + $0x440] sm:$0xff] }
  0x42   :  { %3005 = vmatprep.subr.bf16.mxu0 %v3004_v22  ;;  %3116 = vmatprep.subr.bf16.mxu1 %v3421_v0  ;;  %v37_v21 = vld [vmem:[%s5866_s0 + $0xa0] sm:$0xff]  ;;  %v42_v22 = vld [vmem:[%s5866_s0 + $0xc8] sm:$0xff]  ;;  %v3028_v26 = vpack.c.bf16 %v409_v20, %v406_v19  ;;  %v436_v19 = vld [vmem:[%s5865_s1 + $0x518] sm:$0xff] }
  0x43   :  { %v439_v20 = vld [vmem:[%s5865_s1 + $0x530] sm:$0xff] }
  0x44   :  { %1428 = vmatmul.mubr.f32.vlgmr.msra.gmra.mrb[0].mxu1 %v17_v29  ;;  %530 = vmatmul.mubr.f32.vlgmr.msra.gmra.mrb[0].mxu0 %v17_v29  ;;  %v410_v29 = vld [vmem:[%s5865_s1 + $0x448] sm:$0xff] }
  0x45   :  { %3007 = vmatpush1.bf16.msra.mxu0 %v3006_v30  ;;  %1432 = vmatprep.mubr.f32.mxu1 %v22_v31  ;;  %v412_v30 = vld [vmem:[%s5865_s1 + $0x458] sm:$0xff]  ;;  %v3135_v35 = vpack.c.bf16 %v410_v29, %v407_v28 }
  0x46   :  { %3118 = vmatpush1.bf16.msra.mxu1 %v3117_v32  ;;  %535 = vmatprep.mubr.f32.mxu0 %v22_v31  ;;  %v415_v31 = vld [vmem:[%s5865_s1 + $0x470] sm:$0xff]  ;;  %v41_v32 = vld [vmem:[%s5866_s0 + $0xc0] sm:$0xff]  ;;  %v440_v28 = vld [vmem:[%s5865_s1 + $0x538] sm:$0xff] }
  0x47   :  { %3009 = vmatprep.subr.bf16.mxu0 %v3008_v34  ;;  %3119 = vmatprep.subr.bf16.mxu1 %v3421_v0  ;;  %v3030_v34 = vpack.c.bf16 %v408_v27, %v405_v25  ;;  %v3032_v37 = vpack.c.bf16 %v415_v31, %v412_v30  ;;  %v437_v25 = vld [vmem:[%s5865_s1 + $0x520] sm:$0xff]  ;;  %v78_v31 = vld [vmem:[%s5866_s0 + $0x1e8] sm:$0xff] }
  0x48   :  { %1433 = vmatmul.mubr.f32.gmra.mrb[2].mxu1 %v21_v40  ;;  %536 = vmatmul.mubr.f32.gmra.mrb[2].mxu0 %v21_v40  ;;  %v416_v40 = vld [vmem:[%s5865_s1 + $0x478] sm:$0xff]  ;;  %v3150_v29 = vpack.c.bf16 %v440_v28, %v437_v25  ;;  %v73_v30 = vld [vmem:[%s5866_s0 + $0x1c0] sm:$0xff]  ;;  %v459_v25 = vld [vmem:[%s5865_s1 + $0x5d0] sm:$0xff] }
  0x49   :  { %1437 = vmatprep.mubr.f32.mxu1 %v26_v41  ;;  %541 = vmatprep.mubr.f32.mxu0 %v26_v41  ;;  %v418_v41 = vld [vmem:[%s5865_s1 + $0x488] sm:$0xff]  ;;  %v3138_v46 = vpack.c.bf16 %v416_v40, %v413_v39  ;;  %v85_v39 = vld [vmem:[%s5866_s0 + $0x220] sm:$0xff] }
  0x4a   :  { %3011 = vmatpush1.bf16.msra.mxu0 %v3010_v42  ;;  %3121 = vmatpush1.bf16.msra.mxu1 %v3120_v43  ;;  %v421_v42 = vld [vmem:[%s5865_s1 + $0x4a0] sm:$0xff]  ;;  %v462_v28 = vld [vmem:[%s5865_s1 + $0x5e8] sm:$0xff] }
  0x4b   :  { %3013 = vmatprep.subr.bf16.mxu0 %v3012_v45  ;;  %3122 = vmatprep.subr.bf16.mxu1 %v3421_v0  ;;  %v45_v43 = vld [vmem:[%s5866_s0 + $0xe0] sm:$0xff]  ;;  %v3034_v45 = vpack.c.bf16 %v414_v38, %v411_v36  ;;  %v3036_v48 = vpack.c.bf16 %v421_v42, %v418_v41  ;;  %v442_v36 = vld [vmem:[%s5865_s1 + $0x548] sm:$0xff]  ;;  %v444_v41 = vld [vmem:[%s5865_s1 + $0x558] sm:$0xff] }
  0x4c   :  { %1438 = vmatmul.mubr.f32.gmra.mrb[4].mxu1 %v25_v51  ;;  %542 = vmatmul.mubr.f32.gmra.mrb[4].mxu0 %v25_v51  ;;  %v422_v51 = vld [vmem:[%s5865_s1 + $0x4a8] sm:$0xff]  ;;  %v441_v38 = vld [vmem:[%s5865_s1 + $0x540] sm:$0xff]  ;;  %v443_v42 = vld [vmem:[%s5865_s1 + $0x550] sm:$0xff] }
  0x4d   :  { %1442 = vmatprep.mubr.f32.mxu1 %v30_v52  ;;  %547 = vmatprep.mubr.f32.mxu0 %v30_v52  ;;  %v424_v52 = vld [vmem:[%s5865_s1 + $0x4b8] sm:$0xff]  ;;  %v3141_v57 = vpack.c.bf16 %v422_v51, %v419_v50  ;;  %v98_v50 = vld [vmem:[%s5866_s0 + $0x288] sm:$0xff]  ;;  %v97_v51 = vld [vmem:[%s5866_s0 + $0x280] sm:$0xff] }
  0x4e   :  { %3015 = vmatpush1.bf16.msra.mxu0 %v3014_v53  ;;  %3124 = vmatpush1.bf16.msra.mxu1 %v3123_v54  ;;  %v427_v53 = vld [vmem:[%s5865_s1 + $0x4d0] sm:$0xff]  ;;  %v49_v54 = vld [vmem:[%s5866_s0 + $0x100] sm:$0xff] }
  0x4f   :  { %3017 = vmatprep.subr.bf16.mxu0 %v3016_v56  ;;  %3125 = vmatprep.subr.bf16.mxu1 %v3421_v0  ;;  %v3038_v56 = vpack.c.bf16 %v420_v49, %v417_v47  ;;  %v3040_v59 = vpack.c.bf16 %v427_v53, %v424_v52  ;;  %v89_v47 = vld [vmem:[%s5866_s0 + $0x240] sm:$0xff]  ;;  %v102_v52 = vld [vmem:[%s5866_s0 + $0x2a8] sm:$0xff]  ;;  %v448_v53 = vld [vmem:[%s5865_s1 + $0x578] sm:$0xff] }
  0x50   :  { %1443 = vmatmul.mubr.f32.gmra.mrb[6].mxu1 %v29_v62  ;;  %548 = vmatmul.mubr.f32.gmra.mrb[6].mxu0 %v29_v62  ;;  %v428_v62 = vld [vmem:[%s5865_s1 + $0x4d8] sm:$0xff]  ;;  %v93_v49 = vld [vmem:[%s5866_s0 + $0x260] sm:$0xff] }
  0x51   :  { %1447 = vmatprep.mubr.f32.mxu1 %v34_v63  ;;  %553 = vmatprep.mubr.f32.mxu0 %v34_v63  ;;  %v430_v63 = vld [vmem:[%s5865_s1 + $0x4e8] sm:$0xff]  ;;  %v3144_v5 = vpack.c.bf16 %v428_v62, %v425_v61  ;;  %v452_v62 = vld [vmem:[%s5865_s1 + $0x598] sm:$0xff] }
  0x52   :  { %3019 = vmatpush1.bf16.msra.mxu0 %v3018_v1  ;;  %3127 = vmatpush1.bf16.msra.mxu1 %v3126_v2  ;;  %v433_v1 = vld [vmem:[%s5865_s1 + $0x500] sm:$0xff] }
  0x53   :  { %3021 = vmatprep.subr.bf16.mxu0 %v3020_v4  ;;  %3128 = vmatprep.subr.bf16.mxu1 %v3421_v0  ;;  %v53_v2 = vld [vmem:[%s5866_s0 + $0x120] sm:$0xff]  ;;  %v3042_v4 = vpack.c.bf16 %v426_v60, %v423_v58  ;;  %v3044_v7 = vpack.c.bf16 %v433_v1, %v430_v63  ;;  %v450_v58 = vld [vmem:[%s5865_s1 + $0x588] sm:$0xff] }
  0x54   :  { %1448 = vmatmul.mubr.f32.gmra.mrb[8].mxu1 %v33_v10  ;;  %554 = vmatmul.mubr.f32.gmra.mrb[8].mxu0 %v33_v10  ;;  %v434_v10 = vld [vmem:[%s5865_s1 + $0x508] sm:$0xff]  ;;  %v105_v1 = vld [vmem:[%s5866_s0 + $0x2c0] sm:$0xff] }
  0x55   :  { %1452 = vmatprep.mubr.f32.mxu1 %v38_v11  ;;  %559 = vmatprep.mubr.f32.mxu0 %v38_v11  ;;  %v57_v11 = vld [vmem:[%s5866_s0 + $0x140] sm:$0xff]  ;;  %v3147_v14 = vpack.c.bf16 %v434_v10, %v431_v9  ;;  %v106_v60 = vld [vmem:[%s5866_s0 + $0x2c8] sm:$0xff] }
  0x56   :  { %3023 = vmatpush1.bf16.msra.mxu0 %v3022_v12  ;;  %3130 = vmatpush1.bf16.msra.mxu1 %v3129_v13  ;;  %v62_v12 = vld [vmem:[%s5866_s0 + $0x168] sm:$0xff]  ;;  %v3046_v13 = vpack.c.bf16 %v432_v8, %v429_v6  ;;  %v457_v8 = vld [vmem:[%s5865_s1 + $0x5c0] sm:$0xff] }
  0x57   :  { %3025 = vmatprep.subr.bf16.mxu0 %v3024_v15  ;;  %3131 = vmatprep.subr.bf16.mxu1 %v3421_v0  ;;  %v61_v15 = vld [vmem:[%s5866_s0 + $0x160] sm:$0xff]  ;;  %v118_v6 = vld [vmem:[%s5866_s0 + $0x328] sm:$0xff] }
  0x58   :  { %1453 = vmatmul.mubr.f32.gmra.mrb[10].mxu1 %v37_v21  ;;  %560 = vmatmul.mubr.f32.gmra.mrb[10].mxu0 %v37_v21  ;;  %v435_v21 = vld [vmem:[%s5865_s1 + $0x510] sm:$0xff]  ;;  %v453_v9 = vld [vmem:[%s5865_s1 + $0x5a0] sm:$0xff] }
  0x59   :  { %1457 = vmatprep.mubr.f32.mxu1 %v42_v22  ;;  %565 = vmatprep.mubr.f32.mxu0 %v42_v22  ;;  %v69_v22 = vld [vmem:[%s5866_s0 + $0x1a0] sm:$0xff] }
  0x5a   :  { %3027 = vmatpush1.bf16.msra.mxu0 %v3026_v23  ;;  %3133 = vmatpush1.bf16.msra.mxu1 %v3132_v24  ;;  %v3048_v23 = vpack.c.bf16 %v439_v20, %v436_v19  ;;  %v438_v24 = vld [vmem:[%s5865_s1 + $0x528] sm:$0xff]  ;;  %v117_v10 = vld [vmem:[%s5866_s0 + $0x320] sm:$0xff] }
  0x5b   :  { %3029 = vmatprep.subr.bf16.mxu0 %v3028_v26  ;;  %3134 = vmatprep.subr.bf16.mxu1 %v3421_v0  ;;  %v74_v26 = vld [vmem:[%s5866_s0 + $0x1c8] sm:$0xff]  ;;  %v3050_v27 = vpack.c.bf16 %v438_v24, %v435_v21  ;;  %v125_v20 = vld [vmem:[%s5866_s0 + $0x360] sm:$0xff]  ;;  %v463_v24 = vld [vmem:[%s5865_s1 + $0x5f0] sm:$0xff] }
  0x5c   :  { %1458 = vmatmul.mubr.f32.gmra.mrb[12].mxu1 %v41_v32  ;;  %566 = vmatmul.mubr.f32.gmra.mrb[12].mxu0 %v41_v32  ;;  %v77_v32 = vld [vmem:[%s5866_s0 + $0x1e0] sm:$0xff]  ;;  %v126_v19 = vld [vmem:[%s5866_s0 + $0x368] sm:$0xff] }
  0x5d   :  { %1462 = vmatprep.mubr.f32.mxu1 %v46_v33  ;;  %571 = vmatprep.mubr.f32.mxu0 %v46_v33  ;;  %v82_v33 = vld [vmem:[%s5866_s0 + $0x208] sm:$0xff] }
  0x5e   :  { %3031 = vmatpush1.bf16.msra.mxu0 %v3030_v34  ;;  %3136 = vmatpush1.bf16.msra.mxu1 %v3135_v35  ;;  %v81_v34 = vld [vmem:[%s5866_s0 + $0x200] sm:$0xff]  ;;  %v86_v35 = vld [vmem:[%s5866_s0 + $0x228] sm:$0xff] }
  0x5f   :  { %3033 = vmatprep.subr.bf16.mxu0 %v3032_v37  ;;  %3137 = vmatprep.subr.bf16.mxu1 %v3421_v0  ;;  %v445_v37 = vld [vmem:[%s5865_s1 + $0x560] sm:$0xff]  ;;  %v130_v21 = vld [vmem:[%s5866_s0 + $0x388] sm:$0xff] }
  0x60   :  { %1463 = vmatmul.mubr.f32.gmra.mrb[14].mxu1 %v45_v43  ;;  %572 = vmatmul.mubr.f32.gmra.mrb[14].mxu0 %v45_v43  ;;  %v3052_v40 = vpack.c.bf16 %v445_v37, %v442_v36  ;;  %v90_v43 = vld [vmem:[%s5866_s0 + $0x248] sm:$0xff]  ;;  %v141_v36 = vld [vmem:[%s5866_s0 + $0x3e0] sm:$0xff] }
  0x61   :  { %1467 = vmatprep.mubr.f32.mxu1 %v50_v44  ;;  %577 = vmatprep.mubr.f32.mxu0 %v50_v44  ;;  %v3054_v44 = vpack.c.bf16 %v444_v41, %v441_v38  ;;  %v146_v37 = vld [vmem:[%s5866_s0 + $0x408] sm:$0xff]  ;;  %v145_v38 = vld [vmem:[%s5866_s0 + $0x400] sm:$0xff] }
  0x62   :  { %3035 = vmatpush1.bf16.msra.mxu0 %v3034_v45  ;;  %3139 = vmatpush1.bf16.msra.mxu1 %v3138_v46  ;;  %v446_v45 = vld [vmem:[%s5865_s1 + $0x568] sm:$0xff] }
  0x63   :  { %3037 = vmatprep.subr.bf16.mxu0 %v3036_v48  ;;  %3140 = vmatprep.subr.bf16.mxu1 %v3421_v0  ;;  %v3153_v46 = vpack.c.bf16 %v446_v45, %v443_v42  ;;  %v94_v48 = vld [vmem:[%s5866_s0 + $0x268] sm:$0xff]  ;;  %v153_v42 = vld [vmem:[%s5866_s0 + $0x440] sm:$0xff] }
  0x64   :  { %1468 = vmatmul.mubr.f32.gmra.mrb[16].mxu1 %v49_v54  ;;  %578 = vmatmul.mubr.f32.gmra.mrb[16].mxu0 %v49_v54  ;;  %v451_v54 = vld [vmem:[%s5865_s1 + $0x590] sm:$0xff]  ;;  %v154_v41 = vld [vmem:[%s5866_s0 + $0x448] sm:$0xff] }
  0x65   :  { %1472 = vmatprep.mubr.f32.mxu1 %v54_v55  ;;  %583 = vmatprep.mubr.f32.mxu0 %v54_v55  ;;  %v447_v55 = vld [vmem:[%s5865_s1 + $0x570] sm:$0xff]  ;;  %v162_v45 = vld [vmem:[%s5866_s0 + $0x488] sm:$0xff] }
  0x66   :  { %3039 = vmatpush1.bf16.msra.mxu0 %v3038_v56  ;;  %3142 = vmatpush1.bf16.msra.mxu1 %v3141_v57  ;;  %v101_v56 = vld [vmem:[%s5866_s0 + $0x2a0] sm:$0xff]  ;;  %v3056_v57 = vpack.c.bf16 %v451_v54, %v448_v53  ;;  %v3058_v61 = vpack.c.bf16 %v450_v58, %v447_v55  ;;  %v178_v53 = vld [vmem:[%s5866_s0 + $0x508] sm:$0xff] }
  0x67   :  { %3041 = vmatprep.subr.bf16.mxu0 %v3040_v59  ;;  %3143 = vmatprep.subr.bf16.mxu1 %v3421_v0  ;;  %v449_v59 = vld [vmem:[%s5865_s1 + $0x580] sm:$0xff]  ;;  %v182_v55 = vld [vmem:[%s5866_s0 + $0x528] sm:$0xff] }
  0x68   :  { %1473 = vmatmul.mubr.f32.gmra.mrb[18].mxu1 %v53_v2  ;;  %584 = vmatmul.mubr.f32.gmra.mrb[18].mxu0 %v53_v2  ;;  %v3156_v63 = vpack.c.bf16 %v452_v62, %v449_v59  ;;  %v110_v2 = vld [vmem:[%s5866_s0 + $0x2e8] sm:$0xff]  ;;  %v177_v54 = vld [vmem:[%s5866_s0 + $0x500] sm:$0xff] }
  0x69   :  { %1477 = vmatprep.mubr.f32.mxu1 %v58_v3  ;;  %589 = vmatprep.mubr.f32.mxu0 %v58_v3  ;;  %v109_v3 = vld [vmem:[%s5866_s0 + $0x2e0] sm:$0xff]  ;;  %v190_v59 = vld [vmem:[%s5866_s0 + $0x568] sm:$0xff] }
  0x6a   :  { %3043 = vmatpush1.bf16.msra.mxu0 %v3042_v4  ;;  %3145 = vmatpush1.bf16.msra.mxu1 %v3144_v5  ;;  %v114_v4 = vld [vmem:[%s5866_s0 + $0x308] sm:$0xff]  ;;  %v113_v5 = vld [vmem:[%s5866_s0 + $0x300] sm:$0xff] }
  0x6b   :  { %3045 = vmatprep.subr.bf16.mxu0 %v3044_v7  ;;  %3146 = vmatprep.subr.bf16.mxu1 %v3421_v0  ;;  %v454_v7 = vld [vmem:[%s5865_s1 + $0x5a8] sm:$0xff]  ;;  %v185_v58 = vld [vmem:[%s5866_s0 + $0x540] sm:$0xff] }
  0x6c   :  { %1478 = vmatmul.mubr.f32.gmra.mrb[20].mxu1 %v57_v11  ;;  %590 = vmatmul.mubr.f32.gmra.mrb[20].mxu0 %v57_v11  ;;  %v3060_v11 = vpack.c.bf16 %v457_v8, %v454_v7  ;;  %v193_v62 = vld [vmem:[%s5866_s0 + $0x580] sm:$0xff]  ;;  %v214_v8 = vld [vmem:[%s5866_s0 + $0x628] sm:$0xff] }
  0x6d   :  { %1482 = vmatprep.mubr.f32.mxu1 %v62_v12  ;;  %595 = vmatprep.mubr.f32.mxu0 %v62_v12  ;;  %v456_v12 = vld [vmem:[%s5865_s1 + $0x5b8] sm:$0xff]  ;;  %v209_v7 = vld [vmem:[%s5866_s0 + $0x600] sm:$0xff] }
  0x6e   :  { %3047 = vmatpush1.bf16.msra.mxu0 %v3046_v13  ;;  %3148 = vmatpush1.bf16.msra.mxu1 %v3147_v14  ;;  %v455_v13 = vld [vmem:[%s5865_s1 + $0x5b0] sm:$0xff]  ;;  %v122_v14 = vld [vmem:[%s5866_s0 + $0x348] sm:$0xff] }
  0x6f   :  { %3149 = vmatprep.subr.bf16.mxu1 %v3421_v0  ;;  %3049 = vmatprep.subr.bf16.mxu0 %v3048_v23  ;;  %v460_v23 = vld [vmem:[%s5865_s1 + $0x5d8] sm:$0xff] }
  0x70   :  { %1483 = vmatmul.mubr.f32.gmra.mrb[22].mxu1 %v61_v15  ;;  %596 = vmatmul.mubr.f32.gmra.mrb[22].mxu0 %v61_v15  ;;  %v3062_v15 = vpack.c.bf16 %v456_v12, %v453_v9  ;;  %v213_v9 = vld [vmem:[%s5866_s0 + $0x620] sm:$0xff]  ;;  %v222_v12 = vld [vmem:[%s5866_s0 + $0x668] sm:$0xff] }
  0x71   :  { %1487 = vmatprep.mubr.f32.mxu1 %v66_v16  ;;  %601 = vmatprep.mubr.f32.mxu0 %v66_v16  ;;  %v458_v16 = vld [vmem:[%s5865_s1 + $0x5c8] sm:$0xff] }
  0x72   :  { %3051 = vmatpush1.bf16.msra.mxu0 %v3050_v27  ;;  %3151 = vmatpush1.bf16.msra.mxu1 %v3150_v29  ;;  %v3064_v27 = vpack.c.bf16 %v463_v24, %v460_v23  ;;  %v461_v29 = vld [vmem:[%s5865_s1 + $0x5e0] sm:$0xff]  ;;  %v246_v23 = vld [vmem:[%s5866_s0 + $0x728] sm:$0xff] }
  0x73   :  { %3152 = vmatprep.subr.bf16.mxu1 %v3421_v0  ;;  %3053 = vmatprep.subr.bf16.mxu0 %v3052_v40  ;;  %v149_v40 = vld [vmem:[%s5866_s0 + $0x420] sm:$0xff] }
  0x74   :  { %1488 = vmatmul.mubr.f32.gmra.mrb[24].mxu1 %v65_v17  ;;  %602 = vmatmul.mubr.f32.gmra.mrb[24].mxu0 %v65_v17  ;;  %v3159_v17 = vpack.c.bf16 %v458_v16, %v455_v13  ;;  %v221_v13 = vld [vmem:[%s5866_s0 + $0x660] sm:$0xff]  ;;  %v230_v16 = vld [vmem:[%s5866_s0 + $0x6a8] sm:$0xff] }
  0x75   :  { %1492 = vmatprep.mubr.f32.mxu1 %v70_v18  ;;  %607 = vmatprep.mubr.f32.mxu0 %v70_v18  ;;  %v121_v18 = vld [vmem:[%s5866_s0 + $0x340] sm:$0xff] }
  0x76   :  { %3055 = vmatpush1.bf16.msra.mxu0 %v3054_v44  ;;  %3154 = vmatpush1.bf16.msra.mxu1 %v3153_v46  ;;  %v157_v44 = vld [vmem:[%s5866_s0 + $0x460] sm:$0xff] }
  0x77   :  { %3155 = vmatprep.subr.bf16.mxu1 %v3421_v0  ;;  %3057 = vmatprep.subr.bf16.mxu0 %v3056_v57  ;;  %v161_v46 = vld [vmem:[%s5866_s0 + $0x480] sm:$0xff]  ;;  %v186_v57 = vld [vmem:[%s5866_s0 + $0x548] sm:$0xff] }
  0x78   :  { %1493 = vmatmul.mubr.f32.gmra.mrb[26].mxu1 %v69_v22  ;;  %608 = vmatmul.mubr.f32.gmra.mrb[26].mxu0 %v69_v22  ;;  %v134_v22 = vld [vmem:[%s5866_s0 + $0x3a8] sm:$0xff]  ;;  %v245_v24 = vld [vmem:[%s5866_s0 + $0x720] sm:$0xff] }
  0x79   :  { %1497 = vmatprep.mubr.f32.mxu1 %v74_v26  ;;  %613 = vmatprep.mubr.f32.mxu0 %v74_v26  ;;  %v133_v26 = vld [vmem:[%s5866_s0 + $0x3a0] sm:$0xff] }
  0x7a   :  { %3059 = vmatpush1.bf16.msra.mxu0 %v3058_v61  ;;  %3157 = vmatpush1.bf16.msra.mxu1 %v3156_v63  ;;  %v194_v61 = vld [vmem:[%s5866_s0 + $0x588] sm:$0xff] }
  0x7b   :  { %3158 = vmatprep.subr.bf16.mxu1 %v3421_v0  ;;  %3061 = vmatprep.subr.bf16.mxu0 %v3060_v11  ;;  %v198_v63 = vld [vmem:[%s5866_s0 + $0x5a8] sm:$0xff]  ;;  %v217_v11 = vld [vmem:[%s5866_s0 + $0x640] sm:$0xff] }
  0x7c   :  { %1498 = vmatmul.mubr.f32.gmra.mrb[28].mxu1 %v73_v30  ;;  %614 = vmatmul.mubr.f32.gmra.mrb[28].mxu0 %v73_v30  ;;  %v138_v30 = vld [vmem:[%s5866_s0 + $0x3c8] sm:$0xff] }
  0x7d   :  { %1502 = vmatprep.mubr.f32.mxu1 %v78_v31  ;;  %619 = vmatprep.mubr.f32.mxu0 %v78_v31  ;;  %v3066_v31 = vpack.c.bf16 %v462_v28, %v459_v25  ;;  %v250_v25 = vld [vmem:[%s5866_s0 + $0x748] sm:$0xff]  ;;  %v253_v28 = vld [vmem:[%s5866_s0 + $0x760] sm:$0xff] }
  0x7e   :  { %3063 = vmatpush1.bf16.msra.mxu0 %v3062_v15  ;;  %3160 = vmatpush1.bf16.msra.mxu1 %v3159_v17  ;;  %v225_v15 = vld [vmem:[%s5866_s0 + $0x680] sm:$0xff] }
  0x7f   :  { %3161 = vmatprep.subr.bf16.mxu1 %v3421_v0  ;;  %v129_v0 = vld [vmem:[%s5866_s0 + $0x380] sm:$0xff]  ;;  %3065 = vmatprep.subr.bf16.mxu0 %v3064_v27  ;;  %v254_v27 = vld [vmem:[%s5866_s0 + $0x768] sm:$0xff] }
  0x80   :  { %1503 = vmatmul.mubr.f32.gmra.mrb[30].mxu1 %v77_v32  ;;  %620 = vmatmul.mubr.f32.gmra.mrb[30].mxu0 %v77_v32  ;;  %v464_v32 = vld [vmem:[%s5865_s1 + $0x5f8] sm:$0xff]  ;;  %v229_v17 = vld [vmem:[%s5866_s0 + $0x6a0] sm:$0xff] }
  0x81   :  { %1507 = vmatprep.mubr.f32.mxu1 %v82_v33  ;;  %625 = vmatprep.mubr.f32.mxu0 %v82_v33  ;;  %v3162_v33 = vpack.c.bf16 %v464_v32, %v461_v29  ;;  %v258_v29 = vld [vmem:[%s5866_s0 + $0x788] sm:$0xff]  ;;  %v261_v32 = vld [vmem:[%s5866_s0 + $0x7a0] sm:$0xff] }
  0x82   :  { %3067 = vmatpush1.bf16.msra.mxu0 %v3066_v31  ;;  %v262_v31 = vld [vmem:[%s5866_s0 + $0x7a8] sm:$0xff] }
  0x83   :  { %3163 = vmatpush1.bf16.msra.mxu1 %v3162_v33  ;;  %v266_v33 = vld [vmem:[%s5866_s0 + $0x7c8] sm:$0xff] }
  0x84   :  { %1508 = vmatmul.mubr.f32.gmra.mrb[32].mxu1 %v81_v34  ;;  %626 = vmatmul.mubr.f32.gmra.mrb[32].mxu0 %v81_v34  ;;  %v137_v34 = vld [vmem:[%s5866_s0 + $0x3c0] sm:$0xff] }
  0x85   :  { %1512 = vmatprep.mubr.f32.mxu1 %v86_v35  ;;  %631 = vmatprep.mubr.f32.mxu0 %v86_v35  ;;  %v142_v35 = vld [vmem:[%s5866_s0 + $0x3e8] sm:$0xff] }
  0x88   :  { %1513 = vmatmul.mubr.f32.gmra.mrb[34].mxu1 %v85_v39  ;;  %632 = vmatmul.mubr.f32.gmra.mrb[34].mxu0 %v85_v39  ;;  %v150_v39 = vld [vmem:[%s5866_s0 + $0x428] sm:$0xff] }
  0x89   :  { %1517 = vmatprep.mubr.f32.mxu1 %v90_v43  ;;  %637 = vmatprep.mubr.f32.mxu0 %v90_v43  ;;  %v158_v43 = vld [vmem:[%s5866_s0 + $0x468] sm:$0xff] }
  0x8c   :  { %1518 = vmatmul.mubr.f32.gmra.mrb[36].mxu1 %v89_v47  ;;  %638 = vmatmul.mubr.f32.gmra.mrb[36].mxu0 %v89_v47  ;;  %v166_v47 = vld [vmem:[%s5866_s0 + $0x4a8] sm:$0xff] }
  0x8d   :  { %1522 = vmatprep.mubr.f32.mxu1 %v94_v48  ;;  %643 = vmatprep.mubr.f32.mxu0 %v94_v48  ;;  %v165_v48 = vld [vmem:[%s5866_s0 + $0x4a0] sm:$0xff] }
  0x90   :  { %1523 = vmatmul.mubr.f32.gmra.mrb[38].mxu1 %v93_v49  ;;  %644 = vmatmul.mubr.f32.gmra.mrb[38].mxu0 %v93_v49  ;;  %v170_v49 = vld [vmem:[%s5866_s0 + $0x4c8] sm:$0xff] }
  0x91   :  { %1527 = vmatprep.mubr.f32.mxu1 %v98_v50  ;;  %649 = vmatprep.mubr.f32.mxu0 %v98_v50  ;;  %v169_v50 = vld [vmem:[%s5866_s0 + $0x4c0] sm:$0xff] }
  0x94   :  { %1528 = vmatmul.mubr.f32.gmra.mrb[40].mxu1 %v97_v51  ;;  %650 = vmatmul.mubr.f32.gmra.mrb[40].mxu0 %v97_v51  ;;  %v174_v51 = vld [vmem:[%s5866_s0 + $0x4e8] sm:$0xff] }
  0x95   :  { %1532 = vmatprep.mubr.f32.mxu1 %v102_v52  ;;  %655 = vmatprep.mubr.f32.mxu0 %v102_v52  ;;  %v173_v52 = vld [vmem:[%s5866_s0 + $0x4e0] sm:$0xff] }
  0x98   :  { %1533 = vmatmul.mubr.f32.gmra.mrb[42].mxu1 %v101_v56  ;;  %656 = vmatmul.mubr.f32.gmra.mrb[42].mxu0 %v101_v56  ;;  %v181_v56 = vld [vmem:[%s5866_s0 + $0x520] sm:$0xff] }
  0x99   :  { %1537 = vmatprep.mubr.f32.mxu1 %v106_v60  ;;  %661 = vmatprep.mubr.f32.mxu0 %v106_v60  ;;  %v189_v60 = vld [vmem:[%s5866_s0 + $0x560] sm:$0xff] }
  0x9c   :  { %1538 = vmatmul.mubr.f32.gmra.mrb[44].mxu1 %v105_v1  ;;  %662 = vmatmul.mubr.f32.gmra.mrb[44].mxu0 %v105_v1  ;;  %v197_v1 = vld [vmem:[%s5866_s0 + $0x5a0] sm:$0xff] }
  0x9d   :  { %1542 = vmatprep.mubr.f32.mxu1 %v110_v2  ;;  %667 = vmatprep.mubr.f32.mxu0 %v110_v2  ;;  %v202_v2 = vld [vmem:[%s5866_s0 + $0x5c8] sm:$0xff] }
  0xa0   :  { %1543 = vmatmul.mubr.f32.gmra.mrb[46].mxu1 %v109_v3  ;;  %668 = vmatmul.mubr.f32.gmra.mrb[46].mxu0 %v109_v3  ;;  %v201_v3 = vld [vmem:[%s5866_s0 + $0x5c0] sm:$0xff] }
  0xa1   :  { %1547 = vmatprep.mubr.f32.mxu1 %v114_v4  ;;  %673 = vmatprep.mubr.f32.mxu0 %v114_v4  ;;  %v206_v4 = vld [vmem:[%s5866_s0 + $0x5e8] sm:$0xff] }
  0xa4   :  { %1548 = vmatmul.mubr.f32.gmra.mrb[48].mxu1 %v113_v5  ;;  %674 = vmatmul.mubr.f32.gmra.mrb[48].mxu0 %v113_v5  ;;  %v205_v5 = vld [vmem:[%s5866_s0 + $0x5e0] sm:$0xff] }
  0xa5   :  { %1552 = vmatprep.mubr.f32.mxu1 %v118_v6  ;;  %679 = vmatprep.mubr.f32.mxu0 %v118_v6  ;;  %v210_v6 = vld [vmem:[%s5866_s0 + $0x608] sm:$0xff] }
  0xa8   :  { %1553 = vmatmul.mubr.f32.gmra.mrb[50].mxu1 %v117_v10  ;;  %680 = vmatmul.mubr.f32.gmra.mrb[50].mxu0 %v117_v10  ;;  %v218_v10 = vld [vmem:[%s5866_s0 + $0x648] sm:$0xff] }
  0xa9   :  { %1557 = vmatprep.mubr.f32.mxu1 %v122_v14  ;;  %685 = vmatprep.mubr.f32.mxu0 %v122_v14  ;;  %v226_v14 = vld [vmem:[%s5866_s0 + $0x688] sm:$0xff] }
  0xac   :  { %1558 = vmatmul.mubr.f32.gmra.mrb[52].mxu1 %v121_v18  ;;  %686 = vmatmul.mubr.f32.gmra.mrb[52].mxu0 %v121_v18  ;;  %v234_v18 = vld [vmem:[%s5866_s0 + $0x6c8] sm:$0xff] }
  0xad   :  { %1562 = vmatprep.mubr.f32.mxu1 %v126_v19  ;;  %691 = vmatprep.mubr.f32.mxu0 %v126_v19  ;;  %v233_v19 = vld [vmem:[%s5866_s0 + $0x6c0] sm:$0xff] }
  0xb0   :  { %1563 = vmatmul.mubr.f32.gmra.mrb[54].mxu1 %v125_v20  ;;  %692 = vmatmul.mubr.f32.gmra.mrb[54].mxu0 %v125_v20  ;;  %v238_v20 = vld [vmem:[%s5866_s0 + $0x6e8] sm:$0xff] }
  0xb1   :  { %1567 = vmatprep.mubr.f32.mxu1 %v130_v21  ;;  %697 = vmatprep.mubr.f32.mxu0 %v130_v21  ;;  %v237_v21 = vld [vmem:[%s5866_s0 + $0x6e0] sm:$0xff] }
  0xb4   :  { %1568 = vmatmul.mubr.f32.gmra.mrb[56].mxu1 %v129_v0  ;;  %698 = vmatmul.mubr.f32.gmra.mrb[56].mxu0 %v129_v0  ;;  %v242_v0 = vld [vmem:[%s5866_s0 + $0x708] sm:$0xff] }
  0xb5   :  { %1572 = vmatprep.mubr.f32.mxu1 %v134_v22  ;;  %703 = vmatprep.mubr.f32.mxu0 %v134_v22  ;;  %v241_v22 = vld [vmem:[%s5866_s0 + $0x700] sm:$0xff] }
  0xb8   :  { %1573 = vmatmul.mubr.f32.gmra.mrb[58].mxu1 %v133_v26  ;;  %704 = vmatmul.mubr.f32.gmra.mrb[58].mxu0 %v133_v26  ;;  %v249_v26 = vld [vmem:[%s5866_s0 + $0x740] sm:$0xff] }
  0xb9   :  { %1577 = vmatprep.mubr.f32.mxu1 %v138_v30  ;;  %709 = vmatprep.mubr.f32.mxu0 %v138_v30  ;;  %v257_v30 = vld [vmem:[%s5866_s0 + $0x780] sm:$0xff] }
  0xbc   :  { %1578 = vmatmul.mubr.f32.gmra.mrb[60].mxu1 %v137_v34  ;;  %710 = vmatmul.mubr.f32.gmra.mrb[60].mxu0 %v137_v34  ;;  %v265_v34 = vld [vmem:[%s5866_s0 + $0x7c0] sm:$0xff] }
  0xbd   :  { %1582 = vmatprep.mubr.f32.mxu1 %v142_v35  ;;  %715 = vmatprep.mubr.f32.mxu0 %v142_v35  ;;  %v270_v35 = vld [vmem:[%s5866_s0 + $0x7e8] sm:$0xff] }
  0xc0   :  { %1583 = vmatmul.mubr.f32.gmra.mrb[62].mxu1 %v141_v36  ;;  %716 = vmatmul.mubr.f32.gmra.mrb[62].mxu0 %v141_v36  ;;  %v269_v36 = vld [vmem:[%s5866_s0 + $0x7e0] sm:$0xff] }
  0xc1   :  { %1587 = vmatprep.mubr.f32.mxu1 %v146_v37  ;;  %721 = vmatprep.mubr.f32.mxu0 %v146_v37  ;;  %v20_v37 = vld [vmem:[%s5866_s0 + $0x18] sm:$0xff] }
  0xc4   :  { %1588 = vmatmul.mubr.f32.gmra.mrb[64].mxu1 %v145_v38  ;;  %722 = vmatmul.mubr.f32.gmra.mrb[64].mxu0 %v145_v38  ;;  %v19_v38 = vld [vmem:[%s5866_s0 + $0x10] sm:$0xff] }
  0xc5   :  { %1592 = vmatprep.mubr.f32.mxu1 %v150_v39  ;;  %727 = vmatprep.mubr.f32.mxu0 %v150_v39  ;;  %v24_v39 = vld [vmem:[%s5866_s0 + $0x38] sm:$0xff] }
  0xc8   :  { %1593 = vmatmul.mubr.f32.gmra.mrb[66].mxu1 %v149_v40  ;;  %728 = vmatmul.mubr.f32.gmra.mrb[66].mxu0 %v149_v40  ;;  %v23_v40 = vld [vmem:[%s5866_s0 + $0x30] sm:$0xff] }
  0xc9   :  { %1597 = vmatprep.mubr.f32.mxu1 %v154_v41  ;;  %733 = vmatprep.mubr.f32.mxu0 %v154_v41  ;;  %v28_v41 = vld [vmem:[%s5866_s0 + $0x58] sm:$0xff] }
  0xcc   :  { %1598 = vmatmul.mubr.f32.gmra.mrb[68].mxu1 %v153_v42  ;;  %734 = vmatmul.mubr.f32.gmra.mrb[68].mxu0 %v153_v42  ;;  %v27_v42 = vld [vmem:[%s5866_s0 + $0x50] sm:$0xff] }
  0xcd   :  { %1602 = vmatprep.mubr.f32.mxu1 %v158_v43  ;;  %739 = vmatprep.mubr.f32.mxu0 %v158_v43  ;;  %v32_v43 = vld [vmem:[%s5866_s0 + $0x78] sm:$0xff] }
  0xd0   :  { %1603 = vmatmul.mubr.f32.gmra.mrb[70].mxu1 %v157_v44  ;;  %740 = vmatmul.mubr.f32.gmra.mrb[70].mxu0 %v157_v44  ;;  %v31_v44 = vld [vmem:[%s5866_s0 + $0x70] sm:$0xff] }
  0xd1   :  { %1607 = vmatprep.mubr.f32.mxu1 %v162_v45  ;;  %745 = vmatprep.mubr.f32.mxu0 %v162_v45  ;;  %v36_v45 = vld [vmem:[%s5866_s0 + $0x98] sm:$0xff] }
  0xd4   :  { %1608 = vmatmul.mubr.f32.gmra.mrb[72].mxu1 %v161_v46  ;;  %746 = vmatmul.mubr.f32.gmra.mrb[72].mxu0 %v161_v46  ;;  %v35_v46 = vld [vmem:[%s5866_s0 + $0x90] sm:$0xff] }
  0xd5   :  { %1612 = vmatprep.mubr.f32.mxu1 %v166_v47  ;;  %751 = vmatprep.mubr.f32.mxu0 %v166_v47  ;;  %v40_v47 = vld [vmem:[%s5866_s0 + $0xb8] sm:$0xff] }
  0xd8   :  { %1613 = vmatmul.mubr.f32.gmra.mrb[74].mxu1 %v165_v48  ;;  %752 = vmatmul.mubr.f32.gmra.mrb[74].mxu0 %v165_v48  ;;  %v39_v48 = vld [vmem:[%s5866_s0 + $0xb0] sm:$0xff] }
  0xd9   :  { %1617 = vmatprep.mubr.f32.mxu1 %v170_v49  ;;  %757 = vmatprep.mubr.f32.mxu0 %v170_v49  ;;  %v44_v49 = vld [vmem:[%s5866_s0 + $0xd8] sm:$0xff] }
  0xdc   :  { %1618 = vmatmul.mubr.f32.gmra.mrb[76].mxu1 %v169_v50  ;;  %758 = vmatmul.mubr.f32.gmra.mrb[76].mxu0 %v169_v50  ;;  %v43_v50 = vld [vmem:[%s5866_s0 + $0xd0] sm:$0xff] }
  0xdd   :  { %1622 = vmatprep.mubr.f32.mxu1 %v174_v51  ;;  %763 = vmatprep.mubr.f32.mxu0 %v174_v51  ;;  %v48_v51 = vld [vmem:[%s5866_s0 + $0xf8] sm:$0xff] }
  0xe0   :  { %1623 = vmatmul.mubr.f32.gmra.mrb[78].mxu1 %v173_v52  ;;  %764 = vmatmul.mubr.f32.gmra.mrb[78].mxu0 %v173_v52  ;;  %v47_v52 = vld [vmem:[%s5866_s0 + $0xf0] sm:$0xff] }
  0xe1   :  { %1627 = vmatprep.mubr.f32.mxu1 %v178_v53  ;;  %769 = vmatprep.mubr.f32.mxu0 %v178_v53  ;;  %v52_v53 = vld [vmem:[%s5866_s0 + $0x118] sm:$0xff] }
  0xe4   :  { %1628 = vmatmul.mubr.f32.gmra.mrb[80].mxu1 %v177_v54  ;;  %770 = vmatmul.mubr.f32.gmra.mrb[80].mxu0 %v177_v54  ;;  %v51_v54 = vld [vmem:[%s5866_s0 + $0x110] sm:$0xff] }
  0xe5   :  { %1632 = vmatprep.mubr.f32.mxu1 %v182_v55  ;;  %775 = vmatprep.mubr.f32.mxu0 %v182_v55  ;;  %v56_v55 = vld [vmem:[%s5866_s0 + $0x138] sm:$0xff] }
  0xe8   :  { %1633 = vmatmul.mubr.f32.gmra.mrb[82].mxu1 %v181_v56  ;;  %776 = vmatmul.mubr.f32.gmra.mrb[82].mxu0 %v181_v56  ;;  %v55_v56 = vld [vmem:[%s5866_s0 + $0x130] sm:$0xff] }
  0xe9   :  { %1637 = vmatprep.mubr.f32.mxu1 %v186_v57  ;;  %781 = vmatprep.mubr.f32.mxu0 %v186_v57  ;;  %v60_v57 = vld [vmem:[%s5866_s0 + $0x158] sm:$0xff] }
  0xec   :  { %1638 = vmatmul.mubr.f32.gmra.mrb[84].mxu1 %v185_v58  ;;  %782 = vmatmul.mubr.f32.gmra.mrb[84].mxu0 %v185_v58  ;;  %v59_v58 = vld [vmem:[%s5866_s0 + $0x150] sm:$0xff] }
  0xed   :  { %1642 = vmatprep.mubr.f32.mxu1 %v190_v59  ;;  %787 = vmatprep.mubr.f32.mxu0 %v190_v59  ;;  %v64_v59 = vld [vmem:[%s5866_s0 + $0x178] sm:$0xff] }
  0xf0   :  { %1643 = vmatmul.mubr.f32.gmra.mrb[86].mxu1 %v189_v60  ;;  %788 = vmatmul.mubr.f32.gmra.mrb[86].mxu0 %v189_v60  ;;  %v63_v60 = vld [vmem:[%s5866_s0 + $0x170] sm:$0xff] }
  0xf1   :  { %1647 = vmatprep.mubr.f32.mxu1 %v194_v61  ;;  %793 = vmatprep.mubr.f32.mxu0 %v194_v61  ;;  %v68_v61 = vld [vmem:[%s5866_s0 + $0x198] sm:$0xff] }
  0xf4   :  { %1648 = vmatmul.mubr.f32.gmra.mrb[88].mxu1 %v193_v62  ;;  %794 = vmatmul.mubr.f32.gmra.mrb[88].mxu0 %v193_v62  ;;  %v67_v62 = vld [vmem:[%s5866_s0 + $0x190] sm:$0xff] }
  0xf5   :  { %1652 = vmatprep.mubr.f32.mxu1 %v198_v63  ;;  %799 = vmatprep.mubr.f32.mxu0 %v198_v63  ;;  %v72_v63 = vld [vmem:[%s5866_s0 + $0x1b8] sm:$0xff] }
  0xf8   :  { %1653 = vmatmul.mubr.f32.gmra.mrb[90].mxu1 %v197_v1  ;;  %800 = vmatmul.mubr.f32.gmra.mrb[90].mxu0 %v197_v1  ;;  %v71_v1 = vld [vmem:[%s5866_s0 + $0x1b0] sm:$0xff] }
  0xf9   :  { %1657 = vmatprep.mubr.f32.mxu1 %v202_v2  ;;  %805 = vmatprep.mubr.f32.mxu0 %v202_v2  ;;  %v76_v2 = vld [vmem:[%s5866_s0 + $0x1d8] sm:$0xff] }
  0xfc   :  { %1658 = vmatmul.mubr.f32.gmra.mrb[92].mxu1 %v201_v3  ;;  %806 = vmatmul.mubr.f32.gmra.mrb[92].mxu0 %v201_v3  ;;  %v75_v3 = vld [vmem:[%s5866_s0 + $0x1d0] sm:$0xff] }
  0xfd   :  { %1662 = vmatprep.mubr.f32.mxu1 %v206_v4  ;;  %811 = vmatprep.mubr.f32.mxu0 %v206_v4  ;;  %v80_v4 = vld [vmem:[%s5866_s0 + $0x1f8] sm:$0xff] }
 0x100   :  { %1663 = vmatmul.mubr.f32.gmra.mrb[94].mxu1 %v205_v5  ;;  %812 = vmatmul.mubr.f32.gmra.mrb[94].mxu0 %v205_v5  ;;  %v79_v5 = vld [vmem:[%s5866_s0 + $0x1f0] sm:$0xff] }
 0x101   :  { %1667 = vmatprep.mubr.f32.mxu1 %v210_v6  ;;  %817 = vmatprep.mubr.f32.mxu0 %v210_v6  ;;  %v84_v6 = vld [vmem:[%s5866_s0 + $0x218] sm:$0xff] }
 0x104   :  { %1668 = vmatmul.mubr.f32.gmra.mrb[96].mxu1 %v209_v7  ;;  %818 = vmatmul.mubr.f32.gmra.mrb[96].mxu0 %v209_v7  ;;  %v83_v7 = vld [vmem:[%s5866_s0 + $0x210] sm:$0xff] }
 0x105   :  { %1672 = vmatprep.mubr.f32.mxu1 %v214_v8  ;;  %823 = vmatprep.mubr.f32.mxu0 %v214_v8  ;;  %v88_v8 = vld [vmem:[%s5866_s0 + $0x238] sm:$0xff] }
 0x108   :  { %1673 = vmatmul.mubr.f32.gmra.mrb[98].mxu1 %v213_v9  ;;  %824 = vmatmul.mubr.f32.gmra.mrb[98].mxu0 %v213_v9  ;;  %v87_v9 = vld [vmem:[%s5866_s0 + $0x230] sm:$0xff] }
 0x109   :  { %1677 = vmatprep.mubr.f32.mxu1 %v218_v10  ;;  %829 = vmatprep.mubr.f32.mxu0 %v218_v10  ;;  %v92_v10 = vld [vmem:[%s5866_s0 + $0x258] sm:$0xff] }
 0x10c   :  { %1678 = vmatmul.mubr.f32.gmra.mrb[100].mxu1 %v217_v11  ;;  %830 = vmatmul.mubr.f32.gmra.mrb[100].mxu0 %v217_v11  ;;  %v91_v11 = vld [vmem:[%s5866_s0 + $0x250] sm:$0xff] }
 0x10d   :  { %1682 = vmatprep.mubr.f32.mxu1 %v222_v12  ;;  %835 = vmatprep.mubr.f32.mxu0 %v222_v12  ;;  %v96_v12 = vld [vmem:[%s5866_s0 + $0x278] sm:$0xff] }
 0x110   :  { %1683 = vmatmul.mubr.f32.gmra.mrb[102].mxu1 %v221_v13  ;;  %836 = vmatmul.mubr.f32.gmra.mrb[102].mxu0 %v221_v13  ;;  %v95_v13 = vld [vmem:[%s5866_s0 + $0x270] sm:$0xff] }
 0x111   :  { %1687 = vmatprep.mubr.f32.mxu1 %v226_v14  ;;  %841 = vmatprep.mubr.f32.mxu0 %v226_v14  ;;  %v100_v14 = vld [vmem:[%s5866_s0 + $0x298] sm:$0xff] }
 0x114   :  { %1688 = vmatmul.mubr.f32.gmra.mrb[104].mxu1 %v225_v15  ;;  %842 = vmatmul.mubr.f32.gmra.mrb[104].mxu0 %v225_v15  ;;  %v99_v15 = vld [vmem:[%s5866_s0 + $0x290] sm:$0xff] }
 0x115   :  { %1692 = vmatprep.mubr.f32.mxu1 %v230_v16  ;;  %847 = vmatprep.mubr.f32.mxu0 %v230_v16  ;;  %v104_v16 = vld [vmem:[%s5866_s0 + $0x2b8] sm:$0xff] }
 0x118   :  { %1693 = vmatmul.mubr.f32.gmra.mrb[106].mxu1 %v229_v17  ;;  %848 = vmatmul.mubr.f32.gmra.mrb[106].mxu0 %v229_v17  ;;  %v103_v17 = vld [vmem:[%s5866_s0 + $0x2b0] sm:$0xff] }
 0x119   :  { %1697 = vmatprep.mubr.f32.mxu1 %v234_v18  ;;  %853 = vmatprep.mubr.f32.mxu0 %v234_v18  ;;  %v108_v18 = vld [vmem:[%s5866_s0 + $0x2d8] sm:$0xff] }
 0x11c   :  { %1698 = vmatmul.mubr.f32.gmra.mrb[108].mxu1 %v233_v19  ;;  %854 = vmatmul.mubr.f32.gmra.mrb[108].mxu0 %v233_v19  ;;  %v107_v19 = vld [vmem:[%s5866_s0 + $0x2d0] sm:$0xff] }
 0x11d   :  { %1702 = vmatprep.mubr.f32.mxu1 %v238_v20  ;;  %859 = vmatprep.mubr.f32.mxu0 %v238_v20  ;;  %v112_v20 = vld [vmem:[%s5866_s0 + $0x2f8] sm:$0xff] }
 0x120   :  { %1703 = vmatmul.mubr.f32.gmra.mrb[110].mxu1 %v237_v21  ;;  %860 = vmatmul.mubr.f32.gmra.mrb[110].mxu0 %v237_v21  ;;  %v111_v21 = vld [vmem:[%s5866_s0 + $0x2f0] sm:$0xff] }
 0x121   :  { %1707 = vmatprep.mubr.f32.mxu1 %v242_v0  ;;  %865 = vmatprep.mubr.f32.mxu0 %v242_v0  ;;  %v116_v0 = vld [vmem:[%s5866_s0 + $0x318] sm:$0xff] }
 0x124   :  { %1708 = vmatmul.mubr.f32.gmra.mrb[112].mxu1 %v241_v22  ;;  %866 = vmatmul.mubr.f32.gmra.mrb[112].mxu0 %v241_v22  ;;  %v115_v22 = vld [vmem:[%s5866_s0 + $0x310] sm:$0xff] }
 0x125   :  { %1712 = vmatprep.mubr.f32.mxu1 %v246_v23  ;;  %871 = vmatprep.mubr.f32.mxu0 %v246_v23  ;;  %v120_v23 = vld [vmem:[%s5866_s0 + $0x338] sm:$0xff] }
 0x128   :  { %1713 = vmatmul.mubr.f32.gmra.mrb[114].mxu1 %v245_v24  ;;  %872 = vmatmul.mubr.f32.gmra.mrb[114].mxu0 %v245_v24  ;;  %v119_v24 = vld [vmem:[%s5866_s0 + $0x330] sm:$0xff] }
 0x129   :  { %1717 = vmatprep.mubr.f32.mxu1 %v250_v25  ;;  %877 = vmatprep.mubr.f32.mxu0 %v250_v25  ;;  %v124_v25 = vld [vmem:[%s5866_s0 + $0x358] sm:$0xff] }
 0x12c   :  { %1718 = vmatmul.mubr.f32.gmra.mrb[116].mxu1 %v249_v26  ;;  %878 = vmatmul.mubr.f32.gmra.mrb[116].mxu0 %v249_v26  ;;  %v123_v26 = vld [vmem:[%s5866_s0 + $0x350] sm:$0xff] }
 0x12d   :  { %1722 = vmatprep.mubr.f32.mxu1 %v254_v27  ;;  %883 = vmatprep.mubr.f32.mxu0 %v254_v27  ;;  %v128_v27 = vld [vmem:[%s5866_s0 + $0x378] sm:$0xff] }
 0x130   :  { %1723 = vmatmul.mubr.f32.gmra.mrb[118].mxu1 %v253_v28  ;;  %884 = vmatmul.mubr.f32.gmra.mrb[118].mxu0 %v253_v28  ;;  %v127_v28 = vld [vmem:[%s5866_s0 + $0x370] sm:$0xff] }
 0x131   :  { %1727 = vmatprep.mubr.f32.mxu1 %v258_v29  ;;  %889 = vmatprep.mubr.f32.mxu0 %v258_v29  ;;  %v132_v29 = vld [vmem:[%s5866_s0 + $0x398] sm:$0xff] }
 0x134   :  { %1728 = vmatmul.mubr.f32.gmra.mrb[120].mxu1 %v257_v30  ;;  %890 = vmatmul.mubr.f32.gmra.mrb[120].mxu0 %v257_v30  ;;  %v131_v30 = vld [vmem:[%s5866_s0 + $0x390] sm:$0xff] }
 0x135   :  { %1732 = vmatprep.mubr.f32.mxu1 %v262_v31  ;;  %895 = vmatprep.mubr.f32.mxu0 %v262_v31  ;;  %v136_v31 = vld [vmem:[%s5866_s0 + $0x3b8] sm:$0xff] }
 0x138   :  { %1733 = vmatmul.mubr.f32.gmra.mrb[122].mxu1 %v261_v32  ;;  %896 = vmatmul.mubr.f32.gmra.mrb[122].mxu0 %v261_v32  ;;  %v135_v32 = vld [vmem:[%s5866_s0 + $0x3b0] sm:$0xff] }
 0x139   :  { %1737 = vmatprep.mubr.f32.mxu1 %v266_v33  ;;  %901 = vmatprep.mubr.f32.mxu0 %v266_v33  ;;  %v140_v33 = vld [vmem:[%s5866_s0 + $0x3d8] sm:$0xff] }
 0x13c   :  { %1738 = vmatmul.mubr.f32.gmra.mrb[124].mxu1 %v265_v34  ;;  %902 = vmatmul.mubr.f32.gmra.mrb[124].mxu0 %v265_v34  ;;  %v139_v34 = vld [vmem:[%s5866_s0 + $0x3d0] sm:$0xff] }
 0x13d   :  { %1742 = vmatprep.mubr.f32.mxu1 %v270_v35  ;;  %907 = vmatprep.mubr.f32.mxu0 %v270_v35  ;;  %v144_v35 = vld [vmem:[%s5866_s0 + $0x3f8] sm:$0xff] }
 0x140   :  { %1743 = vmatmul.mubr.f32.gmra.mrb[126].mxu1 %v269_v36  ;;  %908 = vmatmul.mubr.f32.gmra.mrb[126].mxu0 %v269_v36  ;;  %v143_v36 = vld [vmem:[%s5866_s0 + $0x3f0] sm:$0xff] }
 0x141   :  { %1812 = vmatprep.mubr.f32.mxu1 %v20_v37  ;;  %978 = vmatprep.mubr.f32.mxu0 %v20_v37  ;;  %v148_v37 = vld [vmem:[%s5866_s0 + $0x418] sm:$0xff] }
 0x144   :  { %1813 = vmatmul.mubr.f32.vlgmr.msra.gmra.mrb[0].mxu1 %v19_v38  ;;  %979 = vmatmul.mubr.f32.vlgmr.msra.gmra.mrb[0].mxu0 %v19_v38  ;;  %v147_v38 = vld [vmem:[%s5866_s0 + $0x410] sm:$0xff] }
 0x145   :  { %1817 = vmatprep.mubr.f32.mxu1 %v24_v39  ;;  %984 = vmatprep.mubr.f32.mxu0 %v24_v39  ;;  %v152_v39 = vld [vmem:[%s5866_s0 + $0x438] sm:$0xff] }
 0x148   :  { %1818 = vmatmul.mubr.f32.gmra.mrb[2].mxu1 %v23_v40  ;;  %985 = vmatmul.mubr.f32.gmra.mrb[2].mxu0 %v23_v40  ;;  %v151_v40 = vld [vmem:[%s5866_s0 + $0x430] sm:$0xff] }
 0x149   :  { %1822 = vmatprep.mubr.f32.mxu1 %v28_v41  ;;  %990 = vmatprep.mubr.f32.mxu0 %v28_v41  ;;  %v156_v41 = vld [vmem:[%s5866_s0 + $0x458] sm:$0xff] }
 0x14c   :  { %1823 = vmatmul.mubr.f32.gmra.mrb[4].mxu1 %v27_v42  ;;  %991 = vmatmul.mubr.f32.gmra.mrb[4].mxu0 %v27_v42  ;;  %v155_v42 = vld [vmem:[%s5866_s0 + $0x450] sm:$0xff] }
 0x14d   :  { %1827 = vmatprep.mubr.f32.mxu1 %v32_v43  ;;  %996 = vmatprep.mubr.f32.mxu0 %v32_v43  ;;  %v160_v43 = vld [vmem:[%s5866_s0 + $0x478] sm:$0xff] }
 0x150   :  { %1828 = vmatmul.mubr.f32.gmra.mrb[6].mxu1 %v31_v44  ;;  %997 = vmatmul.mubr.f32.gmra.mrb[6].mxu0 %v31_v44  ;;  %v159_v44 = vld [vmem:[%s5866_s0 + $0x470] sm:$0xff] }
 0x151   :  { %1832 = vmatprep.mubr.f32.mxu1 %v36_v45  ;;  %1002 = vmatprep.mubr.f32.mxu0 %v36_v45  ;;  %v164_v45 = vld [vmem:[%s5866_s0 + $0x498] sm:$0xff] }
 0x154   :  { %1833 = vmatmul.mubr.f32.gmra.mrb[8].mxu1 %v35_v46  ;;  %1003 = vmatmul.mubr.f32.gmra.mrb[8].mxu0 %v35_v46  ;;  %v163_v46 = vld [vmem:[%s5866_s0 + $0x490] sm:$0xff] }
 0x155   :  { %1837 = vmatprep.mubr.f32.mxu1 %v40_v47  ;;  %1008 = vmatprep.mubr.f32.mxu0 %v40_v47  ;;  %v168_v47 = vld [vmem:[%s5866_s0 + $0x4b8] sm:$0xff] }
 0x158   :  { %1838 = vmatmul.mubr.f32.gmra.mrb[10].mxu1 %v39_v48  ;;  %1009 = vmatmul.mubr.f32.gmra.mrb[10].mxu0 %v39_v48  ;;  %v167_v48 = vld [vmem:[%s5866_s0 + $0x4b0] sm:$0xff] }
 0x159   :  { %1842 = vmatprep.mubr.f32.mxu1 %v44_v49  ;;  %1014 = vmatprep.mubr.f32.mxu0 %v44_v49  ;;  %v172_v49 = vld [vmem:[%s5866_s0 + $0x4d8] sm:$0xff] }
 0x15c   :  { %1843 = vmatmul.mubr.f32.gmra.mrb[12].mxu1 %v43_v50  ;;  %1015 = vmatmul.mubr.f32.gmra.mrb[12].mxu0 %v43_v50  ;;  %v171_v50 = vld [vmem:[%s5866_s0 + $0x4d0] sm:$0xff] }
 0x15d   :  { %1847 = vmatprep.mubr.f32.mxu1 %v48_v51  ;;  %1020 = vmatprep.mubr.f32.mxu0 %v48_v51  ;;  %v176_v51 = vld [vmem:[%s5866_s0 + $0x4f8] sm:$0xff] }
 0x160   :  { %1848 = vmatmul.mubr.f32.gmra.mrb[14].mxu1 %v47_v52  ;;  %1021 = vmatmul.mubr.f32.gmra.mrb[14].mxu0 %v47_v52  ;;  %v175_v52 = vld [vmem:[%s5866_s0 + $0x4f0] sm:$0xff] }
 0x161   :  { %1852 = vmatprep.mubr.f32.mxu1 %v52_v53  ;;  %1026 = vmatprep.mubr.f32.mxu0 %v52_v53  ;;  %v180_v53 = vld [vmem:[%s5866_s0 + $0x518] sm:$0xff] }
 0x164   :  { %1853 = vmatmul.mubr.f32.gmra.mrb[16].mxu1 %v51_v54  ;;  %1027 = vmatmul.mubr.f32.gmra.mrb[16].mxu0 %v51_v54  ;;  %v179_v54 = vld [vmem:[%s5866_s0 + $0x510] sm:$0xff] }
 0x165   :  { %1857 = vmatprep.mubr.f32.mxu1 %v56_v55  ;;  %1032 = vmatprep.mubr.f32.mxu0 %v56_v55  ;;  %v184_v55 = vld [vmem:[%s5866_s0 + $0x538] sm:$0xff] }
 0x168   :  { %1858 = vmatmul.mubr.f32.gmra.mrb[18].mxu1 %v55_v56  ;;  %1033 = vmatmul.mubr.f32.gmra.mrb[18].mxu0 %v55_v56  ;;  %v183_v56 = vld [vmem:[%s5866_s0 + $0x530] sm:$0xff] }
 0x169   :  { %1862 = vmatprep.mubr.f32.mxu1 %v60_v57  ;;  %1038 = vmatprep.mubr.f32.mxu0 %v60_v57  ;;  %v188_v57 = vld [vmem:[%s5866_s0 + $0x558] sm:$0xff] }
 0x16c   :  { %1863 = vmatmul.mubr.f32.gmra.mrb[20].mxu1 %v59_v58  ;;  %1039 = vmatmul.mubr.f32.gmra.mrb[20].mxu0 %v59_v58  ;;  %v187_v58 = vld [vmem:[%s5866_s0 + $0x550] sm:$0xff] }
 0x16d   :  { %1867 = vmatprep.mubr.f32.mxu1 %v64_v59  ;;  %1044 = vmatprep.mubr.f32.mxu0 %v64_v59  ;;  %v192_v59 = vld [vmem:[%s5866_s0 + $0x578] sm:$0xff] }
 0x170   :  { %1868 = vmatmul.mubr.f32.gmra.mrb[22].mxu1 %v63_v60  ;;  %1045 = vmatmul.mubr.f32.gmra.mrb[22].mxu0 %v63_v60  ;;  %v191_v60 = vld [vmem:[%s5866_s0 + $0x570] sm:$0xff] }
 0x171   :  { %1872 = vmatprep.mubr.f32.mxu1 %v68_v61  ;;  %1050 = vmatprep.mubr.f32.mxu0 %v68_v61  ;;  %v196_v61 = vld [vmem:[%s5866_s0 + $0x598] sm:$0xff] }
 0x174   :  { %1873 = vmatmul.mubr.f32.gmra.mrb[24].mxu1 %v67_v62  ;;  %1051 = vmatmul.mubr.f32.gmra.mrb[24].mxu0 %v67_v62  ;;  %v195_v62 = vld [vmem:[%s5866_s0 + $0x590] sm:$0xff] }
 0x175   :  { %1877 = vmatprep.mubr.f32.mxu1 %v72_v63  ;;  %1056 = vmatprep.mubr.f32.mxu0 %v72_v63  ;;  %v200_v63 = vld [vmem:[%s5866_s0 + $0x5b8] sm:$0xff] }
 0x178   :  { %1878 = vmatmul.mubr.f32.gmra.mrb[26].mxu1 %v71_v1  ;;  %1057 = vmatmul.mubr.f32.gmra.mrb[26].mxu0 %v71_v1  ;;  %v199_v1 = vld [vmem:[%s5866_s0 + $0x5b0] sm:$0xff] }
 0x179   :  { %1882 = vmatprep.mubr.f32.mxu1 %v76_v2  ;;  %1062 = vmatprep.mubr.f32.mxu0 %v76_v2  ;;  %v204_v2 = vld [vmem:[%s5866_s0 + $0x5d8] sm:$0xff] }
 0x17c   :  { %1883 = vmatmul.mubr.f32.gmra.mrb[28].mxu1 %v75_v3  ;;  %1063 = vmatmul.mubr.f32.gmra.mrb[28].mxu0 %v75_v3  ;;  %v203_v3 = vld [vmem:[%s5866_s0 + $0x5d0] sm:$0xff] }
 0x17d   :  { %1887 = vmatprep.mubr.f32.mxu1 %v80_v4  ;;  %1068 = vmatprep.mubr.f32.mxu0 %v80_v4  ;;  %v208_v4 = vld [vmem:[%s5866_s0 + $0x5f8] sm:$0xff] }
 0x180   :  { %1888 = vmatmul.mubr.f32.gmra.mrb[30].mxu1 %v79_v5  ;;  %1069 = vmatmul.mubr.f32.gmra.mrb[30].mxu0 %v79_v5  ;;  %v207_v5 = vld [vmem:[%s5866_s0 + $0x5f0] sm:$0xff] }
 0x181   :  { %1892 = vmatprep.mubr.f32.mxu1 %v84_v6  ;;  %1074 = vmatprep.mubr.f32.mxu0 %v84_v6  ;;  %v212_v6 = vld [vmem:[%s5866_s0 + $0x618] sm:$0xff] }
 0x184   :  { %1893 = vmatmul.mubr.f32.gmra.mrb[32].mxu1 %v83_v7  ;;  %1075 = vmatmul.mubr.f32.gmra.mrb[32].mxu0 %v83_v7  ;;  %v211_v7 = vld [vmem:[%s5866_s0 + $0x610] sm:$0xff] }
 0x185   :  { %1897 = vmatprep.mubr.f32.mxu1 %v88_v8  ;;  %1080 = vmatprep.mubr.f32.mxu0 %v88_v8  ;;  %v216_v8 = vld [vmem:[%s5866_s0 + $0x638] sm:$0xff] }
 0x188   :  { %1898 = vmatmul.mubr.f32.gmra.mrb[34].mxu1 %v87_v9  ;;  %1081 = vmatmul.mubr.f32.gmra.mrb[34].mxu0 %v87_v9  ;;  %v215_v9 = vld [vmem:[%s5866_s0 + $0x630] sm:$0xff] }
 0x189   :  { %1902 = vmatprep.mubr.f32.mxu1 %v92_v10  ;;  %1086 = vmatprep.mubr.f32.mxu0 %v92_v10  ;;  %v220_v10 = vld [vmem:[%s5866_s0 + $0x658] sm:$0xff] }
 0x18c   :  { %1903 = vmatmul.mubr.f32.gmra.mrb[36].mxu1 %v91_v11  ;;  %1087 = vmatmul.mubr.f32.gmra.mrb[36].mxu0 %v91_v11  ;;  %v2135_v11 = vlaneseq }
 0x18d   :  { %1907 = vmatprep.mubr.f32.mxu1 %v96_v12  ;;  %1092 = vmatprep.mubr.f32.mxu0 %v96_v12  ;;  %v219_v12 = vld [vmem:[%s5866_s0 + $0x650] sm:$0xff] }
 0x190   :  { %1908 = vmatmul.mubr.f32.gmra.mrb[38].mxu1 %v95_v13  ;;  %1093 = vmatmul.mubr.f32.gmra.mrb[38].mxu0 %v95_v13  ;;  %v224_v13 = vld [vmem:[%s5866_s0 + $0x678] sm:$0xff] }
 0x191   :  { %1912 = vmatprep.mubr.f32.mxu1 %v100_v14  ;;  %1098 = vmatprep.mubr.f32.mxu0 %v100_v14  ;;  %v2136_v14 = vshrl.u32 %v2135_v11, 7 }
 0x194   :  { %1913 = vmatmul.mubr.f32.gmra.mrb[40].mxu1 %v99_v15  ;;  %1099 = vmatmul.mubr.f32.gmra.mrb[40].mxu0 %v99_v15  ;;  %v223_v15 = vld [vmem:[%s5866_s0 + $0x670] sm:$0xff] }
 0x195   :  { %1917 = vmatprep.mubr.f32.mxu1 %v104_v16  ;;  %1104 = vmatprep.mubr.f32.mxu0 %v104_v16  ;;  %v228_v16 = vld [vmem:[%s5866_s0 + $0x698] sm:$0xff] }
 0x198   :  { %1918 = vmatmul.mubr.f32.gmra.mrb[42].mxu1 %v103_v17  ;;  %1105 = vmatmul.mubr.f32.gmra.mrb[42].mxu0 %v103_v17  ;;  %v2145_v17 = vsub.s32 2, %v2136_v14 }
 0x199   :  { %1922 = vmatprep.mubr.f32.mxu1 %v108_v18  ;;  %1110 = vmatprep.mubr.f32.mxu0 %v108_v18  ;;  %v2137_v18 = vsub.s32 0, %v2136_v14 }
 0x19c   :  { %1923 = vmatmul.mubr.f32.gmra.mrb[44].mxu1 %v107_v19  ;;  %1111 = vmatmul.mubr.f32.gmra.mrb[44].mxu0 %v107_v19  ;;  %v227_v19 = vld [vmem:[%s5866_s0 + $0x690] sm:$0xff] }
 0x19d   :  { %1927 = vmatprep.mubr.f32.mxu1 %v112_v20  ;;  %1116 = vmatprep.mubr.f32.mxu0 %v112_v20  ;;  %v2133_v20 = vld [vmem:[%s5867_s2] sm:$0x7] }
 0x1a0   :  { %1928 = vmatmul.mubr.f32.gmra.mrb[46].mxu1 %v111_v21  ;;  %1117 = vmatmul.mubr.f32.gmra.mrb[46].mxu0 %v111_v21  ;;  %v2141_v21 = vsub.s32 1, %v2136_v14 }
 0x1a1   :  { %1932 = vmatprep.mubr.f32.mxu1 %v116_v0  ;;  %1122 = vmatprep.mubr.f32.mxu0 %v116_v0  ;;  %v232_v0 = vld [vmem:[%s5866_s0 + $0x6b8] sm:$0xff] }
 0x1a4   :  { %1933 = vmatmul.mubr.f32.gmra.mrb[48].mxu1 %v115_v22  ;;  %1123 = vmatmul.mubr.f32.gmra.mrb[48].mxu0 %v115_v22  ;;  %v2342_v22 = vld [vmem:[%s5868_s3] sm:$0x7] }
 0x1a5   :  { %1937 = vmatprep.mubr.f32.mxu1 %v120_v23  ;;  %1128 = vmatprep.mubr.f32.mxu0 %v120_v23  ;;  %v4766_v23 = vrot.slane %v2133_v20, %v2145_v17 }
 0x1a8   :  { %1938 = vmatmul.mubr.f32.gmra.mrb[50].mxu1 %v119_v24  ;;  %1129 = vmatmul.mubr.f32.gmra.mrb[50].mxu0 %v119_v24  ;;  %v4768_v24 = vrot.slane %v2133_v20, %v2137_v18 }
 0x1a9   :  { %1942 = vmatprep.mubr.f32.mxu1 %v124_v25  ;;  %1134 = vmatprep.mubr.f32.mxu0 %v124_v25  ;;  %v231_v25 = vld [vmem:[%s5866_s0 + $0x6b0] sm:$0xff] }
 0x1ac   :  { %1943 = vmatmul.mubr.f32.gmra.mrb[52].mxu1 %v123_v26  ;;  %1135 = vmatmul.mubr.f32.gmra.mrb[52].mxu0 %v123_v26  ;;  %v4773_v26 = vrot.slane %v2133_v20, %v2141_v21  ;;  %v247_v20 = vld [vmem:[%s5866_s0 + $0x730] sm:$0xff] }
 0x1ad   :  { %1947 = vmatprep.mubr.f32.mxu1 %v128_v27  ;;  %1140 = vmatprep.mubr.f32.mxu0 %v128_v27  ;;  %v4775_v27 = vrot.slane %v2342_v22, %v2145_v17 }
 0x1b0   :  { %1948 = vmatmul.mubr.f32.gmra.mrb[54].mxu1 %v127_v28  ;;  %1141 = vmatmul.mubr.f32.gmra.mrb[54].mxu0 %v127_v28  ;;  %v4777_v28 = vrot.slane %v2342_v22, %v2137_v18 }
 0x1b1   :  { %1952 = vmatprep.mubr.f32.mxu1 %v132_v29  ;;  %1146 = vmatprep.mubr.f32.mxu0 %v132_v29  ;;  %v236_v29 = vld [vmem:[%s5866_s0 + $0x6d8] sm:$0xff] }
 0x1b4   :  { %1953 = vmatmul.mubr.f32.gmra.mrb[56].mxu1 %v131_v30  ;;  %1147 = vmatmul.mubr.f32.gmra.mrb[56].mxu0 %v131_v30 }
 0x1b5   :  { %1957 = vmatprep.mubr.f32.mxu1 %v136_v31  ;;  %1152 = vmatprep.mubr.f32.mxu0 %v136_v31 }
 0x1b8   :  { %1958 = vmatmul.mubr.f32.gmra.mrb[58].mxu1 %v135_v32  ;;  %1153 = vmatmul.mubr.f32.gmra.mrb[58].mxu0 %v135_v32  ;;  %v4782_v32 = vrot.slane %v2342_v22, %v2141_v21  ;;  %v252_v22 = vld [vmem:[%s5866_s0 + $0x758] sm:$0xff] }
 0x1b9   :  { %1962 = vmatprep.mubr.f32.mxu1 %v140_v33  ;;  %1158 = vmatprep.mubr.f32.mxu0 %v140_v33 }
 0x1bc   :  { %1963 = vmatmul.mubr.f32.gmra.mrb[60].mxu1 %v139_v34  ;;  %1159 = vmatmul.mubr.f32.gmra.mrb[60].mxu0 %v139_v34 }
 0x1bd   :  { %1967 = vmatprep.mubr.f32.mxu1 %v144_v35  ;;  %1164 = vmatprep.mubr.f32.mxu0 %v144_v35 }
 0x1c0   :  { %1968 = vmatmul.mubr.f32.gmra.mrb[62].mxu1 %v143_v36  ;;  %1165 = vmatmul.mubr.f32.gmra.mrb[62].mxu0 %v143_v36 }
 0x1c1   :  { %1972 = vmatprep.mubr.f32.mxu1 %v148_v37  ;;  %1170 = vmatprep.mubr.f32.mxu0 %v148_v37 }
 0x1c4   :  { %1973 = vmatmul.mubr.f32.gmra.mrb[64].mxu1 %v147_v38  ;;  %1171 = vmatmul.mubr.f32.gmra.mrb[64].mxu0 %v147_v38  ;;  %v235_v38 = vld [vmem:[%s5866_s0 + $0x6d0] sm:$0xff] }
 0x1c5   :  { %1977 = vmatprep.mubr.f32.mxu1 %v152_v39  ;;  %1176 = vmatprep.mubr.f32.mxu0 %v152_v39 }
 0x1c8   :  { %1978 = vmatmul.mubr.f32.gmra.mrb[66].mxu1 %v151_v40  ;;  %1177 = vmatmul.mubr.f32.gmra.mrb[66].mxu0 %v151_v40 }
 0x1c9   :  { %1982 = vmatprep.mubr.f32.mxu1 %v156_v41  ;;  %1182 = vmatprep.mubr.f32.mxu0 %v156_v41  ;;  %v240_v41 = vld [vmem:[%s5866_s0 + $0x6f8] sm:$0xff] }
 0x1cc   :  { %1983 = vmatmul.mubr.f32.gmra.mrb[68].mxu1 %v155_v42  ;;  %1183 = vmatmul.mubr.f32.gmra.mrb[68].mxu0 %v155_v42 }
 0x1cd   :  { %1987 = vmatprep.mubr.f32.mxu1 %v160_v43  ;;  %1188 = vmatprep.mubr.f32.mxu0 %v160_v43 }
 0x1d0   :  { %1988 = vmatmul.mubr.f32.gmra.mrb[70].mxu1 %v159_v44  ;;  %1189 = vmatmul.mubr.f32.gmra.mrb[70].mxu0 %v159_v44 }
 0x1d1   :  { %1992 = vmatprep.mubr.f32.mxu1 %v164_v45  ;;  %1194 = vmatprep.mubr.f32.mxu0 %v164_v45 }
 0x1d4   :  { %1993 = vmatmul.mubr.f32.gmra.mrb[72].mxu1 %v163_v46  ;;  %1195 = vmatmul.mubr.f32.gmra.mrb[72].mxu0 %v163_v46 }
 0x1d5   :  { %1997 = vmatprep.mubr.f32.mxu1 %v168_v47  ;;  %1200 = vmatprep.mubr.f32.mxu0 %v168_v47 }
 0x1d8   :  { %1998 = vmatmul.mubr.f32.gmra.mrb[74].mxu1 %v167_v48  ;;  %1201 = vmatmul.mubr.f32.gmra.mrb[74].mxu0 %v167_v48 }
 0x1d9   :  { %2002 = vmatprep.mubr.f32.mxu1 %v172_v49  ;;  %1206 = vmatprep.mubr.f32.mxu0 %v172_v49 }
 0x1dc   :  { %2003 = vmatmul.mubr.f32.gmra.mrb[76].mxu1 %v171_v50  ;;  %1207 = vmatmul.mubr.f32.gmra.mrb[76].mxu0 %v171_v50 }
 0x1dd   :  { %2007 = vmatprep.mubr.f32.mxu1 %v176_v51  ;;  %1212 = vmatprep.mubr.f32.mxu0 %v176_v51 }
 0x1e0   :  { %2008 = vmatmul.mubr.f32.gmra.mrb[78].mxu1 %v175_v52  ;;  %1213 = vmatmul.mubr.f32.gmra.mrb[78].mxu0 %v175_v52 }
 0x1e1   :  { %2012 = vmatprep.mubr.f32.mxu1 %v180_v53  ;;  %1218 = vmatprep.mubr.f32.mxu0 %v180_v53  ;;  %v239_v53 = vld [vmem:[%s5866_s0 + $0x6f0] sm:$0xff] }
 0x1e4   :  { %2013 = vmatmul.mubr.f32.gmra.mrb[80].mxu1 %v179_v54  ;;  %1219 = vmatmul.mubr.f32.gmra.mrb[80].mxu0 %v179_v54 }
 0x1e5   :  { %2017 = vmatprep.mubr.f32.mxu1 %v184_v55  ;;  %1224 = vmatprep.mubr.f32.mxu0 %v184_v55 }
 0x1e8   :  { %2018 = vmatmul.mubr.f32.gmra.mrb[82].mxu1 %v183_v56  ;;  %1225 = vmatmul.mubr.f32.gmra.mrb[82].mxu0 %v183_v56  ;;  %v244_v56 = vld [vmem:[%s5866_s0 + $0x718] sm:$0xff] }
 0x1e9   :  { %2022 = vmatprep.mubr.f32.mxu1 %v188_v57  ;;  %1230 = vmatprep.mubr.f32.mxu0 %v188_v57 }
 0x1ec   :  { %2023 = vmatmul.mubr.f32.gmra.mrb[84].mxu1 %v187_v58  ;;  %1231 = vmatmul.mubr.f32.gmra.mrb[84].mxu0 %v187_v58 }
 0x1ed   :  { %2027 = vmatprep.mubr.f32.mxu1 %v192_v59  ;;  %1236 = vmatprep.mubr.f32.mxu0 %v192_v59 }
 0x1f0   :  { %2028 = vmatmul.mubr.f32.gmra.mrb[86].mxu1 %v191_v60  ;;  %1237 = vmatmul.mubr.f32.gmra.mrb[86].mxu0 %v191_v60 }
 0x1f1   :  { %2032 = vmatprep.mubr.f32.mxu1 %v196_v61  ;;  %1242 = vmatprep.mubr.f32.mxu0 %v196_v61 }
 0x1f4   :  { %2033 = vmatmul.mubr.f32.gmra.mrb[88].mxu1 %v195_v62  ;;  %1243 = vmatmul.mubr.f32.gmra.mrb[88].mxu0 %v195_v62 }
 0x1f5   :  { %2037 = vmatprep.mubr.f32.mxu1 %v200_v63  ;;  %1248 = vmatprep.mubr.f32.mxu0 %v200_v63 }
 0x1f8   :  { %2038 = vmatmul.mubr.f32.gmra.mrb[90].mxu1 %v199_v1  ;;  %1249 = vmatmul.mubr.f32.gmra.mrb[90].mxu0 %v199_v1 }
 0x1f9   :  { %2042 = vmatprep.mubr.f32.mxu1 %v204_v2  ;;  %1254 = vmatprep.mubr.f32.mxu0 %v204_v2 }
 0x1fc   :  { %2043 = vmatmul.mubr.f32.gmra.mrb[92].mxu1 %v203_v3  ;;  %1255 = vmatmul.mubr.f32.gmra.mrb[92].mxu0 %v203_v3 }
 0x1fd   :  { %2047 = vmatprep.mubr.f32.mxu1 %v208_v4  ;;  %1260 = vmatprep.mubr.f32.mxu0 %v208_v4 }
 0x200   :  { %2048 = vmatmul.mubr.f32.gmra.mrb[94].mxu1 %v207_v5  ;;  %1261 = vmatmul.mubr.f32.gmra.mrb[94].mxu0 %v207_v5  ;;  %v243_v5 = vld [vmem:[%s5866_s0 + $0x710] sm:$0xff] }
 0x201   :  { %2052 = vmatprep.mubr.f32.mxu1 %v212_v6  ;;  %1266 = vmatprep.mubr.f32.mxu0 %v212_v6 }
 0x204   :  { %2053 = vmatmul.mubr.f32.gmra.mrb[96].mxu1 %v211_v7  ;;  %1267 = vmatmul.mubr.f32.gmra.mrb[96].mxu0 %v211_v7 }
 0x205   :  { %2057 = vmatprep.mubr.f32.mxu1 %v216_v8  ;;  %1272 = vmatprep.mubr.f32.mxu0 %v216_v8  ;;  %v248_v8 = vld [vmem:[%s5866_s0 + $0x738] sm:$0xff] }
 0x208   :  { %2058 = vmatmul.mubr.f32.gmra.mrb[98].mxu1 %v215_v9  ;;  %1273 = vmatmul.mubr.f32.gmra.mrb[98].mxu0 %v215_v9 }
 0x209   :  { %2062 = vmatprep.mubr.f32.mxu1 %v220_v10  ;;  %1278 = vmatprep.mubr.f32.mxu0 %v220_v10 }
 0x20c   :  { %2063 = vmatmul.mubr.f32.gmra.mrb[100].mxu1 %v219_v12  ;;  %1279 = vmatmul.mubr.f32.gmra.mrb[100].mxu0 %v219_v12 }
 0x20d   :  { %2067 = vmatprep.mubr.f32.mxu1 %v224_v13  ;;  %1284 = vmatprep.mubr.f32.mxu0 %v224_v13 }
 0x210   :  { %2068 = vmatmul.mubr.f32.gmra.mrb[102].mxu1 %v223_v15  ;;  %1285 = vmatmul.mubr.f32.gmra.mrb[102].mxu0 %v223_v15 }
 0x211   :  { %2072 = vmatprep.mubr.f32.mxu1 %v228_v16  ;;  %1290 = vmatprep.mubr.f32.mxu0 %v228_v16 }
 0x214   :  { %2073 = vmatmul.mubr.f32.gmra.mrb[104].mxu1 %v227_v19  ;;  %1291 = vmatmul.mubr.f32.gmra.mrb[104].mxu0 %v227_v19 }
 0x215   :  { %2077 = vmatprep.mubr.f32.mxu1 %v232_v0  ;;  %1296 = vmatprep.mubr.f32.mxu0 %v232_v0 }
 0x217   :  { %v1814_v30 = vpop.f32.mrb[0].mxu1  ;;  %v980_v31 = vpop.f32.mrb[0].mxu0 }
 0x218   :  { %v2152_v33 = vmul.f32 %v4766_v23, %v1814_v30  ;;  %v2150_v34 = vmul.f32 %v4768_v24, %v980_v31  ;;  %v1816_v35 = vpop.f32.mrb[1].mxu1  ;;  %2078 = vmatmul.mubr.f32.gmra.mrb[106].mxu1 %v231_v25  ;;  %v982_v36 = vpop.f32.mrb[1].mxu0  ;;  %1297 = vmatmul.mubr.f32.gmra.mrb[106].mxu0 %v231_v25 }
 0x219   :  { %v2151_v37 = vmul.f32 %v4773_v26, %v982_v36  ;;  %2082 = vmatprep.mubr.f32.mxu1 %v236_v29  ;;  %1302 = vmatprep.mubr.f32.mxu0 %v236_v29 }
 0x21a   :  { %v2361_v39 = vadd.f32 %v4775_v27, %v2152_v33  ;;  %v2359_v40 = vadd.f32 %v4777_v28, %v2150_v34 }
 0x21b   :  { %v2360_v42 = vadd.f32 %v4782_v32, %v2151_v37  ;;  %v1819_v43 = vpop.f32.mrb[2].mxu1  ;;  %v986_v44 = vpop.f32.mrb[2].mxu0 }
 0x21c   :  { %v2553_v45 = vmax.f32 %v2361_v39, 0.0  ;;  %v2551_v46 = vmax.f32 %v2359_v40, 0.0  ;;  %v2155_v47 = vmul.f32 %v4766_v23, %v1819_v43  ;;  %v2153_v48 = vmul.f32 %v4768_v24, %v986_v44  ;;  %v1821_v49 = vpop.f32.mrb[3].mxu1  ;;  %2083 = vmatmul.mubr.f32.gmra.mrb[108].mxu1 %v235_v38  ;;  %v988_v50 = vpop.f32.mrb[3].mxu0  ;;  %1303 = vmatmul.mubr.f32.gmra.mrb[108].mxu0 %v235_v38  ;;  %v251_v40 = vld [vmem:[%s5866_s0 + $0x750] sm:$0xff]  ;;  %v256_v43 = vld [vmem:[%s5866_s0 + $0x778] sm:$0xff] }
 0x21d   :  { %v2552_v51 = vmax.f32 %v2360_v42, 0.0  ;;  %v2154_v52 = vmul.f32 %v4773_v26, %v988_v50  ;;  %2087 = vmatprep.mubr.f32.mxu1 %v240_v41  ;;  %1308 = vmatprep.mubr.f32.mxu0 %v240_v41 }
 0x21e   :  { %2746 = vst.msk [vmem:[%s5869_s4 + $0x10] sm:$0xff] %vm2745_vm0, %v2553_v45  ;;  %2743 = vst [vmem:[%s5869_s4] sm:$0xff] %v2551_v46  ;;  %v2364_v54 = vadd.f32 %v4775_v27, %v2155_v47  ;;  %v2362_v55 = vadd.f32 %v4777_v28, %v2153_v48 }
 0x21f   :  { %2744 = vst [vmem:[%s5869_s4 + $0x8] sm:$0xff] %v2552_v51  ;;  %v2363_v57 = vadd.f32 %v4782_v32, %v2154_v52  ;;  %v1824_v58 = vpop.f32.mrb[4].mxu1  ;;  %v992_v59 = vpop.f32.mrb[4].mxu0 }
 0x220   :  { %v2556_v60 = vmax.f32 %v2364_v54, 0.0  ;;  %v2554_v61 = vmax.f32 %v2362_v55, 0.0  ;;  %v2158_v62 = vmul.f32 %v4766_v23, %v1824_v58  ;;  %v2156_v63 = vmul.f32 %v4768_v24, %v992_v59  ;;  %v1826_v1 = vpop.f32.mrb[5].mxu1  ;;  %2088 = vmatmul.mubr.f32.gmra.mrb[110].mxu1 %v239_v53  ;;  %v994_v2 = vpop.f32.mrb[5].mxu0  ;;  %1309 = vmatmul.mubr.f32.gmra.mrb[110].mxu0 %v239_v53  ;;  %v255_v55 = vld [vmem:[%s5866_s0 + $0x770] sm:$0xff]  ;;  %v260_v58 = vld [vmem:[%s5866_s0 + $0x798] sm:$0xff] }
 0x221   :  { %v2555_v3 = vmax.f32 %v2363_v57, 0.0  ;;  %v2157_v4 = vmul.f32 %v4773_v26, %v994_v2  ;;  %2092 = vmatprep.mubr.f32.mxu1 %v244_v56  ;;  %1314 = vmatprep.mubr.f32.mxu0 %v244_v56 }
 0x222   :  { %2749 = vst.msk [vmem:[%s5869_s4 + $0x28] sm:$0xff] %vm2745_vm0, %v2556_v60  ;;  %2747 = vst [vmem:[%s5869_s4 + $0x18] sm:$0xff] %v2554_v61  ;;  %v2367_v6 = vadd.f32 %v4775_v27, %v2158_v62  ;;  %v2365_v7 = vadd.f32 %v4777_v28, %v2156_v63 }
 0x223   :  { %2748 = vst [vmem:[%s5869_s4 + $0x20] sm:$0xff] %v2555_v3  ;;  %v2366_v9 = vadd.f32 %v4782_v32, %v2157_v4  ;;  %v1829_v10 = vpop.f32.mrb[6].mxu1  ;;  %v998_v11 = vpop.f32.mrb[6].mxu0 }
 0x224   :  { %v2559_v12 = vmax.f32 %v2367_v6, 0.0  ;;  %v2557_v13 = vmax.f32 %v2365_v7, 0.0  ;;  %v2161_v14 = vmul.f32 %v4766_v23, %v1829_v10  ;;  %v2159_v15 = vmul.f32 %v4768_v24, %v998_v11  ;;  %v1831_v16 = vpop.f32.mrb[7].mxu1  ;;  %2093 = vmatmul.mubr.f32.gmra.mrb[112].mxu1 %v243_v5  ;;  %v1000_v17 = vpop.f32.mrb[7].mxu0  ;;  %1315 = vmatmul.mubr.f32.gmra.mrb[112].mxu0 %v243_v5  ;;  %v259_v7 = vld [vmem:[%s5866_s0 + $0x790] sm:$0xff]  ;;  %v264_v10 = vld [vmem:[%s5866_s0 + $0x7b8] sm:$0xff] }
 0x225   :  { %v2558_v18 = vmax.f32 %v2366_v9, 0.0  ;;  %v2160_v19 = vmul.f32 %v4773_v26, %v1000_v17  ;;  %2097 = vmatprep.mubr.f32.mxu1 %v248_v8  ;;  %1320 = vmatprep.mubr.f32.mxu0 %v248_v8 }
 0x226   :  { %2752 = vst.msk [vmem:[%s5869_s4 + $0x40] sm:$0xff] %vm2745_vm0, %v2559_v12  ;;  %2750 = vst [vmem:[%s5869_s4 + $0x30] sm:$0xff] %v2557_v13  ;;  %v2370_v21 = vadd.f32 %v4775_v27, %v2161_v14  ;;  %v2368_v0 = vadd.f32 %v4777_v28, %v2159_v15 }
 0x227   :  { %2751 = vst [vmem:[%s5869_s4 + $0x38] sm:$0xff] %v2558_v18  ;;  %v2369_v25 = vadd.f32 %v4782_v32, %v2160_v19  ;;  %v1834_v29 = vpop.f32.mrb[8].mxu1  ;;  %v1004_v30 = vpop.f32.mrb[8].mxu0 }
 0x228   :  { %v2562_v31 = vmax.f32 %v2370_v21, 0.0  ;;  %v2560_v33 = vmax.f32 %v2368_v0, 0.0  ;;  %v2164_v34 = vmul.f32 %v4766_v23, %v1834_v29  ;;  %v2162_v35 = vmul.f32 %v4768_v24, %v1004_v30  ;;  %v1836_v36 = vpop.f32.mrb[9].mxu1  ;;  %2098 = vmatmul.mubr.f32.gmra.mrb[114].mxu1 %v247_v20  ;;  %v1006_v37 = vpop.f32.mrb[9].mxu0  ;;  %1321 = vmatmul.mubr.f32.gmra.mrb[114].mxu0 %v247_v20  ;;  %v263_v0 = vld [vmem:[%s5866_s0 + $0x7b0] sm:$0xff]  ;;  %v268_v29 = vld [vmem:[%s5866_s0 + $0x7d8] sm:$0xff] }
 0x229   :  { %v2561_v38 = vmax.f32 %v2369_v25, 0.0  ;;  %v2163_v39 = vmul.f32 %v4773_v26, %v1006_v37  ;;  %2102 = vmatprep.mubr.f32.mxu1 %v252_v22  ;;  %1326 = vmatprep.mubr.f32.mxu0 %v252_v22 }
 0x22a   :  { %2755 = vst.msk [vmem:[%s5869_s4 + $0x58] sm:$0xff] %vm2745_vm0, %v2562_v31  ;;  %2753 = vst [vmem:[%s5869_s4 + $0x48] sm:$0xff] %v2560_v33  ;;  %v2373_v41 = vadd.f32 %v4775_v27, %v2164_v34  ;;  %v2371_v42 = vadd.f32 %v4777_v28, %v2162_v35 }
 0x22b   :  { %2754 = vst [vmem:[%s5869_s4 + $0x50] sm:$0xff] %v2561_v38  ;;  %v2372_v44 = vadd.f32 %v4782_v32, %v2163_v39  ;;  %v1839_v45 = vpop.f32.mrb[10].mxu1  ;;  %v1010_v46 = vpop.f32.mrb[10].mxu0 }
 0x22c   :  { %v2565_v47 = vmax.f32 %v2373_v41, 0.0  ;;  %v2563_v48 = vmax.f32 %v2371_v42, 0.0  ;;  %v2167_v49 = vmul.f32 %v4766_v23, %v1839_v45  ;;  %v2165_v50 = vmul.f32 %v4768_v24, %v1010_v46  ;;  %v1841_v51 = vpop.f32.mrb[11].mxu1  ;;  %2103 = vmatmul.mubr.f32.gmra.mrb[116].mxu1 %v251_v40  ;;  %v1012_v52 = vpop.f32.mrb[11].mxu0  ;;  %1327 = vmatmul.mubr.f32.gmra.mrb[116].mxu0 %v251_v40  ;;  %v267_v42 = vld [vmem:[%s5866_s0 + $0x7d0] sm:$0xff]  ;;  %v272_v45 = vld [vmem:[%s5866_s0 + $0x7f8] sm:$0xff] }
 0x22d   :  { %v2564_v53 = vmax.f32 %v2372_v44, 0.0  ;;  %v2166_v54 = vmul.f32 %v4773_v26, %v1012_v52  ;;  %2107 = vmatprep.mubr.f32.mxu1 %v256_v43  ;;  %1332 = vmatprep.mubr.f32.mxu0 %v256_v43 }
 0x22e   :  { %2758 = vst.msk [vmem:[%s5869_s4 + $0x70] sm:$0xff] %vm2745_vm0, %v2565_v47  ;;  %2756 = vst [vmem:[%s5869_s4 + $0x60] sm:$0xff] %v2563_v48  ;;  %v2376_v56 = vadd.f32 %v4775_v27, %v2167_v49  ;;  %v2374_v57 = vadd.f32 %v4777_v28, %v2165_v50 }
 0x22f   :  { %2757 = vst [vmem:[%s5869_s4 + $0x68] sm:$0xff] %v2564_v53  ;;  %v2375_v59 = vadd.f32 %v4782_v32, %v2166_v54  ;;  %v1844_v60 = vpop.f32.mrb[12].mxu1  ;;  %v1016_v61 = vpop.f32.mrb[12].mxu0 }
 0x230   :  { %v2568_v62 = vmax.f32 %v2376_v56, 0.0  ;;  %v2566_v63 = vmax.f32 %v2374_v57, 0.0  ;;  %v2170_v1 = vmul.f32 %v4766_v23, %v1844_v60  ;;  %v2168_v2 = vmul.f32 %v4768_v24, %v1016_v61  ;;  %v1846_v3 = vpop.f32.mrb[13].mxu1  ;;  %2108 = vmatmul.mubr.f32.gmra.mrb[118].mxu1 %v255_v55  ;;  %v1018_v4 = vpop.f32.mrb[13].mxu0  ;;  %1333 = vmatmul.mubr.f32.gmra.mrb[118].mxu0 %v255_v55  ;;  %v271_v57 = vld [vmem:[%s5866_s0 + $0x7f0] sm:$0xff] }
 0x231   :  { %v2567_v5 = vmax.f32 %v2375_v59, 0.0  ;;  %v2169_v6 = vmul.f32 %v4773_v26, %v1018_v4  ;;  %2112 = vmatprep.mubr.f32.mxu1 %v260_v58  ;;  %1338 = vmatprep.mubr.f32.mxu0 %v260_v58 }
 0x232   :  { %2761 = vst.msk [vmem:[%s5869_s4 + $0x88] sm:$0xff] %vm2745_vm0, %v2568_v62  ;;  %2759 = vst [vmem:[%s5869_s4 + $0x78] sm:$0xff] %v2566_v63  ;;  %v2379_v8 = vadd.f32 %v4775_v27, %v2170_v1  ;;  %v2377_v9 = vadd.f32 %v4777_v28, %v2168_v2 }
 0x233   :  { %2760 = vst [vmem:[%s5869_s4 + $0x80] sm:$0xff] %v2567_v5  ;;  %v2378_v11 = vadd.f32 %v4782_v32, %v2169_v6  ;;  %v1849_v12 = vpop.f32.mrb[14].mxu1  ;;  %v1022_v13 = vpop.f32.mrb[14].mxu0 }
 0x234   :  { %v2571_v14 = vmax.f32 %v2379_v8, 0.0  ;;  %v2569_v15 = vmax.f32 %v2377_v9, 0.0  ;;  %v2173_v16 = vmul.f32 %v4766_v23, %v1849_v12  ;;  %v2171_v17 = vmul.f32 %v4768_v24, %v1022_v13  ;;  %v1851_v18 = vpop.f32.mrb[15].mxu1  ;;  %2113 = vmatmul.mubr.f32.gmra.mrb[120].mxu1 %v259_v7  ;;  %v1024_v19 = vpop.f32.mrb[15].mxu0  ;;  %1339 = vmatmul.mubr.f32.gmra.mrb[120].mxu0 %v259_v7 }
 0x235   :  { %v2570_v20 = vmax.f32 %v2378_v11, 0.0  ;;  %v2172_v21 = vmul.f32 %v4773_v26, %v1024_v19  ;;  %2117 = vmatprep.mubr.f32.mxu1 %v264_v10  ;;  %1344 = vmatprep.mubr.f32.mxu0 %v264_v10 }
 0x236   :  { %2764 = vst.msk [vmem:[%s5869_s4 + $0xa0] sm:$0xff] %vm2745_vm0, %v2571_v14  ;;  %2762 = vst [vmem:[%s5869_s4 + $0x90] sm:$0xff] %v2569_v15  ;;  %v2382_v22 = vadd.f32 %v4775_v27, %v2173_v16  ;;  %v2380_v25 = vadd.f32 %v4777_v28, %v2171_v17 }
 0x237   :  { %2763 = vst [vmem:[%s5869_s4 + $0x98] sm:$0xff] %v2570_v20  ;;  %v2381_v30 = vadd.f32 %v4782_v32, %v2172_v21  ;;  %v1854_v31 = vpop.f32.mrb[16].mxu1  ;;  %v1028_v33 = vpop.f32.mrb[16].mxu0 }
 0x238   :  { %v2574_v34 = vmax.f32 %v2382_v22, 0.0  ;;  %v2572_v35 = vmax.f32 %v2380_v25, 0.0  ;;  %v2176_v36 = vmul.f32 %v4766_v23, %v1854_v31  ;;  %v2174_v37 = vmul.f32 %v4768_v24, %v1028_v33  ;;  %v1856_v38 = vpop.f32.mrb[17].mxu1  ;;  %2118 = vmatmul.mubr.f32.gmra.mrb[122].mxu1 %v263_v0  ;;  %v1030_v39 = vpop.f32.mrb[17].mxu0  ;;  %1345 = vmatmul.mubr.f32.gmra.mrb[122].mxu0 %v263_v0 }
 0x239   :  { %v2573_v40 = vmax.f32 %v2381_v30, 0.0  ;;  %v2175_v41 = vmul.f32 %v4773_v26, %v1030_v39  ;;  %2122 = vmatprep.mubr.f32.mxu1 %v268_v29  ;;  %1350 = vmatprep.mubr.f32.mxu0 %v268_v29 }
 0x23a   :  { %2767 = vst.msk [vmem:[%s5869_s4 + $0xb8] sm:$0xff] %vm2745_vm0, %v2574_v34  ;;  %2765 = vst [vmem:[%s5869_s4 + $0xa8] sm:$0xff] %v2572_v35  ;;  %v2385_v43 = vadd.f32 %v4775_v27, %v2176_v36  ;;  %v2383_v44 = vadd.f32 %v4777_v28, %v2174_v37 }
 0x23b   :  { %2766 = vst [vmem:[%s5869_s4 + $0xb0] sm:$0xff] %v2573_v40  ;;  %v2384_v46 = vadd.f32 %v4782_v32, %v2175_v41  ;;  %v1859_v47 = vpop.f32.mrb[18].mxu1  ;;  %v1034_v48 = vpop.f32.mrb[18].mxu0 }
 0x23c   :  { %v2577_v49 = vmax.f32 %v2385_v43, 0.0  ;;  %v2575_v50 = vmax.f32 %v2383_v44, 0.0  ;;  %v2179_v51 = vmul.f32 %v4766_v23, %v1859_v47  ;;  %v2177_v52 = vmul.f32 %v4768_v24, %v1034_v48  ;;  %v1861_v53 = vpop.f32.mrb[19].mxu1  ;;  %2123 = vmatmul.mubr.f32.gmra.mrb[124].mxu1 %v267_v42  ;;  %v1036_v54 = vpop.f32.mrb[19].mxu0  ;;  %1351 = vmatmul.mubr.f32.gmra.mrb[124].mxu0 %v267_v42 }
 0x23d   :  { %v2576_v55 = vmax.f32 %v2384_v46, 0.0  ;;  %v2178_v56 = vmul.f32 %v4773_v26, %v1036_v54  ;;  %2127 = vmatprep.mubr.f32.mxu1 %v272_v45  ;;  %1356 = vmatprep.mubr.f32.mxu0 %v272_v45 }
 0x23e   :  { %2770 = vst.msk [vmem:[%s5869_s4 + $0xd0] sm:$0xff] %vm2745_vm0, %v2577_v49  ;;  %2768 = vst [vmem:[%s5869_s4 + $0xc0] sm:$0xff] %v2575_v50  ;;  %v2388_v58 = vadd.f32 %v4775_v27, %v2179_v51  ;;  %v2386_v59 = vadd.f32 %v4777_v28, %v2177_v52 }
 0x23f   :  { %2769 = vst [vmem:[%s5869_s4 + $0xc8] sm:$0xff] %v2576_v55  ;;  %v2387_v60 = vadd.f32 %v4782_v32, %v2178_v56  ;;  %v1864_v61 = vpop.f32.mrb[20].mxu1  ;;  %v1040_v62 = vpop.f32.mrb[20].mxu0 }
 0x240   :  { %v2580_v63 = vmax.f32 %v2388_v58, 0.0  ;;  %v2578_v1 = vmax.f32 %v2386_v59, 0.0  ;;  %v2182_v2 = vmul.f32 %v4766_v23, %v1864_v61  ;;  %v2180_v3 = vmul.f32 %v4768_v24, %v1040_v62  ;;  %v1866_v4 = vpop.f32.mrb[21].mxu1  ;;  %2128 = vmatmul.mubr.f32.gmra.mrb[126].mxu1 %v271_v57  ;;  %v1042_v5 = vpop.f32.mrb[21].mxu0  ;;  %1357 = vmatmul.mubr.f32.gmra.mrb[126].mxu0 %v271_v57 }
 0x241   :  { %v2579_v6 = vmax.f32 %v2387_v60, 0.0  ;;  %v2181_v7 = vmul.f32 %v4773_v26, %v1042_v5 }
 0x242   :  { %2773 = vst.msk [vmem:[%s5869_s4 + $0xe8] sm:$0xff] %vm2745_vm0, %v2580_v63  ;;  %2771 = vst [vmem:[%s5869_s4 + $0xd8] sm:$0xff] %v2578_v1  ;;  %v2391_v8 = vadd.f32 %v4775_v27, %v2182_v2  ;;  %v2389_v9 = vadd.f32 %v4777_v28, %v2180_v3 }
 0x243   :  { %2772 = vst [vmem:[%s5869_s4 + $0xe0] sm:$0xff] %v2579_v6  ;;  %v2390_v10 = vadd.f32 %v4782_v32, %v2181_v7  ;;  %v1869_v11 = vpop.f32.mrb[22].mxu1  ;;  %v1046_v12 = vpop.f32.mrb[22].mxu0 }
 0x244   :  { %v2583_v13 = vmax.f32 %v2391_v8, 0.0  ;;  %v2581_v14 = vmax.f32 %v2389_v9, 0.0  ;;  %v2185_v15 = vmul.f32 %v4766_v23, %v1869_v11  ;;  %v2183_v16 = vmul.f32 %v4768_v24, %v1046_v12  ;;  %v1871_v17 = vpop.f32.mrb[23].mxu1  ;;  %v1048_v18 = vpop.f32.mrb[23].mxu0 }
 0x245   :  { %v2582_v19 = vmax.f32 %v2390_v10, 0.0  ;;  %v2184_v20 = vmul.f32 %v4773_v26, %v1048_v18 }
 0x246   :  { %2776 = vst.msk [vmem:[%s5869_s4 + $0x100] sm:$0xff] %vm2745_vm0, %v2583_v13  ;;  %2774 = vst [vmem:[%s5869_s4 + $0xf0] sm:$0xff] %v2581_v14  ;;  %v2394_v21 = vadd.f32 %v4775_v27, %v2185_v15  ;;  %v2392_v0 = vadd.f32 %v4777_v28, %v2183_v16 }
 0x247   :  { %2775 = vst [vmem:[%s5869_s4 + $0xf8] sm:$0xff] %v2582_v19  ;;  %v2393_v22 = vadd.f32 %v4782_v32, %v2184_v20  ;;  %v1874_v25 = vpop.f32.mrb[24].mxu1  ;;  %v1052_v29 = vpop.f32.mrb[24].mxu0 }
 0x248   :  { %v2586_v30 = vmax.f32 %v2394_v21, 0.0  ;;  %v2584_v31 = vmax.f32 %v2392_v0, 0.0  ;;  %v2188_v33 = vmul.f32 %v4766_v23, %v1874_v25  ;;  %v2186_v34 = vmul.f32 %v4768_v24, %v1052_v29  ;;  %v1876_v35 = vpop.f32.mrb[25].mxu1  ;;  %v1054_v36 = vpop.f32.mrb[25].mxu0 }
 0x249   :  { %v2585_v37 = vmax.f32 %v2393_v22, 0.0  ;;  %v2187_v38 = vmul.f32 %v4773_v26, %v1054_v36 }
 0x24a   :  { %2779 = vst.msk [vmem:[%s5869_s4 + $0x118] sm:$0xff] %vm2745_vm0, %v2586_v30  ;;  %2777 = vst [vmem:[%s5869_s4 + $0x108] sm:$0xff] %v2584_v31  ;;  %v2397_v39 = vadd.f32 %v4775_v27, %v2188_v33  ;;  %v2395_v40 = vadd.f32 %v4777_v28, %v2186_v34 }
 0x24b   :  { %2778 = vst [vmem:[%s5869_s4 + $0x110] sm:$0xff] %v2585_v37  ;;  %v2396_v41 = vadd.f32 %v4782_v32, %v2187_v38  ;;  %v1879_v42 = vpop.f32.mrb[26].mxu1  ;;  %v1058_v43 = vpop.f32.mrb[26].mxu0 }
 0x24c   :  { %v2589_v44 = vmax.f32 %v2397_v39, 0.0  ;;  %v2587_v45 = vmax.f32 %v2395_v40, 0.0  ;;  %v2191_v46 = vmul.f32 %v4766_v23, %v1879_v42  ;;  %v2189_v47 = vmul.f32 %v4768_v24, %v1058_v43  ;;  %v1881_v48 = vpop.f32.mrb[27].mxu1  ;;  %v1060_v49 = vpop.f32.mrb[27].mxu0 }
 0x24d   :  { %v2588_v50 = vmax.f32 %v2396_v41, 0.0  ;;  %v2190_v51 = vmul.f32 %v4773_v26, %v1060_v49 }
 0x24e   :  { %2782 = vst.msk [vmem:[%s5869_s4 + $0x130] sm:$0xff] %vm2745_vm0, %v2589_v44  ;;  %2780 = vst [vmem:[%s5869_s4 + $0x120] sm:$0xff] %v2587_v45  ;;  %v2400_v52 = vadd.f32 %v4775_v27, %v2191_v46  ;;  %v2398_v53 = vadd.f32 %v4777_v28, %v2189_v47 }
 0x24f   :  { %2781 = vst [vmem:[%s5869_s4 + $0x128] sm:$0xff] %v2588_v50  ;;  %v2399_v54 = vadd.f32 %v4782_v32, %v2190_v51  ;;  %v1884_v55 = vpop.f32.mrb[28].mxu1  ;;  %v1064_v56 = vpop.f32.mrb[28].mxu0 }
 0x250   :  { %v2592_v57 = vmax.f32 %v2400_v52, 0.0  ;;  %v2590_v58 = vmax.f32 %v2398_v53, 0.0  ;;  %v2194_v59 = vmul.f32 %v4766_v23, %v1884_v55  ;;  %v2192_v60 = vmul.f32 %v4768_v24, %v1064_v56  ;;  %v1886_v61 = vpop.f32.mrb[29].mxu1  ;;  %v1066_v62 = vpop.f32.mrb[29].mxu0 }
 0x251   :  { %v2591_v63 = vmax.f32 %v2399_v54, 0.0  ;;  %v2193_v1 = vmul.f32 %v4773_v26, %v1066_v62 }
 0x252   :  { %2785 = vst.msk [vmem:[%s5869_s4 + $0x148] sm:$0xff] %vm2745_vm0, %v2592_v57  ;;  %2783 = vst [vmem:[%s5869_s4 + $0x138] sm:$0xff] %v2590_v58  ;;  %v2403_v2 = vadd.f32 %v4775_v27, %v2194_v59  ;;  %v2401_v3 = vadd.f32 %v4777_v28, %v2192_v60 }
 0x253   :  { %2784 = vst [vmem:[%s5869_s4 + $0x140] sm:$0xff] %v2591_v63  ;;  %v2402_v4 = vadd.f32 %v4782_v32, %v2193_v1  ;;  %v1889_v5 = vpop.f32.mrb[30].mxu1  ;;  %v1070_v6 = vpop.f32.mrb[30].mxu0 }
 0x254   :  { %v2595_v7 = vmax.f32 %v2403_v2, 0.0  ;;  %v2593_v8 = vmax.f32 %v2401_v3, 0.0  ;;  %v2197_v9 = vmul.f32 %v4766_v23, %v1889_v5  ;;  %v2195_v10 = vmul.f32 %v4768_v24, %v1070_v6  ;;  %v1891_v11 = vpop.f32.mrb[31].mxu1  ;;  %v1072_v12 = vpop.f32.mrb[31].mxu0 }
 0x255   :  { %v2594_v13 = vmax.f32 %v2402_v4, 0.0  ;;  %v2196_v14 = vmul.f32 %v4773_v26, %v1072_v12 }
 0x256   :  { %2788 = vst.msk [vmem:[%s5869_s4 + $0x160] sm:$0xff] %vm2745_vm0, %v2595_v7  ;;  %2786 = vst [vmem:[%s5869_s4 + $0x150] sm:$0xff] %v2593_v8  ;;  %v2406_v15 = vadd.f32 %v4775_v27, %v2197_v9  ;;  %v2404_v16 = vadd.f32 %v4777_v28, %v2195_v10 }
 0x257   :  { %2787 = vst [vmem:[%s5869_s4 + $0x158] sm:$0xff] %v2594_v13  ;;  %v2405_v17 = vadd.f32 %v4782_v32, %v2196_v14  ;;  %v1894_v18 = vpop.f32.mrb[32].mxu1  ;;  %v1076_v19 = vpop.f32.mrb[32].mxu0 }
 0x258   :  { %v2598_v20 = vmax.f32 %v2406_v15, 0.0  ;;  %v2596_v21 = vmax.f32 %v2404_v16, 0.0  ;;  %v2200_v0 = vmul.f32 %v4766_v23, %v1894_v18  ;;  %v2198_v22 = vmul.f32 %v4768_v24, %v1076_v19  ;;  %v1896_v25 = vpop.f32.mrb[33].mxu1  ;;  %v1078_v29 = vpop.f32.mrb[33].mxu0 }
 0x259   :  { %v2597_v30 = vmax.f32 %v2405_v17, 0.0  ;;  %v2199_v31 = vmul.f32 %v4773_v26, %v1078_v29 }
 0x25a   :  { %2791 = vst.msk [vmem:[%s5869_s4 + $0x178] sm:$0xff] %vm2745_vm0, %v2598_v20  ;;  %2789 = vst [vmem:[%s5869_s4 + $0x168] sm:$0xff] %v2596_v21  ;;  %v2409_v33 = vadd.f32 %v4775_v27, %v2200_v0  ;;  %v2407_v34 = vadd.f32 %v4777_v28, %v2198_v22 }
 0x25b   :  { %2790 = vst [vmem:[%s5869_s4 + $0x170] sm:$0xff] %v2597_v30  ;;  %v2408_v35 = vadd.f32 %v4782_v32, %v2199_v31  ;;  %v1899_v36 = vpop.f32.mrb[34].mxu1  ;;  %v1082_v37 = vpop.f32.mrb[34].mxu0 }
 0x25c   :  { %v2601_v38 = vmax.f32 %v2409_v33, 0.0  ;;  %v2599_v39 = vmax.f32 %v2407_v34, 0.0  ;;  %v2203_v40 = vmul.f32 %v4766_v23, %v1899_v36  ;;  %v2201_v41 = vmul.f32 %v4768_v24, %v1082_v37  ;;  %v1901_v42 = vpop.f32.mrb[35].mxu1  ;;  %v1084_v43 = vpop.f32.mrb[35].mxu0 }
 0x25d   :  { %v2600_v44 = vmax.f32 %v2408_v35, 0.0  ;;  %v2202_v45 = vmul.f32 %v4773_v26, %v1084_v43 }
 0x25e   :  { %2794 = vst.msk [vmem:[%s5869_s4 + $0x190] sm:$0xff] %vm2745_vm0, %v2601_v38  ;;  %2792 = vst [vmem:[%s5869_s4 + $0x180] sm:$0xff] %v2599_v39  ;;  %v2412_v46 = vadd.f32 %v4775_v27, %v2203_v40  ;;  %v2410_v47 = vadd.f32 %v4777_v28, %v2201_v41 }
 0x25f   :  { %2793 = vst [vmem:[%s5869_s4 + $0x188] sm:$0xff] %v2600_v44  ;;  %v2411_v48 = vadd.f32 %v4782_v32, %v2202_v45  ;;  %v1904_v49 = vpop.f32.mrb[36].mxu1  ;;  %v1088_v50 = vpop.f32.mrb[36].mxu0 }
 0x260   :  { %v2604_v51 = vmax.f32 %v2412_v46, 0.0  ;;  %v2602_v52 = vmax.f32 %v2410_v47, 0.0  ;;  %v2206_v53 = vmul.f32 %v4766_v23, %v1904_v49  ;;  %v2204_v54 = vmul.f32 %v4768_v24, %v1088_v50  ;;  %v1906_v55 = vpop.f32.mrb[37].mxu1  ;;  %v1090_v56 = vpop.f32.mrb[37].mxu0 }
 0x261   :  { %v2603_v57 = vmax.f32 %v2411_v48, 0.0  ;;  %v2205_v58 = vmul.f32 %v4773_v26, %v1090_v56 }
 0x262   :  { %2797 = vst.msk [vmem:[%s5869_s4 + $0x1a8] sm:$0xff] %vm2745_vm0, %v2604_v51  ;;  %2795 = vst [vmem:[%s5869_s4 + $0x198] sm:$0xff] %v2602_v52  ;;  %v2415_v59 = vadd.f32 %v4775_v27, %v2206_v53  ;;  %v2413_v60 = vadd.f32 %v4777_v28, %v2204_v54 }
 0x263   :  { %2796 = vst [vmem:[%s5869_s4 + $0x1a0] sm:$0xff] %v2603_v57  ;;  %v2414_v61 = vadd.f32 %v4782_v32, %v2205_v58  ;;  %v1909_v62 = vpop.f32.mrb[38].mxu1  ;;  %v1094_v63 = vpop.f32.mrb[38].mxu0 }
 0x264   :  { %v2607_v1 = vmax.f32 %v2415_v59, 0.0  ;;  %v2605_v2 = vmax.f32 %v2413_v60, 0.0  ;;  %v2209_v3 = vmul.f32 %v4766_v23, %v1909_v62  ;;  %v2207_v4 = vmul.f32 %v4768_v24, %v1094_v63  ;;  %v1911_v5 = vpop.f32.mrb[39].mxu1  ;;  %v1096_v6 = vpop.f32.mrb[39].mxu0 }
 0x265   :  { %v2606_v7 = vmax.f32 %v2414_v61, 0.0  ;;  %v2208_v8 = vmul.f32 %v4773_v26, %v1096_v6 }
 0x266   :  { %2800 = vst.msk [vmem:[%s5869_s4 + $0x1c0] sm:$0xff] %vm2745_vm0, %v2607_v1  ;;  %2798 = vst [vmem:[%s5869_s4 + $0x1b0] sm:$0xff] %v2605_v2  ;;  %v2418_v9 = vadd.f32 %v4775_v27, %v2209_v3  ;;  %v2416_v10 = vadd.f32 %v4777_v28, %v2207_v4 }
 0x267   :  { %2799 = vst [vmem:[%s5869_s4 + $0x1b8] sm:$0xff] %v2606_v7  ;;  %v2417_v11 = vadd.f32 %v4782_v32, %v2208_v8  ;;  %v1914_v12 = vpop.f32.mrb[40].mxu1  ;;  %v1100_v13 = vpop.f32.mrb[40].mxu0 }
 0x268   :  { %v2610_v14 = vmax.f32 %v2418_v9, 0.0  ;;  %v2608_v15 = vmax.f32 %v2416_v10, 0.0  ;;  %v2212_v16 = vmul.f32 %v4766_v23, %v1914_v12  ;;  %v2210_v17 = vmul.f32 %v4768_v24, %v1100_v13  ;;  %v1916_v18 = vpop.f32.mrb[41].mxu1  ;;  %v1102_v19 = vpop.f32.mrb[41].mxu0 }
 0x269   :  { %v2609_v20 = vmax.f32 %v2417_v11, 0.0  ;;  %v2211_v21 = vmul.f32 %v4773_v26, %v1102_v19 }
 0x26a   :  { %2803 = vst.msk [vmem:[%s5869_s4 + $0x1d8] sm:$0xff] %vm2745_vm0, %v2610_v14  ;;  %2801 = vst [vmem:[%s5869_s4 + $0x1c8] sm:$0xff] %v2608_v15  ;;  %v2421_v0 = vadd.f32 %v4775_v27, %v2212_v16  ;;  %v2419_v22 = vadd.f32 %v4777_v28, %v2210_v17 }
 0x26b   :  { %2802 = vst [vmem:[%s5869_s4 + $0x1d0] sm:$0xff] %v2609_v20  ;;  %v2420_v25 = vadd.f32 %v4782_v32, %v2211_v21  ;;  %v1919_v29 = vpop.f32.mrb[42].mxu1  ;;  %v1106_v30 = vpop.f32.mrb[42].mxu0 }
 0x26c   :  { %v2613_v31 = vmax.f32 %v2421_v0, 0.0  ;;  %v2611_v33 = vmax.f32 %v2419_v22, 0.0  ;;  %v2215_v34 = vmul.f32 %v4766_v23, %v1919_v29  ;;  %v2213_v35 = vmul.f32 %v4768_v24, %v1106_v30  ;;  %v1921_v36 = vpop.f32.mrb[43].mxu1  ;;  %v1108_v37 = vpop.f32.mrb[43].mxu0 }
 0x26d   :  { %v2612_v38 = vmax.f32 %v2420_v25, 0.0  ;;  %v2214_v39 = vmul.f32 %v4773_v26, %v1108_v37 }
 0x26e   :  { %2806 = vst.msk [vmem:[%s5869_s4 + $0x1f0] sm:$0xff] %vm2745_vm0, %v2613_v31  ;;  %2804 = vst [vmem:[%s5869_s4 + $0x1e0] sm:$0xff] %v2611_v33  ;;  %v2424_v40 = vadd.f32 %v4775_v27, %v2215_v34  ;;  %v2422_v41 = vadd.f32 %v4777_v28, %v2213_v35 }
 0x26f   :  { %2805 = vst [vmem:[%s5869_s4 + $0x1e8] sm:$0xff] %v2612_v38  ;;  %v2423_v42 = vadd.f32 %v4782_v32, %v2214_v39  ;;  %v1924_v43 = vpop.f32.mrb[44].mxu1  ;;  %v1112_v44 = vpop.f32.mrb[44].mxu0 }
 0x270   :  { %v2616_v45 = vmax.f32 %v2424_v40, 0.0  ;;  %v2614_v46 = vmax.f32 %v2422_v41, 0.0  ;;  %v2218_v47 = vmul.f32 %v4766_v23, %v1924_v43  ;;  %v2216_v48 = vmul.f32 %v4768_v24, %v1112_v44  ;;  %v1926_v49 = vpop.f32.mrb[45].mxu1  ;;  %v1114_v50 = vpop.f32.mrb[45].mxu0 }
 0x271   :  { %v2615_v51 = vmax.f32 %v2423_v42, 0.0  ;;  %v2217_v52 = vmul.f32 %v4773_v26, %v1114_v50 }
 0x272   :  { %2809 = vst.msk [vmem:[%s5869_s4 + $0x208] sm:$0xff] %vm2745_vm0, %v2616_v45  ;;  %2807 = vst [vmem:[%s5869_s4 + $0x1f8] sm:$0xff] %v2614_v46  ;;  %v2427_v53 = vadd.f32 %v4775_v27, %v2218_v47  ;;  %v2425_v54 = vadd.f32 %v4777_v28, %v2216_v48 }
 0x273   :  { %2808 = vst [vmem:[%s5869_s4 + $0x200] sm:$0xff] %v2615_v51  ;;  %v2426_v55 = vadd.f32 %v4782_v32, %v2217_v52  ;;  %v1929_v56 = vpop.f32.mrb[46].mxu1  ;;  %v1118_v57 = vpop.f32.mrb[46].mxu0 }
 0x274   :  { %v2619_v58 = vmax.f32 %v2427_v53, 0.0  ;;  %v2617_v59 = vmax.f32 %v2425_v54, 0.0  ;;  %v2221_v60 = vmul.f32 %v4766_v23, %v1929_v56  ;;  %v2219_v61 = vmul.f32 %v4768_v24, %v1118_v57  ;;  %v1931_v62 = vpop.f32.mrb[47].mxu1  ;;  %v1120_v63 = vpop.f32.mrb[47].mxu0 }
 0x275   :  { %v2618_v1 = vmax.f32 %v2426_v55, 0.0  ;;  %v2220_v2 = vmul.f32 %v4773_v26, %v1120_v63 }
 0x276   :  { %2812 = vst.msk [vmem:[%s5869_s4 + $0x220] sm:$0xff] %vm2745_vm0, %v2619_v58  ;;  %2810 = vst [vmem:[%s5869_s4 + $0x210] sm:$0xff] %v2617_v59  ;;  %v2430_v3 = vadd.f32 %v4775_v27, %v2221_v60  ;;  %v2428_v4 = vadd.f32 %v4777_v28, %v2219_v61 }
 0x277   :  { %2811 = vst [vmem:[%s5869_s4 + $0x218] sm:$0xff] %v2618_v1  ;;  %v2429_v5 = vadd.f32 %v4782_v32, %v2220_v2  ;;  %v1934_v6 = vpop.f32.mrb[48].mxu1  ;;  %v1124_v7 = vpop.f32.mrb[48].mxu0 }
 0x278   :  { %v2622_v8 = vmax.f32 %v2430_v3, 0.0  ;;  %v2620_v9 = vmax.f32 %v2428_v4, 0.0  ;;  %v2224_v10 = vmul.f32 %v4766_v23, %v1934_v6  ;;  %v2222_v11 = vmul.f32 %v4768_v24, %v1124_v7  ;;  %v1936_v12 = vpop.f32.mrb[49].mxu1  ;;  %v1126_v13 = vpop.f32.mrb[49].mxu0 }
 0x279   :  { %v2621_v14 = vmax.f32 %v2429_v5, 0.0  ;;  %v2223_v15 = vmul.f32 %v4773_v26, %v1126_v13 }
 0x27a   :  { %2815 = vst.msk [vmem:[%s5869_s4 + $0x238] sm:$0xff] %vm2745_vm0, %v2622_v8  ;;  %2813 = vst [vmem:[%s5869_s4 + $0x228] sm:$0xff] %v2620_v9  ;;  %v2433_v16 = vadd.f32 %v4775_v27, %v2224_v10  ;;  %v2431_v17 = vadd.f32 %v4777_v28, %v2222_v11 }
 0x27b   :  { %2814 = vst [vmem:[%s5869_s4 + $0x230] sm:$0xff] %v2621_v14  ;;  %v2432_v18 = vadd.f32 %v4782_v32, %v2223_v15  ;;  %v1939_v19 = vpop.f32.mrb[50].mxu1  ;;  %v1130_v20 = vpop.f32.mrb[50].mxu0 }
 0x27c   :  { %v2625_v21 = vmax.f32 %v2433_v16, 0.0  ;;  %v2623_v0 = vmax.f32 %v2431_v17, 0.0  ;;  %v2227_v22 = vmul.f32 %v4766_v23, %v1939_v19  ;;  %v2225_v25 = vmul.f32 %v4768_v24, %v1130_v20  ;;  %v1941_v29 = vpop.f32.mrb[51].mxu1  ;;  %v1132_v30 = vpop.f32.mrb[51].mxu0 }
 0x27d   :  { %v2624_v31 = vmax.f32 %v2432_v18, 0.0  ;;  %v2226_v33 = vmul.f32 %v4773_v26, %v1132_v30 }
 0x27e   :  { %2818 = vst.msk [vmem:[%s5869_s4 + $0x250] sm:$0xff] %vm2745_vm0, %v2625_v21  ;;  %2816 = vst [vmem:[%s5869_s4 + $0x240] sm:$0xff] %v2623_v0  ;;  %v2436_v34 = vadd.f32 %v4775_v27, %v2227_v22  ;;  %v2434_v35 = vadd.f32 %v4777_v28, %v2225_v25 }
 0x27f   :  { %2817 = vst [vmem:[%s5869_s4 + $0x248] sm:$0xff] %v2624_v31  ;;  %v2435_v36 = vadd.f32 %v4782_v32, %v2226_v33  ;;  %v1944_v37 = vpop.f32.mrb[52].mxu1  ;;  %v1136_v38 = vpop.f32.mrb[52].mxu0 }
 0x280   :  { %v2628_v39 = vmax.f32 %v2436_v34, 0.0  ;;  %v2626_v40 = vmax.f32 %v2434_v35, 0.0  ;;  %v2230_v41 = vmul.f32 %v4766_v23, %v1944_v37  ;;  %v2228_v42 = vmul.f32 %v4768_v24, %v1136_v38  ;;  %v1946_v43 = vpop.f32.mrb[53].mxu1  ;;  %v1138_v44 = vpop.f32.mrb[53].mxu0 }
 0x281   :  { %v2627_v45 = vmax.f32 %v2435_v36, 0.0  ;;  %v2229_v46 = vmul.f32 %v4773_v26, %v1138_v44 }
 0x282   :  { %2821 = vst.msk [vmem:[%s5869_s4 + $0x268] sm:$0xff] %vm2745_vm0, %v2628_v39  ;;  %2819 = vst [vmem:[%s5869_s4 + $0x258] sm:$0xff] %v2626_v40  ;;  %v2439_v47 = vadd.f32 %v4775_v27, %v2230_v41  ;;  %v2437_v48 = vadd.f32 %v4777_v28, %v2228_v42 }
 0x283   :  { %2820 = vst [vmem:[%s5869_s4 + $0x260] sm:$0xff] %v2627_v45  ;;  %v2438_v49 = vadd.f32 %v4782_v32, %v2229_v46  ;;  %v1949_v50 = vpop.f32.mrb[54].mxu1  ;;  %v1142_v51 = vpop.f32.mrb[54].mxu0 }
 0x284   :  { %v2631_v52 = vmax.f32 %v2439_v47, 0.0  ;;  %v2629_v53 = vmax.f32 %v2437_v48, 0.0  ;;  %v2233_v54 = vmul.f32 %v4766_v23, %v1949_v50  ;;  %v2231_v55 = vmul.f32 %v4768_v24, %v1142_v51  ;;  %v1951_v56 = vpop.f32.mrb[55].mxu1  ;;  %v1144_v57 = vpop.f32.mrb[55].mxu0 }
 0x285   :  { %v2630_v58 = vmax.f32 %v2438_v49, 0.0  ;;  %v2232_v59 = vmul.f32 %v4773_v26, %v1144_v57 }
 0x286   :  { %2824 = vst.msk [vmem:[%s5869_s4 + $0x280] sm:$0xff] %vm2745_vm0, %v2631_v52  ;;  %2822 = vst [vmem:[%s5869_s4 + $0x270] sm:$0xff] %v2629_v53  ;;  %v2442_v60 = vadd.f32 %v4775_v27, %v2233_v54  ;;  %v2440_v61 = vadd.f32 %v4777_v28, %v2231_v55 }
 0x287   :  { %2823 = vst [vmem:[%s5869_s4 + $0x278] sm:$0xff] %v2630_v58  ;;  %v2441_v62 = vadd.f32 %v4782_v32, %v2232_v59  ;;  %v1954_v63 = vpop.f32.mrb[56].mxu1  ;;  %v1148_v1 = vpop.f32.mrb[56].mxu0 }
 0x288   :  { %v2634_v2 = vmax.f32 %v2442_v60, 0.0  ;;  %v2632_v3 = vmax.f32 %v2440_v61, 0.0  ;;  %v2236_v4 = vmul.f32 %v4766_v23, %v1954_v63  ;;  %v2234_v5 = vmul.f32 %v4768_v24, %v1148_v1  ;;  %v1956_v6 = vpop.f32.mrb[57].mxu1  ;;  %v1150_v7 = vpop.f32.mrb[57].mxu0 }
 0x289   :  { %v2633_v8 = vmax.f32 %v2441_v62, 0.0  ;;  %v2235_v9 = vmul.f32 %v4773_v26, %v1150_v7 }
 0x28a   :  { %2827 = vst.msk [vmem:[%s5869_s4 + $0x298] sm:$0xff] %vm2745_vm0, %v2634_v2  ;;  %2825 = vst [vmem:[%s5869_s4 + $0x288] sm:$0xff] %v2632_v3  ;;  %v2445_v10 = vadd.f32 %v4775_v27, %v2236_v4  ;;  %v2443_v11 = vadd.f32 %v4777_v28, %v2234_v5 }
 0x28b   :  { %2826 = vst [vmem:[%s5869_s4 + $0x290] sm:$0xff] %v2633_v8  ;;  %v2444_v12 = vadd.f32 %v4782_v32, %v2235_v9  ;;  %v1959_v13 = vpop.f32.mrb[58].mxu1  ;;  %v1154_v14 = vpop.f32.mrb[58].mxu0 }
 0x28c   :  { %v2637_v15 = vmax.f32 %v2445_v10, 0.0  ;;  %v2635_v16 = vmax.f32 %v2443_v11, 0.0  ;;  %v2239_v17 = vmul.f32 %v4766_v23, %v1959_v13  ;;  %v2237_v18 = vmul.f32 %v4768_v24, %v1154_v14  ;;  %v1961_v19 = vpop.f32.mrb[59].mxu1  ;;  %v1156_v20 = vpop.f32.mrb[59].mxu0 }
 0x28d   :  { %v2636_v21 = vmax.f32 %v2444_v12, 0.0  ;;  %v2238_v0 = vmul.f32 %v4773_v26, %v1156_v20 }
 0x28e   :  { %2830 = vst.msk [vmem:[%s5869_s4 + $0x2b0] sm:$0xff] %vm2745_vm0, %v2637_v15  ;;  %2828 = vst [vmem:[%s5869_s4 + $0x2a0] sm:$0xff] %v2635_v16  ;;  %v2448_v22 = vadd.f32 %v4775_v27, %v2239_v17  ;;  %v2446_v25 = vadd.f32 %v4777_v28, %v2237_v18 }
 0x28f   :  { %2829 = vst [vmem:[%s5869_s4 + $0x2a8] sm:$0xff] %v2636_v21  ;;  %v2447_v29 = vadd.f32 %v4782_v32, %v2238_v0  ;;  %v1964_v30 = vpop.f32.mrb[60].mxu1  ;;  %v1160_v31 = vpop.f32.mrb[60].mxu0 }
 0x290   :  { %v2640_v33 = vmax.f32 %v2448_v22, 0.0  ;;  %v2638_v34 = vmax.f32 %v2446_v25, 0.0  ;;  %v2242_v35 = vmul.f32 %v4766_v23, %v1964_v30  ;;  %v2240_v36 = vmul.f32 %v4768_v24, %v1160_v31  ;;  %v1966_v37 = vpop.f32.mrb[61].mxu1  ;;  %v1162_v38 = vpop.f32.mrb[61].mxu0 }
 0x291   :  { %v2639_v39 = vmax.f32 %v2447_v29, 0.0  ;;  %v2241_v40 = vmul.f32 %v4773_v26, %v1162_v38 }
 0x292   :  { %2833 = vst.msk [vmem:[%s5869_s4 + $0x2c8] sm:$0xff] %vm2745_vm0, %v2640_v33  ;;  %2831 = vst [vmem:[%s5869_s4 + $0x2b8] sm:$0xff] %v2638_v34  ;;  %v2451_v41 = vadd.f32 %v4775_v27, %v2242_v35  ;;  %v2449_v42 = vadd.f32 %v4777_v28, %v2240_v36 }
 0x293   :  { %2832 = vst [vmem:[%s5869_s4 + $0x2c0] sm:$0xff] %v2639_v39  ;;  %v2450_v43 = vadd.f32 %v4782_v32, %v2241_v40  ;;  %v1969_v44 = vpop.f32.mrb[62].mxu1  ;;  %v1166_v45 = vpop.f32.mrb[62].mxu0 }
 0x294   :  { %v2643_v46 = vmax.f32 %v2451_v41, 0.0  ;;  %v2641_v47 = vmax.f32 %v2449_v42, 0.0  ;;  %v2245_v48 = vmul.f32 %v4766_v23, %v1969_v44  ;;  %v2243_v49 = vmul.f32 %v4768_v24, %v1166_v45  ;;  %v1971_v50 = vpop.f32.mrb[63].mxu1  ;;  %v1168_v51 = vpop.f32.mrb[63].mxu0 }
 0x295   :  { %v2642_v52 = vmax.f32 %v2450_v43, 0.0  ;;  %v2244_v53 = vmul.f32 %v4773_v26, %v1168_v51 }
 0x296   :  { %2836 = vst.msk [vmem:[%s5869_s4 + $0x2e0] sm:$0xff] %vm2745_vm0, %v2643_v46  ;;  %2834 = vst [vmem:[%s5869_s4 + $0x2d0] sm:$0xff] %v2641_v47  ;;  %v2454_v54 = vadd.f32 %v4775_v27, %v2245_v48  ;;  %v2452_v55 = vadd.f32 %v4777_v28, %v2243_v49 }
 0x297   :  { %2835 = vst [vmem:[%s5869_s4 + $0x2d8] sm:$0xff] %v2642_v52  ;;  %v2453_v56 = vadd.f32 %v4782_v32, %v2244_v53  ;;  %v1974_v57 = vpop.f32.mrb[64].mxu1  ;;  %v1172_v58 = vpop.f32.mrb[64].mxu0 }
 0x298   :  { %v2646_v59 = vmax.f32 %v2454_v54, 0.0  ;;  %v2644_v60 = vmax.f32 %v2452_v55, 0.0  ;;  %v2248_v61 = vmul.f32 %v4766_v23, %v1974_v57  ;;  %v2246_v62 = vmul.f32 %v4768_v24, %v1172_v58  ;;  %v1976_v63 = vpop.f32.mrb[65].mxu1  ;;  %v1174_v1 = vpop.f32.mrb[65].mxu0 }
 0x299   :  { %v2645_v2 = vmax.f32 %v2453_v56, 0.0  ;;  %v2247_v3 = vmul.f32 %v4773_v26, %v1174_v1 }
 0x29a   :  { %2839 = vst.msk [vmem:[%s5869_s4 + $0x2f8] sm:$0xff] %vm2745_vm0, %v2646_v59  ;;  %2837 = vst [vmem:[%s5869_s4 + $0x2e8] sm:$0xff] %v2644_v60  ;;  %v2457_v4 = vadd.f32 %v4775_v27, %v2248_v61  ;;  %v2455_v5 = vadd.f32 %v4777_v28, %v2246_v62 }
 0x29b   :  { %2838 = vst [vmem:[%s5869_s4 + $0x2f0] sm:$0xff] %v2645_v2  ;;  %v2456_v6 = vadd.f32 %v4782_v32, %v2247_v3  ;;  %v1979_v7 = vpop.f32.mrb[66].mxu1  ;;  %v1178_v8 = vpop.f32.mrb[66].mxu0 }
 0x29c   :  { %v2649_v9 = vmax.f32 %v2457_v4, 0.0  ;;  %v2647_v10 = vmax.f32 %v2455_v5, 0.0  ;;  %v2251_v11 = vmul.f32 %v4766_v23, %v1979_v7  ;;  %v2249_v12 = vmul.f32 %v4768_v24, %v1178_v8  ;;  %v1981_v13 = vpop.f32.mrb[67].mxu1  ;;  %v1180_v14 = vpop.f32.mrb[67].mxu0 }
 0x29d   :  { %v2648_v15 = vmax.f32 %v2456_v6, 0.0  ;;  %v2250_v16 = vmul.f32 %v4773_v26, %v1180_v14 }
 0x29e   :  { %2842 = vst.msk [vmem:[%s5869_s4 + $0x310] sm:$0xff] %vm2745_vm0, %v2649_v9  ;;  %2840 = vst [vmem:[%s5869_s4 + $0x300] sm:$0xff] %v2647_v10  ;;  %v2460_v17 = vadd.f32 %v4775_v27, %v2251_v11  ;;  %v2458_v18 = vadd.f32 %v4777_v28, %v2249_v12 }
 0x29f   :  { %2841 = vst [vmem:[%s5869_s4 + $0x308] sm:$0xff] %v2648_v15  ;;  %v2459_v19 = vadd.f32 %v4782_v32, %v2250_v16  ;;  %v1984_v20 = vpop.f32.mrb[68].mxu1  ;;  %v1184_v21 = vpop.f32.mrb[68].mxu0 }
 0x2a0   :  { %v2652_v0 = vmax.f32 %v2460_v17, 0.0  ;;  %v2650_v22 = vmax.f32 %v2458_v18, 0.0  ;;  %v2254_v25 = vmul.f32 %v4766_v23, %v1984_v20  ;;  %v2252_v29 = vmul.f32 %v4768_v24, %v1184_v21  ;;  %v1986_v30 = vpop.f32.mrb[69].mxu1  ;;  %v1186_v31 = vpop.f32.mrb[69].mxu0 }
 0x2a1   :  { %v2651_v33 = vmax.f32 %v2459_v19, 0.0  ;;  %v2253_v34 = vmul.f32 %v4773_v26, %v1186_v31 }
 0x2a2   :  { %2845 = vst.msk [vmem:[%s5869_s4 + $0x328] sm:$0xff] %vm2745_vm0, %v2652_v0  ;;  %2843 = vst [vmem:[%s5869_s4 + $0x318] sm:$0xff] %v2650_v22  ;;  %v2463_v35 = vadd.f32 %v4775_v27, %v2254_v25  ;;  %v2461_v36 = vadd.f32 %v4777_v28, %v2252_v29 }
 0x2a3   :  { %2844 = vst [vmem:[%s5869_s4 + $0x320] sm:$0xff] %v2651_v33  ;;  %v2462_v37 = vadd.f32 %v4782_v32, %v2253_v34  ;;  %v1989_v38 = vpop.f32.mrb[70].mxu1  ;;  %v1190_v39 = vpop.f32.mrb[70].mxu0 }
 0x2a4   :  { %v2655_v40 = vmax.f32 %v2463_v35, 0.0  ;;  %v2653_v41 = vmax.f32 %v2461_v36, 0.0  ;;  %v2257_v42 = vmul.f32 %v4766_v23, %v1989_v38  ;;  %v2255_v43 = vmul.f32 %v4768_v24, %v1190_v39  ;;  %v1991_v44 = vpop.f32.mrb[71].mxu1  ;;  %v1192_v45 = vpop.f32.mrb[71].mxu0 }
 0x2a5   :  { %v2654_v46 = vmax.f32 %v2462_v37, 0.0  ;;  %v2256_v47 = vmul.f32 %v4773_v26, %v1192_v45 }
 0x2a6   :  { %2848 = vst.msk [vmem:[%s5869_s4 + $0x340] sm:$0xff] %vm2745_vm0, %v2655_v40  ;;  %2846 = vst [vmem:[%s5869_s4 + $0x330] sm:$0xff] %v2653_v41  ;;  %v2466_v48 = vadd.f32 %v4775_v27, %v2257_v42  ;;  %v2464_v49 = vadd.f32 %v4777_v28, %v2255_v43 }
 0x2a7   :  { %2847 = vst [vmem:[%s5869_s4 + $0x338] sm:$0xff] %v2654_v46  ;;  %v2465_v50 = vadd.f32 %v4782_v32, %v2256_v47  ;;  %v1994_v51 = vpop.f32.mrb[72].mxu1  ;;  %v1196_v52 = vpop.f32.mrb[72].mxu0 }
 0x2a8   :  { %v2658_v53 = vmax.f32 %v2466_v48, 0.0  ;;  %v2656_v54 = vmax.f32 %v2464_v49, 0.0  ;;  %v2260_v55 = vmul.f32 %v4766_v23, %v1994_v51  ;;  %v2258_v56 = vmul.f32 %v4768_v24, %v1196_v52  ;;  %v1996_v57 = vpop.f32.mrb[73].mxu1  ;;  %v1198_v58 = vpop.f32.mrb[73].mxu0 }
 0x2a9   :  { %v2657_v59 = vmax.f32 %v2465_v50, 0.0  ;;  %v2259_v60 = vmul.f32 %v4773_v26, %v1198_v58 }
 0x2aa   :  { %2851 = vst.msk [vmem:[%s5869_s4 + $0x358] sm:$0xff] %vm2745_vm0, %v2658_v53  ;;  %2849 = vst [vmem:[%s5869_s4 + $0x348] sm:$0xff] %v2656_v54  ;;  %v2469_v61 = vadd.f32 %v4775_v27, %v2260_v55  ;;  %v2467_v62 = vadd.f32 %v4777_v28, %v2258_v56 }
 0x2ab   :  { %2850 = vst [vmem:[%s5869_s4 + $0x350] sm:$0xff] %v2657_v59  ;;  %v2468_v63 = vadd.f32 %v4782_v32, %v2259_v60  ;;  %v1999_v1 = vpop.f32.mrb[74].mxu1  ;;  %v1202_v2 = vpop.f32.mrb[74].mxu0 }
 0x2ac   :  { %v2661_v3 = vmax.f32 %v2469_v61, 0.0  ;;  %v2659_v4 = vmax.f32 %v2467_v62, 0.0  ;;  %v2263_v5 = vmul.f32 %v4766_v23, %v1999_v1  ;;  %v2261_v6 = vmul.f32 %v4768_v24, %v1202_v2  ;;  %v2001_v7 = vpop.f32.mrb[75].mxu1  ;;  %v1204_v8 = vpop.f32.mrb[75].mxu0 }
 0x2ad   :  { %v2660_v9 = vmax.f32 %v2468_v63, 0.0  ;;  %v2262_v10 = vmul.f32 %v4773_v26, %v1204_v8 }
 0x2ae   :  { %2854 = vst.msk [vmem:[%s5869_s4 + $0x370] sm:$0xff] %vm2745_vm0, %v2661_v3  ;;  %2852 = vst [vmem:[%s5869_s4 + $0x360] sm:$0xff] %v2659_v4  ;;  %v2472_v11 = vadd.f32 %v4775_v27, %v2263_v5  ;;  %v2470_v12 = vadd.f32 %v4777_v28, %v2261_v6 }
 0x2af   :  { %2853 = vst [vmem:[%s5869_s4 + $0x368] sm:$0xff] %v2660_v9  ;;  %v2471_v13 = vadd.f32 %v4782_v32, %v2262_v10  ;;  %v2004_v14 = vpop.f32.mrb[76].mxu1  ;;  %v1208_v15 = vpop.f32.mrb[76].mxu0 }
 0x2b0   :  { %v2664_v16 = vmax.f32 %v2472_v11, 0.0  ;;  %v2662_v17 = vmax.f32 %v2470_v12, 0.0  ;;  %v2266_v18 = vmul.f32 %v4766_v23, %v2004_v14  ;;  %v2264_v19 = vmul.f32 %v4768_v24, %v1208_v15  ;;  %v2006_v20 = vpop.f32.mrb[77].mxu1  ;;  %v1210_v21 = vpop.f32.mrb[77].mxu0 }
 0x2b1   :  { %v2663_v0 = vmax.f32 %v2471_v13, 0.0  ;;  %v2265_v22 = vmul.f32 %v4773_v26, %v1210_v21 }
 0x2b2   :  { %2857 = vst.msk [vmem:[%s5869_s4 + $0x388] sm:$0xff] %vm2745_vm0, %v2664_v16  ;;  %2855 = vst [vmem:[%s5869_s4 + $0x378] sm:$0xff] %v2662_v17  ;;  %v2475_v25 = vadd.f32 %v4775_v27, %v2266_v18  ;;  %v2473_v29 = vadd.f32 %v4777_v28, %v2264_v19 }
 0x2b3   :  { %2856 = vst [vmem:[%s5869_s4 + $0x380] sm:$0xff] %v2663_v0  ;;  %v2474_v30 = vadd.f32 %v4782_v32, %v2265_v22  ;;  %v2009_v31 = vpop.f32.mrb[78].mxu1  ;;  %v1214_v33 = vpop.f32.mrb[78].mxu0 }
 0x2b4   :  { %v2667_v34 = vmax.f32 %v2475_v25, 0.0  ;;  %v2665_v35 = vmax.f32 %v2473_v29, 0.0  ;;  %v2269_v36 = vmul.f32 %v4766_v23, %v2009_v31  ;;  %v2267_v37 = vmul.f32 %v4768_v24, %v1214_v33  ;;  %v2011_v38 = vpop.f32.mrb[79].mxu1  ;;  %v1216_v39 = vpop.f32.mrb[79].mxu0 }
 0x2b5   :  { %v2666_v40 = vmax.f32 %v2474_v30, 0.0  ;;  %v2268_v41 = vmul.f32 %v4773_v26, %v1216_v39 }
 0x2b6   :  { %2860 = vst.msk [vmem:[%s5869_s4 + $0x3a0] sm:$0xff] %vm2745_vm0, %v2667_v34  ;;  %2858 = vst [vmem:[%s5869_s4 + $0x390] sm:$0xff] %v2665_v35  ;;  %v2478_v42 = vadd.f32 %v4775_v27, %v2269_v36  ;;  %v2476_v43 = vadd.f32 %v4777_v28, %v2267_v37 }
 0x2b7   :  { %2859 = vst [vmem:[%s5869_s4 + $0x398] sm:$0xff] %v2666_v40  ;;  %v2477_v44 = vadd.f32 %v4782_v32, %v2268_v41  ;;  %v2014_v45 = vpop.f32.mrb[80].mxu1  ;;  %v1220_v46 = vpop.f32.mrb[80].mxu0 }
 0x2b8   :  { %v2670_v47 = vmax.f32 %v2478_v42, 0.0  ;;  %v2668_v48 = vmax.f32 %v2476_v43, 0.0  ;;  %v2272_v49 = vmul.f32 %v4766_v23, %v2014_v45  ;;  %v2270_v50 = vmul.f32 %v4768_v24, %v1220_v46  ;;  %v2016_v51 = vpop.f32.mrb[81].mxu1  ;;  %v1222_v52 = vpop.f32.mrb[81].mxu0 }
 0x2b9   :  { %v2669_v53 = vmax.f32 %v2477_v44, 0.0  ;;  %v2271_v54 = vmul.f32 %v4773_v26, %v1222_v52 }
 0x2ba   :  { %2863 = vst.msk [vmem:[%s5869_s4 + $0x3b8] sm:$0xff] %vm2745_vm0, %v2670_v47  ;;  %2861 = vst [vmem:[%s5869_s4 + $0x3a8] sm:$0xff] %v2668_v48  ;;  %v2481_v55 = vadd.f32 %v4775_v27, %v2272_v49  ;;  %v2479_v56 = vadd.f32 %v4777_v28, %v2270_v50 }
 0x2bb   :  { %2862 = vst [vmem:[%s5869_s4 + $0x3b0] sm:$0xff] %v2669_v53  ;;  %v2480_v57 = vadd.f32 %v4782_v32, %v2271_v54  ;;  %v2019_v58 = vpop.f32.mrb[82].mxu1  ;;  %v1226_v59 = vpop.f32.mrb[82].mxu0 }
 0x2bc   :  { %v2673_v60 = vmax.f32 %v2481_v55, 0.0  ;;  %v2671_v61 = vmax.f32 %v2479_v56, 0.0  ;;  %v2275_v62 = vmul.f32 %v4766_v23, %v2019_v58  ;;  %v2273_v63 = vmul.f32 %v4768_v24, %v1226_v59  ;;  %v2021_v1 = vpop.f32.mrb[83].mxu1  ;;  %v1228_v2 = vpop.f32.mrb[83].mxu0 }
 0x2bd   :  { %v2672_v3 = vmax.f32 %v2480_v57, 0.0  ;;  %v2274_v4 = vmul.f32 %v4773_v26, %v1228_v2 }
 0x2be   :  { %2866 = vst.msk [vmem:[%s5869_s4 + $0x3d0] sm:$0xff] %vm2745_vm0, %v2673_v60  ;;  %2864 = vst [vmem:[%s5869_s4 + $0x3c0] sm:$0xff] %v2671_v61  ;;  %v2484_v5 = vadd.f32 %v4775_v27, %v2275_v62  ;;  %v2482_v6 = vadd.f32 %v4777_v28, %v2273_v63 }
 0x2bf   :  { %2865 = vst [vmem:[%s5869_s4 + $0x3c8] sm:$0xff] %v2672_v3  ;;  %v2483_v7 = vadd.f32 %v4782_v32, %v2274_v4  ;;  %v2024_v8 = vpop.f32.mrb[84].mxu1  ;;  %v1232_v9 = vpop.f32.mrb[84].mxu0 }
 0x2c0   :  { %v2676_v10 = vmax.f32 %v2484_v5, 0.0  ;;  %v2674_v11 = vmax.f32 %v2482_v6, 0.0  ;;  %v2278_v12 = vmul.f32 %v4766_v23, %v2024_v8  ;;  %v2276_v13 = vmul.f32 %v4768_v24, %v1232_v9  ;;  %v2026_v14 = vpop.f32.mrb[85].mxu1  ;;  %v1234_v15 = vpop.f32.mrb[85].mxu0 }
 0x2c1   :  { %v2675_v16 = vmax.f32 %v2483_v7, 0.0  ;;  %v2277_v17 = vmul.f32 %v4773_v26, %v1234_v15 }
 0x2c2   :  { %2869 = vst.msk [vmem:[%s5869_s4 + $0x3e8] sm:$0xff] %vm2745_vm0, %v2676_v10  ;;  %2867 = vst [vmem:[%s5869_s4 + $0x3d8] sm:$0xff] %v2674_v11  ;;  %v2487_v18 = vadd.f32 %v4775_v27, %v2278_v12  ;;  %v2485_v19 = vadd.f32 %v4777_v28, %v2276_v13 }
 0x2c3   :  { %2868 = vst [vmem:[%s5869_s4 + $0x3e0] sm:$0xff] %v2675_v16  ;;  %v2486_v20 = vadd.f32 %v4782_v32, %v2277_v17  ;;  %v2029_v21 = vpop.f32.mrb[86].mxu1  ;;  %v1238_v0 = vpop.f32.mrb[86].mxu0 }
 0x2c4   :  { %v2679_v22 = vmax.f32 %v2487_v18, 0.0  ;;  %v2677_v25 = vmax.f32 %v2485_v19, 0.0  ;;  %v2281_v29 = vmul.f32 %v4766_v23, %v2029_v21  ;;  %v2279_v30 = vmul.f32 %v4768_v24, %v1238_v0  ;;  %v2031_v31 = vpop.f32.mrb[87].mxu1  ;;  %v1240_v33 = vpop.f32.mrb[87].mxu0 }
 0x2c5   :  { %v2678_v34 = vmax.f32 %v2486_v20, 0.0  ;;  %v2280_v35 = vmul.f32 %v4773_v26, %v1240_v33 }
 0x2c6   :  { %2872 = vst.msk [vmem:[%s5869_s4 + $0x400] sm:$0xff] %vm2745_vm0, %v2679_v22  ;;  %2870 = vst [vmem:[%s5869_s4 + $0x3f0] sm:$0xff] %v2677_v25  ;;  %v2490_v36 = vadd.f32 %v4775_v27, %v2281_v29  ;;  %v2488_v37 = vadd.f32 %v4777_v28, %v2279_v30 }
 0x2c7   :  { %2871 = vst [vmem:[%s5869_s4 + $0x3f8] sm:$0xff] %v2678_v34  ;;  %v2489_v38 = vadd.f32 %v4782_v32, %v2280_v35  ;;  %v2034_v39 = vpop.f32.mrb[88].mxu1  ;;  %v1244_v40 = vpop.f32.mrb[88].mxu0 }
 0x2c8   :  { %v2682_v41 = vmax.f32 %v2490_v36, 0.0  ;;  %v2680_v42 = vmax.f32 %v2488_v37, 0.0  ;;  %v2284_v43 = vmul.f32 %v4766_v23, %v2034_v39  ;;  %v2282_v44 = vmul.f32 %v4768_v24, %v1244_v40  ;;  %v2036_v45 = vpop.f32.mrb[89].mxu1  ;;  %v1246_v46 = vpop.f32.mrb[89].mxu0 }
 0x2c9   :  { %v2681_v47 = vmax.f32 %v2489_v38, 0.0  ;;  %v2283_v48 = vmul.f32 %v4773_v26, %v1246_v46 }
 0x2ca   :  { %2875 = vst.msk [vmem:[%s5869_s4 + $0x418] sm:$0xff] %vm2745_vm0, %v2682_v41  ;;  %2873 = vst [vmem:[%s5869_s4 + $0x408] sm:$0xff] %v2680_v42  ;;  %v2493_v49 = vadd.f32 %v4775_v27, %v2284_v43  ;;  %v2491_v50 = vadd.f32 %v4777_v28, %v2282_v44 }
 0x2cb   :  { %2874 = vst [vmem:[%s5869_s4 + $0x410] sm:$0xff] %v2681_v47  ;;  %v2492_v51 = vadd.f32 %v4782_v32, %v2283_v48  ;;  %v2039_v52 = vpop.f32.mrb[90].mxu1  ;;  %v1250_v53 = vpop.f32.mrb[90].mxu0 }
 0x2cc   :  { %v2685_v54 = vmax.f32 %v2493_v49, 0.0  ;;  %v2683_v55 = vmax.f32 %v2491_v50, 0.0  ;;  %v2287_v56 = vmul.f32 %v4766_v23, %v2039_v52  ;;  %v2285_v57 = vmul.f32 %v4768_v24, %v1250_v53  ;;  %v2041_v58 = vpop.f32.mrb[91].mxu1  ;;  %v1252_v59 = vpop.f32.mrb[91].mxu0 }
 0x2cd   :  { %v2684_v60 = vmax.f32 %v2492_v51, 0.0  ;;  %v2286_v61 = vmul.f32 %v4773_v26, %v1252_v59 }
 0x2ce   :  { %2878 = vst.msk [vmem:[%s5869_s4 + $0x430] sm:$0xff] %vm2745_vm0, %v2685_v54  ;;  %2876 = vst [vmem:[%s5869_s4 + $0x420] sm:$0xff] %v2683_v55  ;;  %v2496_v62 = vadd.f32 %v4775_v27, %v2287_v56  ;;  %v2494_v63 = vadd.f32 %v4777_v28, %v2285_v57 }
 0x2cf   :  { %2877 = vst [vmem:[%s5869_s4 + $0x428] sm:$0xff] %v2684_v60  ;;  %v2495_v1 = vadd.f32 %v4782_v32, %v2286_v61  ;;  %v2044_v2 = vpop.f32.mrb[92].mxu1  ;;  %v1256_v3 = vpop.f32.mrb[92].mxu0 }
 0x2d0   :  { %v2688_v4 = vmax.f32 %v2496_v62, 0.0  ;;  %v2686_v5 = vmax.f32 %v2494_v63, 0.0  ;;  %v2290_v6 = vmul.f32 %v4766_v23, %v2044_v2  ;;  %v2288_v7 = vmul.f32 %v4768_v24, %v1256_v3  ;;  %v2046_v8 = vpop.f32.mrb[93].mxu1  ;;  %v1258_v9 = vpop.f32.mrb[93].mxu0 }
 0x2d1   :  { %v2687_v10 = vmax.f32 %v2495_v1, 0.0  ;;  %v2289_v11 = vmul.f32 %v4773_v26, %v1258_v9 }
 0x2d2   :  { %2881 = vst.msk [vmem:[%s5869_s4 + $0x448] sm:$0xff] %vm2745_vm0, %v2688_v4  ;;  %2879 = vst [vmem:[%s5869_s4 + $0x438] sm:$0xff] %v2686_v5  ;;  %v2499_v12 = vadd.f32 %v4775_v27, %v2290_v6  ;;  %v2497_v13 = vadd.f32 %v4777_v28, %v2288_v7 }
 0x2d3   :  { %2880 = vst [vmem:[%s5869_s4 + $0x440] sm:$0xff] %v2687_v10  ;;  %v2498_v14 = vadd.f32 %v4782_v32, %v2289_v11  ;;  %v2049_v15 = vpop.f32.mrb[94].mxu1  ;;  %v1262_v16 = vpop.f32.mrb[94].mxu0 }
 0x2d4   :  { %v2691_v17 = vmax.f32 %v2499_v12, 0.0  ;;  %v2689_v18 = vmax.f32 %v2497_v13, 0.0  ;;  %v2293_v19 = vmul.f32 %v4766_v23, %v2049_v15  ;;  %v2291_v20 = vmul.f32 %v4768_v24, %v1262_v16  ;;  %v2051_v21 = vpop.f32.mrb[95].mxu1  ;;  %v1264_v0 = vpop.f32.mrb[95].mxu0 }
 0x2d5   :  { %v2690_v22 = vmax.f32 %v2498_v14, 0.0  ;;  %v2292_v25 = vmul.f32 %v4773_v26, %v1264_v0 }
 0x2d6   :  { %2884 = vst.msk [vmem:[%s5869_s4 + $0x460] sm:$0xff] %vm2745_vm0, %v2691_v17  ;;  %2882 = vst [vmem:[%s5869_s4 + $0x450] sm:$0xff] %v2689_v18  ;;  %v2502_v29 = vadd.f32 %v4775_v27, %v2293_v19  ;;  %v2500_v30 = vadd.f32 %v4777_v28, %v2291_v20 }
 0x2d7   :  { %2883 = vst [vmem:[%s5869_s4 + $0x458] sm:$0xff] %v2690_v22  ;;  %v2501_v31 = vadd.f32 %v4782_v32, %v2292_v25  ;;  %v2054_v33 = vpop.f32.mrb[96].mxu1  ;;  %v1268_v34 = vpop.f32.mrb[96].mxu0 }
 0x2d8   :  { %v2694_v35 = vmax.f32 %v2502_v29, 0.0  ;;  %v2692_v36 = vmax.f32 %v2500_v30, 0.0  ;;  %v2296_v37 = vmul.f32 %v4766_v23, %v2054_v33  ;;  %v2294_v38 = vmul.f32 %v4768_v24, %v1268_v34  ;;  %v2056_v39 = vpop.f32.mrb[97].mxu1  ;;  %v1270_v40 = vpop.f32.mrb[97].mxu0 }
 0x2d9   :  { %v2693_v41 = vmax.f32 %v2501_v31, 0.0  ;;  %v2295_v42 = vmul.f32 %v4773_v26, %v1270_v40 }
 0x2da   :  { %2887 = vst.msk [vmem:[%s5869_s4 + $0x478] sm:$0xff] %vm2745_vm0, %v2694_v35  ;;  %2885 = vst [vmem:[%s5869_s4 + $0x468] sm:$0xff] %v2692_v36  ;;  %v2505_v43 = vadd.f32 %v4775_v27, %v2296_v37  ;;  %v2503_v44 = vadd.f32 %v4777_v28, %v2294_v38 }
 0x2db   :  { %2886 = vst [vmem:[%s5869_s4 + $0x470] sm:$0xff] %v2693_v41  ;;  %v2504_v45 = vadd.f32 %v4782_v32, %v2295_v42  ;;  %v2059_v46 = vpop.f32.mrb[98].mxu1  ;;  %v1274_v47 = vpop.f32.mrb[98].mxu0 }
 0x2dc   :  { %v2697_v48 = vmax.f32 %v2505_v43, 0.0  ;;  %v2695_v49 = vmax.f32 %v2503_v44, 0.0  ;;  %v2299_v50 = vmul.f32 %v4766_v23, %v2059_v46  ;;  %v2297_v51 = vmul.f32 %v4768_v24, %v1274_v47  ;;  %v2061_v52 = vpop.f32.mrb[99].mxu1  ;;  %v1276_v53 = vpop.f32.mrb[99].mxu0 }
 0x2dd   :  { %v2696_v54 = vmax.f32 %v2504_v45, 0.0  ;;  %v2298_v55 = vmul.f32 %v4773_v26, %v1276_v53 }
 0x2de   :  { %2890 = vst.msk [vmem:[%s5869_s4 + $0x490] sm:$0xff] %vm2745_vm0, %v2697_v48  ;;  %2888 = vst [vmem:[%s5869_s4 + $0x480] sm:$0xff] %v2695_v49  ;;  %v2508_v56 = vadd.f32 %v4775_v27, %v2299_v50  ;;  %v2506_v57 = vadd.f32 %v4777_v28, %v2297_v51 }
 0x2df   :  { %2889 = vst [vmem:[%s5869_s4 + $0x488] sm:$0xff] %v2696_v54  ;;  %v2507_v58 = vadd.f32 %v4782_v32, %v2298_v55  ;;  %v2064_v59 = vpop.f32.mrb[100].mxu1  ;;  %v1280_v60 = vpop.f32.mrb[100].mxu0 }
 0x2e0   :  { %v2700_v61 = vmax.f32 %v2508_v56, 0.0  ;;  %v2698_v62 = vmax.f32 %v2506_v57, 0.0  ;;  %v2302_v63 = vmul.f32 %v4766_v23, %v2064_v59  ;;  %v2300_v1 = vmul.f32 %v4768_v24, %v1280_v60  ;;  %v2066_v2 = vpop.f32.mrb[101].mxu1  ;;  %v1282_v3 = vpop.f32.mrb[101].mxu0 }
 0x2e1   :  { %v2699_v4 = vmax.f32 %v2507_v58, 0.0  ;;  %v2301_v5 = vmul.f32 %v4773_v26, %v1282_v3 }
 0x2e2   :  { %2893 = vst.msk [vmem:[%s5869_s4 + $0x4a8] sm:$0xff] %vm2745_vm0, %v2700_v61  ;;  %2891 = vst [vmem:[%s5869_s4 + $0x498] sm:$0xff] %v2698_v62  ;;  %v2511_v6 = vadd.f32 %v4775_v27, %v2302_v63  ;;  %v2509_v7 = vadd.f32 %v4777_v28, %v2300_v1 }
 0x2e3   :  { %2892 = vst [vmem:[%s5869_s4 + $0x4a0] sm:$0xff] %v2699_v4  ;;  %v2510_v8 = vadd.f32 %v4782_v32, %v2301_v5  ;;  %v2069_v9 = vpop.f32.mrb[102].mxu1  ;;  %v1286_v10 = vpop.f32.mrb[102].mxu0 }
 0x2e4   :  { %v2703_v11 = vmax.f32 %v2511_v6, 0.0  ;;  %v2701_v12 = vmax.f32 %v2509_v7, 0.0  ;;  %v2305_v13 = vmul.f32 %v4766_v23, %v2069_v9  ;;  %v2303_v14 = vmul.f32 %v4768_v24, %v1286_v10  ;;  %v2071_v15 = vpop.f32.mrb[103].mxu1  ;;  %v1288_v16 = vpop.f32.mrb[103].mxu0 }
 0x2e5   :  { %v2702_v17 = vmax.f32 %v2510_v8, 0.0  ;;  %v2304_v18 = vmul.f32 %v4773_v26, %v1288_v16 }
 0x2e6   :  { %2896 = vst.msk [vmem:[%s5869_s4 + $0x4c0] sm:$0xff] %vm2745_vm0, %v2703_v11  ;;  %2894 = vst [vmem:[%s5869_s4 + $0x4b0] sm:$0xff] %v2701_v12  ;;  %v2514_v19 = vadd.f32 %v4775_v27, %v2305_v13  ;;  %v2512_v20 = vadd.f32 %v4777_v28, %v2303_v14 }
 0x2e7   :  { %2895 = vst [vmem:[%s5869_s4 + $0x4b8] sm:$0xff] %v2702_v17  ;;  %v2513_v21 = vadd.f32 %v4782_v32, %v2304_v18  ;;  %v2074_v0 = vpop.f32.mrb[104].mxu1  ;;  %v1292_v22 = vpop.f32.mrb[104].mxu0 }
 0x2e8   :  { %v2706_v25 = vmax.f32 %v2514_v19, 0.0  ;;  %v2704_v29 = vmax.f32 %v2512_v20, 0.0  ;;  %v2308_v30 = vmul.f32 %v4766_v23, %v2074_v0  ;;  %v2306_v31 = vmul.f32 %v4768_v24, %v1292_v22  ;;  %v2076_v33 = vpop.f32.mrb[105].mxu1  ;;  %v1294_v34 = vpop.f32.mrb[105].mxu0 }
 0x2e9   :  { %v2705_v35 = vmax.f32 %v2513_v21, 0.0  ;;  %v2307_v36 = vmul.f32 %v4773_v26, %v1294_v34 }
 0x2ea   :  { %2899 = vst.msk [vmem:[%s5869_s4 + $0x4d8] sm:$0xff] %vm2745_vm0, %v2706_v25  ;;  %2897 = vst [vmem:[%s5869_s4 + $0x4c8] sm:$0xff] %v2704_v29  ;;  %v2517_v37 = vadd.f32 %v4775_v27, %v2308_v30  ;;  %v2515_v38 = vadd.f32 %v4777_v28, %v2306_v31 }
 0x2eb   :  { %2898 = vst [vmem:[%s5869_s4 + $0x4d0] sm:$0xff] %v2705_v35  ;;  %v2516_v39 = vadd.f32 %v4782_v32, %v2307_v36  ;;  %v2079_v40 = vpop.f32.mrb[106].mxu1  ;;  %v1298_v41 = vpop.f32.mrb[106].mxu0 }
 0x2ec   :  { %v2709_v42 = vmax.f32 %v2517_v37, 0.0  ;;  %v2707_v43 = vmax.f32 %v2515_v38, 0.0  ;;  %v2311_v44 = vmul.f32 %v4766_v23, %v2079_v40  ;;  %v2309_v45 = vmul.f32 %v4768_v24, %v1298_v41  ;;  %v2081_v46 = vpop.f32.mrb[107].mxu1  ;;  %v1300_v47 = vpop.f32.mrb[107].mxu0 }
 0x2ed   :  { %v2708_v48 = vmax.f32 %v2516_v39, 0.0  ;;  %v2310_v49 = vmul.f32 %v4773_v26, %v1300_v47 }
 0x2ee   :  { %2902 = vst.msk [vmem:[%s5869_s4 + $0x4f0] sm:$0xff] %vm2745_vm0, %v2709_v42  ;;  %2900 = vst [vmem:[%s5869_s4 + $0x4e0] sm:$0xff] %v2707_v43  ;;  %v2520_v50 = vadd.f32 %v4775_v27, %v2311_v44  ;;  %v2518_v51 = vadd.f32 %v4777_v28, %v2309_v45 }
 0x2ef   :  { %2901 = vst [vmem:[%s5869_s4 + $0x4e8] sm:$0xff] %v2708_v48  ;;  %v2519_v52 = vadd.f32 %v4782_v32, %v2310_v49  ;;  %v2084_v53 = vpop.f32.mrb[108].mxu1  ;;  %v1304_v54 = vpop.f32.mrb[108].mxu0 }
 0x2f0   :  { %v2712_v55 = vmax.f32 %v2520_v50, 0.0  ;;  %v2710_v56 = vmax.f32 %v2518_v51, 0.0  ;;  %v2314_v57 = vmul.f32 %v4766_v23, %v2084_v53  ;;  %v2312_v58 = vmul.f32 %v4768_v24, %v1304_v54  ;;  %v2086_v59 = vpop.f32.mrb[109].mxu1  ;;  %v1306_v60 = vpop.f32.mrb[109].mxu0 }
 0x2f1   :  { %v2711_v61 = vmax.f32 %v2519_v52, 0.0  ;;  %v2313_v62 = vmul.f32 %v4773_v26, %v1306_v60 }
 0x2f2   :  { %2905 = vst.msk [vmem:[%s5869_s4 + $0x508] sm:$0xff] %vm2745_vm0, %v2712_v55  ;;  %2903 = vst [vmem:[%s5869_s4 + $0x4f8] sm:$0xff] %v2710_v56  ;;  %v2523_v63 = vadd.f32 %v4775_v27, %v2314_v57  ;;  %v2521_v1 = vadd.f32 %v4777_v28, %v2312_v58 }
 0x2f3   :  { %2904 = vst [vmem:[%s5869_s4 + $0x500] sm:$0xff] %v2711_v61  ;;  %v2522_v2 = vadd.f32 %v4782_v32, %v2313_v62  ;;  %v2089_v3 = vpop.f32.mrb[110].mxu1  ;;  %v1310_v4 = vpop.f32.mrb[110].mxu0 }
 0x2f4   :  { %v2715_v5 = vmax.f32 %v2523_v63, 0.0  ;;  %v2713_v6 = vmax.f32 %v2521_v1, 0.0  ;;  %v2317_v7 = vmul.f32 %v4766_v23, %v2089_v3  ;;  %v2315_v8 = vmul.f32 %v4768_v24, %v1310_v4  ;;  %v2091_v9 = vpop.f32.mrb[111].mxu1  ;;  %v1312_v10 = vpop.f32.mrb[111].mxu0 }
 0x2f5   :  { %v2714_v11 = vmax.f32 %v2522_v2, 0.0  ;;  %v2316_v12 = vmul.f32 %v4773_v26, %v1312_v10 }
 0x2f6   :  { %2908 = vst.msk [vmem:[%s5869_s4 + $0x520] sm:$0xff] %vm2745_vm0, %v2715_v5  ;;  %2906 = vst [vmem:[%s5869_s4 + $0x510] sm:$0xff] %v2713_v6  ;;  %v2526_v13 = vadd.f32 %v4775_v27, %v2317_v7  ;;  %v2524_v14 = vadd.f32 %v4777_v28, %v2315_v8 }
 0x2f7   :  { %2907 = vst [vmem:[%s5869_s4 + $0x518] sm:$0xff] %v2714_v11  ;;  %v2525_v15 = vadd.f32 %v4782_v32, %v2316_v12  ;;  %v2094_v16 = vpop.f32.mrb[112].mxu1  ;;  %v1316_v17 = vpop.f32.mrb[112].mxu0 }
 0x2f8   :  { %v2718_v18 = vmax.f32 %v2526_v13, 0.0  ;;  %v2716_v19 = vmax.f32 %v2524_v14, 0.0  ;;  %v2320_v20 = vmul.f32 %v4766_v23, %v2094_v16  ;;  %v2318_v21 = vmul.f32 %v4768_v24, %v1316_v17  ;;  %v2096_v0 = vpop.f32.mrb[113].mxu1  ;;  %v1318_v22 = vpop.f32.mrb[113].mxu0 }
 0x2f9   :  { %v2717_v25 = vmax.f32 %v2525_v15, 0.0  ;;  %v2319_v29 = vmul.f32 %v4773_v26, %v1318_v22 }
 0x2fa   :  { %2911 = vst.msk [vmem:[%s5869_s4 + $0x538] sm:$0xff] %vm2745_vm0, %v2718_v18  ;;  %2909 = vst [vmem:[%s5869_s4 + $0x528] sm:$0xff] %v2716_v19  ;;  %v2529_v30 = vadd.f32 %v4775_v27, %v2320_v20  ;;  %v2527_v31 = vadd.f32 %v4777_v28, %v2318_v21 }
 0x2fb   :  { %2910 = vst [vmem:[%s5869_s4 + $0x530] sm:$0xff] %v2717_v25  ;;  %v2528_v33 = vadd.f32 %v4782_v32, %v2319_v29  ;;  %v2099_v34 = vpop.f32.mrb[114].mxu1  ;;  %v1322_v35 = vpop.f32.mrb[114].mxu0 }
 0x2fc   :  { %v2721_v36 = vmax.f32 %v2529_v30, 0.0  ;;  %v2719_v37 = vmax.f32 %v2527_v31, 0.0  ;;  %v2323_v38 = vmul.f32 %v4766_v23, %v2099_v34  ;;  %v2321_v39 = vmul.f32 %v4768_v24, %v1322_v35  ;;  %v2101_v40 = vpop.f32.mrb[115].mxu1  ;;  %v1324_v41 = vpop.f32.mrb[115].mxu0 }
 0x2fd   :  { %v2720_v42 = vmax.f32 %v2528_v33, 0.0  ;;  %v2322_v43 = vmul.f32 %v4773_v26, %v1324_v41 }
 0x2fe   :  { %2914 = vst.msk [vmem:[%s5869_s4 + $0x550] sm:$0xff] %vm2745_vm0, %v2721_v36  ;;  %2912 = vst [vmem:[%s5869_s4 + $0x540] sm:$0xff] %v2719_v37  ;;  %v2532_v44 = vadd.f32 %v4775_v27, %v2323_v38  ;;  %v2530_v45 = vadd.f32 %v4777_v28, %v2321_v39 }
 0x2ff   :  { %2913 = vst [vmem:[%s5869_s4 + $0x548] sm:$0xff] %v2720_v42  ;;  %v2531_v46 = vadd.f32 %v4782_v32, %v2322_v43  ;;  %v2104_v47 = vpop.f32.mrb[116].mxu1  ;;  %v1328_v48 = vpop.f32.mrb[116].mxu0 }
 0x300   :  { %v2724_v49 = vmax.f32 %v2532_v44, 0.0  ;;  %v2722_v50 = vmax.f32 %v2530_v45, 0.0  ;;  %v2326_v51 = vmul.f32 %v4766_v23, %v2104_v47  ;;  %v2324_v52 = vmul.f32 %v4768_v24, %v1328_v48  ;;  %v2106_v53 = vpop.f32.mrb[117].mxu1  ;;  %v1330_v54 = vpop.f32.mrb[117].mxu0 }
 0x301   :  { %v2723_v55 = vmax.f32 %v2531_v46, 0.0  ;;  %v2325_v56 = vmul.f32 %v4773_v26, %v1330_v54 }
 0x302   :  { %2917 = vst.msk [vmem:[%s5869_s4 + $0x568] sm:$0xff] %vm2745_vm0, %v2724_v49  ;;  %2915 = vst [vmem:[%s5869_s4 + $0x558] sm:$0xff] %v2722_v50  ;;  %v2535_v57 = vadd.f32 %v4775_v27, %v2326_v51  ;;  %v2533_v58 = vadd.f32 %v4777_v28, %v2324_v52 }
 0x303   :  { %2916 = vst [vmem:[%s5869_s4 + $0x560] sm:$0xff] %v2723_v55  ;;  %v2534_v59 = vadd.f32 %v4782_v32, %v2325_v56  ;;  %v2109_v60 = vpop.f32.mrb[118].mxu1  ;;  %v1334_v61 = vpop.f32.mrb[118].mxu0 }
 0x304   :  { %v2727_v62 = vmax.f32 %v2535_v57, 0.0  ;;  %v2725_v63 = vmax.f32 %v2533_v58, 0.0  ;;  %v2329_v1 = vmul.f32 %v4766_v23, %v2109_v60  ;;  %v2327_v2 = vmul.f32 %v4768_v24, %v1334_v61  ;;  %v2111_v3 = vpop.f32.mrb[119].mxu1  ;;  %v1336_v4 = vpop.f32.mrb[119].mxu0 }
 0x305   :  { %v2726_v5 = vmax.f32 %v2534_v59, 0.0  ;;  %v2328_v6 = vmul.f32 %v4773_v26, %v1336_v4 }
 0x306   :  { %2920 = vst.msk [vmem:[%s5869_s4 + $0x580] sm:$0xff] %vm2745_vm0, %v2727_v62  ;;  %2918 = vst [vmem:[%s5869_s4 + $0x570] sm:$0xff] %v2725_v63  ;;  %v2538_v7 = vadd.f32 %v4775_v27, %v2329_v1  ;;  %v2536_v8 = vadd.f32 %v4777_v28, %v2327_v2 }
 0x307   :  { %2919 = vst [vmem:[%s5869_s4 + $0x578] sm:$0xff] %v2726_v5  ;;  %v2537_v9 = vadd.f32 %v4782_v32, %v2328_v6  ;;  %v2114_v10 = vpop.f32.mrb[120].mxu1  ;;  %v1340_v11 = vpop.f32.mrb[120].mxu0 }
 0x308   :  { %v2730_v12 = vmax.f32 %v2538_v7, 0.0  ;;  %v2728_v13 = vmax.f32 %v2536_v8, 0.0  ;;  %v2332_v14 = vmul.f32 %v4766_v23, %v2114_v10  ;;  %v2330_v15 = vmul.f32 %v4768_v24, %v1340_v11  ;;  %v2116_v16 = vpop.f32.mrb[121].mxu1  ;;  %v1342_v17 = vpop.f32.mrb[121].mxu0 }
 0x309   :  { %v2729_v18 = vmax.f32 %v2537_v9, 0.0  ;;  %v2331_v19 = vmul.f32 %v4773_v26, %v1342_v17 }
 0x30a   :  { %2923 = vst.msk [vmem:[%s5869_s4 + $0x598] sm:$0xff] %vm2745_vm0, %v2730_v12  ;;  %2921 = vst [vmem:[%s5869_s4 + $0x588] sm:$0xff] %v2728_v13  ;;  %v2541_v20 = vadd.f32 %v4775_v27, %v2332_v14  ;;  %v2539_v21 = vadd.f32 %v4777_v28, %v2330_v15 }
 0x30b   :  { %2922 = vst [vmem:[%s5869_s4 + $0x590] sm:$0xff] %v2729_v18  ;;  %v2540_v0 = vadd.f32 %v4782_v32, %v2331_v19  ;;  %v2119_v22 = vpop.f32.mrb[122].mxu1  ;;  %v1346_v25 = vpop.f32.mrb[122].mxu0 }
 0x30c   :  { %v2733_v29 = vmax.f32 %v2541_v20, 0.0  ;;  %v2731_v30 = vmax.f32 %v2539_v21, 0.0  ;;  %v2335_v31 = vmul.f32 %v4766_v23, %v2119_v22  ;;  %v2333_v33 = vmul.f32 %v4768_v24, %v1346_v25  ;;  %v2121_v34 = vpop.f32.mrb[123].mxu1  ;;  %v1348_v35 = vpop.f32.mrb[123].mxu0 }
 0x30d   :  { %v2732_v36 = vmax.f32 %v2540_v0, 0.0  ;;  %v2334_v37 = vmul.f32 %v4773_v26, %v1348_v35 }
 0x30e   :  { %2926 = vst.msk [vmem:[%s5869_s4 + $0x5b0] sm:$0xff] %vm2745_vm0, %v2733_v29  ;;  %2924 = vst [vmem:[%s5869_s4 + $0x5a0] sm:$0xff] %v2731_v30  ;;  %v2544_v38 = vadd.f32 %v4775_v27, %v2335_v31  ;;  %v2542_v39 = vadd.f32 %v4777_v28, %v2333_v33 }
 0x30f   :  { %2925 = vst [vmem:[%s5869_s4 + $0x5a8] sm:$0xff] %v2732_v36  ;;  %v2543_v40 = vadd.f32 %v4782_v32, %v2334_v37  ;;  %v2124_v41 = vpop.f32.mrb[124].mxu1  ;;  %v1352_v42 = vpop.f32.mrb[124].mxu0 }
 0x310   :  { %v2736_v43 = vmax.f32 %v2544_v38, 0.0  ;;  %v2734_v44 = vmax.f32 %v2542_v39, 0.0  ;;  %v2338_v45 = vmul.f32 %v4766_v23, %v2124_v41  ;;  %v2336_v46 = vmul.f32 %v4768_v24, %v1352_v42  ;;  %v2126_v47 = vpop.f32.mrb[125].mxu1  ;;  %v1354_v48 = vpop.f32.mrb[125].mxu0 }
 0x311   :  { %v2735_v49 = vmax.f32 %v2543_v40, 0.0  ;;  %v2337_v50 = vmul.f32 %v4773_v26, %v1354_v48 }
 0x312   :  { %2929 = vst.msk [vmem:[%s5869_s4 + $0x5c8] sm:$0xff] %vm2745_vm0, %v2736_v43  ;;  %2927 = vst [vmem:[%s5869_s4 + $0x5b8] sm:$0xff] %v2734_v44  ;;  %v2547_v51 = vadd.f32 %v4775_v27, %v2338_v45  ;;  %v2545_v52 = vadd.f32 %v4777_v28, %v2336_v46 }
 0x313   :  { %2928 = vst [vmem:[%s5869_s4 + $0x5c0] sm:$0xff] %v2735_v49  ;;  %v2546_v53 = vadd.f32 %v4782_v32, %v2337_v50  ;;  %v2129_v54 = vpop.f32.mrb[126].mxu1  ;;  %v1358_v55 = vpop.f32.mrb[126].mxu0 }
 0x314   :  { %v2739_v56 = vmax.f32 %v2547_v51, 0.0  ;;  %v2737_v57 = vmax.f32 %v2545_v52, 0.0  ;;  %v2341_v58 = vmul.f32 %v4766_v23, %v2129_v54  ;;  %v2339_v59 = vmul.f32 %v4768_v24, %v1358_v55  ;;  %v2131_v60 = vpop.f32.mrb[127].mxu1  ;;  %v1360_v61 = vpop.f32.mrb[127].mxu0 }
 0x315   :  { %v2738_v62 = vmax.f32 %v2546_v53, 0.0  ;;  %v2340_v63 = vmul.f32 %v4773_v26, %v1360_v61 }
 0x316   :  { %2932 = vst.msk [vmem:[%s5869_s4 + $0x5e0] sm:$0xff] %vm2745_vm0, %v2739_v56  ;;  %2930 = vst [vmem:[%s5869_s4 + $0x5d0] sm:$0xff] %v2737_v57  ;;  %v2550_v1 = vadd.f32 %v4775_v27, %v2341_v58  ;;  %v2548_v23 = vadd.f32 %v4777_v28, %v2339_v59 }
 0x317   :  { %2931 = vst [vmem:[%s5869_s4 + $0x5d8] sm:$0xff] %v2738_v62  ;;  %v2549_v24 = vadd.f32 %v4782_v32, %v2340_v63 }
 0x318   :  { %v2742_v26 = vmax.f32 %v2550_v1, 0.0  ;;  %v2740_v2 = vmax.f32 %v2548_v23, 0.0 }
 0x319   :  { %v2741_v3 = vmax.f32 %v2549_v24, 0.0 }
 0x31a   :  { %2935 = vst.msk [vmem:[%s5869_s4 + $0x5f8] sm:$0xff] %vm2745_vm0, %v2742_v26  ;;  %2933 = vst [vmem:[%s5869_s4 + $0x5e8] sm:$0xff] %v2740_v2 }
 0x31b   :  { %2934 = vst [vmem:[%s5869_s4 + $0x5f0] sm:$0xff] %v2741_v3 }

</bundles_post_ra>
